<compile_context>
chip_gen: v6e
topology: v6e:2x2x1
jax: 0.10.0
libtpu: 0.0.40
codegen_flags: <defaults>
</compile_context>

<pallas_src>
import math

import jax
import jax.numpy as jnp
from jax import lax
from jax.experimental import pallas as pl
from jax.experimental.pallas import tpu as pltpu

COCO_IDX = jnp.array(
    [1, 2, 3, 4, 5, 6, 7, 8, 9, 10, 11, 13, 14, 15, 16, 17, 18, 19, 20, 21,
     22, 23, 24, 25, 27, 28, 31, 32, 33, 34, 35, 36, 37, 38, 39, 40, 41, 42,
     43, 44, 46, 47, 48, 49, 50, 51, 52, 53, 54, 55, 56, 57, 58, 59, 60, 61,
     62, 63, 64, 65, 67, 70, 72, 73, 74, 75, 76, 77, 78, 79, 80, 81, 82, 84,
     85, 86, 87, 88, 89, 90, 91], dtype=jnp.int32)


# ----------------------------- Pallas kernel -------------------------------

def _ssd_fused_kernel(imgt_ref, ct_ref, w1_ref, b1_ref, wl4_ref, bl4_ref,
                      wc4_ref, bc4_ref, db4_ref,
                      boxes_ref, scores_ref, labels_ref):
    """Whole SSD pipeline for one image in a single grid step.

    imgt : (H*W, C)        flattened+transposed raw image (values in [0,1])
    ct   : (M, H*W)        fused normalize+resize+avg-pool matrix, M = fk*fk
    w1   : (C, hid), b1: (1, hid)   pointwise-conv backbone layer (offset folded)
    wl4  : (4, hid, A), bl4: (4, 1, A)   loc head, coordinate-major planes
    wc4  : (A, hid, NC), bc4: (A, 1, NC) conf head, per-anchor planes
    db4  : (4, M, A)       default boxes (cx, cy, w, h) planes
    boxes: (4, M, A)       decoded (l, t, r, b) planes
    scores/labels: (A, M, 1)  best foreground prob / class (1..NC-1) per box
    """
    # (1) normalize + resize + pool + backbone layer:  h = relu(Ct @ (x @ w1) + b1)
    # z-first association keeps every matmul lane-dense-ish and avoids N<8 dots.
    z = jnp.dot(imgt_ref[...], w1_ref[...], preferred_element_type=jnp.float32)   # (P, hid)
    h = jnp.dot(ct_ref[...], z, preferred_element_type=jnp.float32) + b1_ref[...]  # (M, hid)
    h = jnp.maximum(h, 0.0)

    # (2) loc head (coordinate-major weight planes) + SSD decode
    lx = jnp.dot(h, wl4_ref[0], preferred_element_type=jnp.float32) + bl4_ref[0]
    ly = jnp.dot(h, wl4_ref[1], preferred_element_type=jnp.float32) + bl4_ref[1]
    lw = jnp.dot(h, wl4_ref[2], preferred_element_type=jnp.float32) + bl4_ref[2]
    lh = jnp.dot(h, wl4_ref[3], preferred_element_type=jnp.float32) + bl4_ref[3]
    dx = db4_ref[0]
    dy = db4_ref[1]
    dw = db4_ref[2]
    dh = db4_ref[3]
    cx = lx * 0.1 * dw + dx
    cy = ly * 0.1 * dh + dy
    bw = jnp.exp(lw * 0.2) * dw
    bh = jnp.exp(lh * 0.2) * dh
    boxes_ref[0] = cx - 0.5 * bw
    boxes_ref[1] = cy - 0.5 * bh
    boxes_ref[2] = cx + 0.5 * bw
    boxes_ref[3] = cy + 0.5 * bh

    # (3) conf head + softmax + best non-background class, per anchor (static unroll)
    n_anchors, _, n_classes = wc4_ref.shape
    m = h.shape[0]
    cls_iota = lax.broadcasted_iota(jnp.int32, (m, n_classes), 1)
    for a in range(n_anchors):
        logits = jnp.dot(h, wc4_ref[a], preferred_element_type=jnp.float32) + bc4_ref[a]
        mx = jnp.max(logits, axis=-1, keepdims=True)
        e = jnp.exp(logits - mx)
        probs = e / jnp.sum(e, axis=-1, keepdims=True)
        fg = jnp.where(cls_iota >= 1, probs, -1.0)              # mask background cls 0
        best = jnp.max(fg, axis=-1, keepdims=True)              # (M, 1)
        lbl = jnp.min(jnp.where(fg >= best, cls_iota, n_classes + 1),
                      axis=-1, keepdims=True)                   # first argmax, in 1..NC-1
        scores_ref[a] = best
        labels_ref[a] = lbl


def _full_spec(shape):
    return pl.BlockSpec(tuple(shape), lambda i, n=len(shape): (0,) * n)


def ssd_fused(imgT, consts):
    ct, w1, b1 = consts['ct'], consts['w1'], consts['b1_eff']
    wl4, bl4 = consts['wl4'], consts['bl4']
    wc4, bc4 = consts['wc4'], consts['bc4']
    db4 = consts['db4']
    M = ct.shape[0]
    A = wl4.shape[2]
    return pl.pallas_call(
        _ssd_fused_kernel,
        out_shape=(jax.ShapeDtypeStruct((4, M, A), jnp.float32),
                   jax.ShapeDtypeStruct((A, M, 1), jnp.float32),
                   jax.ShapeDtypeStruct((A, M, 1), jnp.int32)),
        grid=(1,),
        in_specs=[_full_spec(imgT.shape), _full_spec(ct.shape),
                  _full_spec(w1.shape), _full_spec(b1.shape),
                  _full_spec(wl4.shape), _full_spec(bl4.shape),
                  _full_spec(wc4.shape), _full_spec(bc4.shape),
                  _full_spec(db4.shape)],
        out_specs=(_full_spec((4, M, A)), _full_spec((A, M, 1)),
                   _full_spec((A, M, 1))),
        compiler_params=pltpu.CompilerParams(dimension_semantics=("arbitrary",)),
    )(imgT, ct, w1, b1, wl4, bl4, wc4, bc4, db4)


# -------------------------- constant construction ---------------------------

def _interp_matrix(n_out, n_in):
    """Row-stochastic bilinear (align_corners=True) interpolation matrix."""
    src = jnp.arange(n_out, dtype=jnp.float32) * (float(n_in - 1) /
                                                  float(max(n_out - 1, 1)))
    i0 = jnp.clip(jnp.floor(src).astype(jnp.int32), 0, n_in - 1)
    i1 = jnp.clip(i0 + 1, 0, n_in - 1)
    w1 = src - i0.astype(jnp.float32)
    w0 = 1.0 - w1
    oh0 = jax.nn.one_hot(i0, n_in, dtype=jnp.float32)
    oh1 = jax.nn.one_hot(i1, n_in, dtype=jnp.float32)
    return w0[:, None] * oh0 + w1[:, None] * oh1


def _avgpool_matrix(n_out, n_in):
    # assumes n_in % n_out == 0 (true for 300 -> 10)
    k = n_in // n_out
    return jnp.repeat(jnp.eye(n_out, dtype=jnp.float32), k, axis=1) / float(k)


def make_default_boxes(fk=10):
    s = 2.0 ** 0.5
    anchors_wh = jnp.array([[0.1, 0.1], [0.2, 0.2],
                            [0.1 * s, 0.1 / s], [0.1 / s, 0.1 * s]],
                           dtype=jnp.float32)
    ys, xs = jnp.meshgrid(jnp.arange(fk, dtype=jnp.float32),
                          jnp.arange(fk, dtype=jnp.float32), indexing='ij')
    cx = (xs.reshape(-1) + 0.5) / fk
    cy = (ys.reshape(-1) + 0.5) / fk
    n_cells = fk * fk
    a = anchors_wh.shape[0]
    cxg = jnp.broadcast_to(cx[:, None], (n_cells, a))
    cyg = jnp.broadcast_to(cy[:, None], (n_cells, a))
    wg = jnp.broadcast_to(anchors_wh[None, :, 0], (n_cells, a))
    hg = jnp.broadcast_to(anchors_wh[None, :, 1], (n_cells, a))
    return jnp.stack([cxg, cyg, wg, hg], axis=-1).reshape(n_cells * a, 4)  # (nb, 4) xywh


def init_params(key, cin=3, hidden=32, anchors=4, num_classes=81):
    k1, k2, k3 = jax.random.split(key, 3)
    w1 = jax.random.normal(k1, (cin, hidden), jnp.float32) * 0.1
    b1 = jnp.zeros((1, hidden), jnp.float32)
    wl = jax.random.normal(k2, (hidden, 4 * anchors), jnp.float32) * 0.1
    bl = jnp.zeros((1, 4 * anchors), jnp.float32)
    wc = jax.random.normal(k3, (hidden, num_classes * anchors), jnp.float32) * 0.1
    bc = jnp.zeros((1, num_classes * anchors), jnp.float32)
    return (w1, b1, wl, bl, wc, bc)


def make_constants(params, img_hw, fk=10, anchors=4, num_classes=81, out_size=300):
    """Pre-fold everything that only depends on static shapes / weights."""
    h_in, w_in = img_hw
    scale = float(out_size) / float(min(h_in, w_in))
    h_out = int(math.floor(h_in * scale))
    w_out = int(math.floor(w_in * scale))

    ry = _interp_matrix(h_out, h_in)              # (h_out, h_in)
    rx = _interp_matrix(w_out, w_in)              # (w_out, w_in)
    py = _avgpool_matrix(fk, h_out)               # (fk, h_out)
    px = _avgpool_matrix(fk, w_out)               # (fk, w_out)
    a0 = py @ ry                                  # (fk, h_in)   rows sum to 1
    b0 = rx.T @ px.T                              # (w_in, fk)   cols sum to 1
    # Kronecker "resize+pool" matrix with the 255/128 normalization scale folded
    # in.  NOTE: sized (fk^2, h_in*w_in) -- fine for the small test images here.
    ct = (255.0 / 128.0) * jnp.einsum('fy,xg->fgyx', a0, b0).reshape(fk * fk,
                                                                     h_in * w_in)

    w1, b1, wl, bl, wc, bc = params
    hid = w1.shape[1]
    # fold the "-1" offset of (x*255-128)/128 into the first-layer bias
    b1_eff = b1 - jnp.sum(w1, axis=0, keepdims=True)

    # loc head -> coordinate-major planes: wl4[coord][:, a] == wl[:, a*4 + coord]
    wl4 = wl.reshape(hid, anchors, 4).transpose(2, 0, 1)              # (4, hid, A)
    bl4 = bl.reshape(1, anchors, 4).transpose(2, 0, 1)                # (4, 1, A)
    # conf head -> per-anchor planes
    wc4 = wc.reshape(hid, anchors, num_classes).transpose(1, 0, 2)    # (A, hid, NC)
    bc4 = bc.reshape(1, anchors, num_classes).transpose(1, 0, 2)      # (A, 1, NC)

    db = make_default_boxes(fk)                                        # (nb, 4)
    db4 = db.reshape(fk * fk, anchors, 4).transpose(2, 0, 1)           # (4, M, A)

    return dict(scale=scale, fk=fk, anchors=anchors, num_classes=num_classes,
                ct=ct, w1=w1, b1_eff=b1_eff, wl4=wl4, bl4=bl4,
                wc4=wc4, bc4=bc4, db4=db4)


# ------------------------------- forward ------------------------------------

def wrapper_forward(inputs, consts, top_k=10, score_thresh=0.2):
    img = inputs[0]                                   # (C, H, W) float32 in [0, 1]
    c, h, w = img.shape
    scale = consts['scale']
    fk, anchors = consts['fk'], consts['anchors']
    nb = fk * fk * anchors

    imgT = jnp.transpose(img.reshape(c, h * w), (1, 0))          # (H*W, C), tiny

    boxes4, scores4, labels4 = ssd_fused(imgT, consts)
    # boxes4: (4=ltrb, cells, anchors); scores4/labels4: (anchors, cells, 1)
    boxes = jnp.transpose(boxes4, (1, 2, 0)).reshape(nb, 4)      # (nb, 4) ltrb in [0,1]
    scores = jnp.transpose(scores4[:, :, 0], (1, 0)).reshape(nb)  # (nb,)
    labels = jnp.transpose(labels4[:, :, 0], (1, 0)).reshape(nb)  # (nb,) in 1..80

    # pick_best: best non-background class, fixed top-k, score-threshold mask
    top_scores, top_idx = lax.top_k(scores, top_k)
    sel_boxes = boxes[top_idx]
    sel_labels = labels[top_idx]
    valid = top_scores > score_thresh
    # TODO(synk): per-class NMS (decode_single) and dynamic-size filtering have
    # no clean static-shape Pallas equivalent; masked fixed-K output used here.
    boxes_out = jnp.where(valid[:, None],
                          jnp.clip(sel_boxes, 0.0, 1.0) * 300.0 / scale, 0.0)
    labels_out = jnp.where(valid, COCO_IDX[sel_labels - 1], 0)
    scores_out = jnp.where(valid, top_scores, 0.0)

    res = {'boxes': boxes_out, 'labels': labels_out, 'scores': scores_out}
    return inputs, [res]


if __name__ == "__main__":
    key = jax.random.PRNGKey(0)
    k_img, k_par = jax.random.split(key)

    img = jax.random.uniform(k_img, (3, 16, 16), dtype=jnp.float32)   # CHW in [0, 1]
    params = init_params(k_par)
    consts = make_constants(params, img_hw=(16, 16), fk=10)           # hoisted once

    fwd = jax.jit(lambda image: wrapper_forward([image], consts))
    out_inputs, results = fwd(img)
    jax.block_until_ready(results[0]['boxes'])
    jax.block_until_ready(results[0]['labels'])
    jax.block_until_ready(results[0]['scores'])

    assert results[0]['boxes'].shape == (10, 4)
    assert results[0]['labels'].shape == (10,)
    assert results[0]['scores'].shape == (10,)
    print("KERNEL_OK")
</pallas_src>

<mosaic_0001>
module attributes {stable_mosaic.version = 11 : i64} {
  func.func @_ssd_fused_kernel(%arg0: i32, %arg1: memref<256x3xf32, #tpu.memory_space<vmem>>, %arg2: memref<100x256xf32, #tpu.memory_space<vmem>>, %arg3: memref<3x32xf32, #tpu.memory_space<vmem>>, %arg4: memref<1x32xf32, #tpu.memory_space<vmem>>, %arg5: memref<4x32x4xf32, #tpu.memory_space<vmem>>, %arg6: memref<4x1x4xf32, #tpu.memory_space<vmem>>, %arg7: memref<4x32x81xf32, #tpu.memory_space<vmem>>, %arg8: memref<4x1x81xf32, #tpu.memory_space<vmem>>, %arg9: memref<4x100x4xf32, #tpu.memory_space<vmem>>, %arg10: memref<4x100x4xf32, #tpu.memory_space<vmem>>, %arg11: memref<4x100x1xf32, #tpu.memory_space<vmem>>, %arg12: memref<4x100x1xi32, #tpu.memory_space<vmem>>) attributes {dimension_semantics = [#tpu.dimension_semantics<arbitrary>], iteration_bounds = array<i64: 1>, scalar_prefetch = 0 : i64, scratch_operands = 0 : i64, tpu.core_type = #tpu.core_type<tc>, window_params = [{pipeline_mode = #tpu.pipeline_mode<synchronous>, transform_indices = @transform_0, window_bounds = array<i64: 256, 3>}, {pipeline_mode = #tpu.pipeline_mode<synchronous>, transform_indices = @transform_1, window_bounds = array<i64: 100, 256>}, {pipeline_mode = #tpu.pipeline_mode<synchronous>, transform_indices = @transform_2, window_bounds = array<i64: 3, 32>}, {pipeline_mode = #tpu.pipeline_mode<synchronous>, transform_indices = @transform_3, window_bounds = array<i64: 1, 32>}, {pipeline_mode = #tpu.pipeline_mode<synchronous>, transform_indices = @transform_4, window_bounds = array<i64: 4, 32, 4>}, {pipeline_mode = #tpu.pipeline_mode<synchronous>, transform_indices = @transform_5, window_bounds = array<i64: 4, 1, 4>}, {pipeline_mode = #tpu.pipeline_mode<synchronous>, transform_indices = @transform_6, window_bounds = array<i64: 4, 32, 81>}, {pipeline_mode = #tpu.pipeline_mode<synchronous>, transform_indices = @transform_7, window_bounds = array<i64: 4, 1, 81>}, {pipeline_mode = #tpu.pipeline_mode<synchronous>, transform_indices = @transform_8, window_bounds = array<i64: 4, 100, 4>}, {pipeline_mode = #tpu.pipeline_mode<synchronous>, transform_indices = @transform_9, window_bounds = array<i64: 4, 100, 4>}, {pipeline_mode = #tpu.pipeline_mode<synchronous>, transform_indices = @transform_10, window_bounds = array<i64: 4, 100, 1>}, {pipeline_mode = #tpu.pipeline_mode<synchronous>, transform_indices = @transform_11, window_bounds = array<i64: 4, 100, 1>}]} {
    %c0 = arith.constant 0 : index
    %c0_0 = arith.constant 0 : index
    %0 = vector.load %arg1[%c0, %c0_0] : memref<256x3xf32, #tpu.memory_space<vmem>>, vector<256x3xf32>
    %c0_1 = arith.constant 0 : index
    %c0_2 = arith.constant 0 : index
    %1 = vector.load %arg3[%c0_1, %c0_2] : memref<3x32xf32, #tpu.memory_space<vmem>>, vector<3x32xf32>
    %cst = arith.constant dense<0.000000e+00> : vector<256x32xf32>
    %2 = tpu.matmul %0, %1, %cst {dimension_numbers = #tpu.dot_dimension_numbers<[1], [0], [0], [1], [0, 0, 1, 1], [], []>} : vector<256x3xf32>, vector<3x32xf32>, vector<256x32xf32> -> vector<256x32xf32>
    %c0_3 = arith.constant 0 : index
    %c0_4 = arith.constant 0 : index
    %3 = vector.load %arg2[%c0_3, %c0_4] : memref<100x256xf32, #tpu.memory_space<vmem>>, vector<100x256xf32>
    %cst_5 = arith.constant dense<0.000000e+00> : vector<100x32xf32>
    %4 = tpu.matmul %3, %2, %cst_5 {dimension_numbers = #tpu.dot_dimension_numbers<[1], [0], [0], [1], [0, 0, 1, 1], [], []>} : vector<100x256xf32>, vector<256x32xf32>, vector<100x32xf32> -> vector<100x32xf32>
    %c0_6 = arith.constant 0 : index
    %c0_7 = arith.constant 0 : index
    %5 = vector.load %arg4[%c0_6, %c0_7] : memref<1x32xf32, #tpu.memory_space<vmem>>, vector<1x32xf32>
    %6 = vector.broadcast %5 : vector<1x32xf32> to vector<100x32xf32>
    %7 = arith.addf %4, %6 : vector<100x32xf32>
    %cst_8 = arith.constant 0.000000e+00 : f32
    %8 = vector.broadcast %cst_8 : f32 to vector<100x32xf32>
    %9 = arith.maximumf %7, %8 : vector<100x32xf32>
    %c0_9 = arith.constant 0 : index
    %c0_10 = arith.constant 0 : index
    %c0_11 = arith.constant 0 : index
    %10 = vector.load %arg5[%c0_9, %c0_10, %c0_11] : memref<4x32x4xf32, #tpu.memory_space<vmem>>, vector<1x32x4xf32>
    %11 = vector.shape_cast %10 : vector<1x32x4xf32> to vector<32x4xf32>
    %cst_12 = arith.constant dense<0.000000e+00> : vector<100x4xf32>
    %12 = tpu.matmul %9, %11, %cst_12 {dimension_numbers = #tpu.dot_dimension_numbers<[1], [0], [0], [1], [0, 0, 1, 1], [], []>} : vector<100x32xf32>, vector<32x4xf32>, vector<100x4xf32> -> vector<100x4xf32>
    %c0_13 = arith.constant 0 : index
    %c0_14 = arith.constant 0 : index
    %c0_15 = arith.constant 0 : index
    %13 = vector.load %arg6[%c0_13, %c0_14, %c0_15] : memref<4x1x4xf32, #tpu.memory_space<vmem>>, vector<1x1x4xf32>
    %14 = vector.shape_cast %13 : vector<1x1x4xf32> to vector<1x4xf32>
    %15 = vector.broadcast %14 : vector<1x4xf32> to vector<100x4xf32>
    %16 = arith.addf %12, %15 : vector<100x4xf32>
    %c1 = arith.constant 1 : index
    %c0_16 = arith.constant 0 : index
    %c0_17 = arith.constant 0 : index
    %17 = vector.load %arg5[%c1, %c0_16, %c0_17] : memref<4x32x4xf32, #tpu.memory_space<vmem>>, vector<1x32x4xf32>
    %18 = vector.shape_cast %17 : vector<1x32x4xf32> to vector<32x4xf32>
    %cst_18 = arith.constant dense<0.000000e+00> : vector<100x4xf32>
    %19 = tpu.matmul %9, %18, %cst_18 {dimension_numbers = #tpu.dot_dimension_numbers<[1], [0], [0], [1], [0, 0, 1, 1], [], []>} : vector<100x32xf32>, vector<32x4xf32>, vector<100x4xf32> -> vector<100x4xf32>
    %c1_19 = arith.constant 1 : index
    %c0_20 = arith.constant 0 : index
    %c0_21 = arith.constant 0 : index
    %20 = vector.load %arg6[%c1_19, %c0_20, %c0_21] : memref<4x1x4xf32, #tpu.memory_space<vmem>>, vector<1x1x4xf32>
    %21 = vector.shape_cast %20 : vector<1x1x4xf32> to vector<1x4xf32>
    %22 = vector.broadcast %21 : vector<1x4xf32> to vector<100x4xf32>
    %23 = arith.addf %19, %22 : vector<100x4xf32>
    %c2 = arith.constant 2 : index
    %c0_22 = arith.constant 0 : index
    %c0_23 = arith.constant 0 : index
    %24 = vector.load %arg5[%c2, %c0_22, %c0_23] : memref<4x32x4xf32, #tpu.memory_space<vmem>>, vector<1x32x4xf32>
    %25 = vector.shape_cast %24 : vector<1x32x4xf32> to vector<32x4xf32>
    %cst_24 = arith.constant dense<0.000000e+00> : vector<100x4xf32>
    %26 = tpu.matmul %9, %25, %cst_24 {dimension_numbers = #tpu.dot_dimension_numbers<[1], [0], [0], [1], [0, 0, 1, 1], [], []>} : vector<100x32xf32>, vector<32x4xf32>, vector<100x4xf32> -> vector<100x4xf32>
    %c2_25 = arith.constant 2 : index
    %c0_26 = arith.constant 0 : index
    %c0_27 = arith.constant 0 : index
    %27 = vector.load %arg6[%c2_25, %c0_26, %c0_27] : memref<4x1x4xf32, #tpu.memory_space<vmem>>, vector<1x1x4xf32>
    %28 = vector.shape_cast %27 : vector<1x1x4xf32> to vector<1x4xf32>
    %29 = vector.broadcast %28 : vector<1x4xf32> to vector<100x4xf32>
    %30 = arith.addf %26, %29 : vector<100x4xf32>
    %c3 = arith.constant 3 : index
    %c0_28 = arith.constant 0 : index
    %c0_29 = arith.constant 0 : index
    %31 = vector.load %arg5[%c3, %c0_28, %c0_29] : memref<4x32x4xf32, #tpu.memory_space<vmem>>, vector<1x32x4xf32>
    %32 = vector.shape_cast %31 : vector<1x32x4xf32> to vector<32x4xf32>
    %cst_30 = arith.constant dense<0.000000e+00> : vector<100x4xf32>
    %33 = tpu.matmul %9, %32, %cst_30 {dimension_numbers = #tpu.dot_dimension_numbers<[1], [0], [0], [1], [0, 0, 1, 1], [], []>} : vector<100x32xf32>, vector<32x4xf32>, vector<100x4xf32> -> vector<100x4xf32>
    %c3_31 = arith.constant 3 : index
    %c0_32 = arith.constant 0 : index
    %c0_33 = arith.constant 0 : index
    %34 = vector.load %arg6[%c3_31, %c0_32, %c0_33] : memref<4x1x4xf32, #tpu.memory_space<vmem>>, vector<1x1x4xf32>
    %35 = vector.shape_cast %34 : vector<1x1x4xf32> to vector<1x4xf32>
    %36 = vector.broadcast %35 : vector<1x4xf32> to vector<100x4xf32>
    %37 = arith.addf %33, %36 : vector<100x4xf32>
    %c0_34 = arith.constant 0 : index
    %c0_35 = arith.constant 0 : index
    %c0_36 = arith.constant 0 : index
    %38 = vector.load %arg9[%c0_34, %c0_35, %c0_36] : memref<4x100x4xf32, #tpu.memory_space<vmem>>, vector<1x100x4xf32>
    %39 = vector.shape_cast %38 : vector<1x100x4xf32> to vector<100x4xf32>
    %c1_37 = arith.constant 1 : index
    %c0_38 = arith.constant 0 : index
    %c0_39 = arith.constant 0 : index
    %40 = vector.load %arg9[%c1_37, %c0_38, %c0_39] : memref<4x100x4xf32, #tpu.memory_space<vmem>>, vector<1x100x4xf32>
    %41 = vector.shape_cast %40 : vector<1x100x4xf32> to vector<100x4xf32>
    %c2_40 = arith.constant 2 : index
    %c0_41 = arith.constant 0 : index
    %c0_42 = arith.constant 0 : index
    %42 = vector.load %arg9[%c2_40, %c0_41, %c0_42] : memref<4x100x4xf32, #tpu.memory_space<vmem>>, vector<1x100x4xf32>
    %43 = vector.shape_cast %42 : vector<1x100x4xf32> to vector<100x4xf32>
    %c3_43 = arith.constant 3 : index
    %c0_44 = arith.constant 0 : index
    %c0_45 = arith.constant 0 : index
    %44 = vector.load %arg9[%c3_43, %c0_44, %c0_45] : memref<4x100x4xf32, #tpu.memory_space<vmem>>, vector<1x100x4xf32>
    %45 = vector.shape_cast %44 : vector<1x100x4xf32> to vector<100x4xf32>
    %cst_46 = arith.constant 1.000000e-01 : f32
    %46 = vector.broadcast %cst_46 : f32 to vector<100x4xf32>
    %47 = arith.mulf %16, %46 : vector<100x4xf32>
    %48 = arith.mulf %47, %43 : vector<100x4xf32>
    %49 = arith.addf %48, %39 : vector<100x4xf32>
    %cst_47 = arith.constant 1.000000e-01 : f32
    %50 = vector.broadcast %cst_47 : f32 to vector<100x4xf32>
    %51 = arith.mulf %23, %50 : vector<100x4xf32>
    %52 = arith.mulf %51, %45 : vector<100x4xf32>
    %53 = arith.addf %52, %41 : vector<100x4xf32>
    %cst_48 = arith.constant 2.000000e-01 : f32
    %54 = vector.broadcast %cst_48 : f32 to vector<100x4xf32>
    %55 = arith.mulf %30, %54 : vector<100x4xf32>
    %56 = math.exp %55 : vector<100x4xf32>
    %57 = arith.mulf %56, %43 : vector<100x4xf32>
    %cst_49 = arith.constant 2.000000e-01 : f32
    %58 = vector.broadcast %cst_49 : f32 to vector<100x4xf32>
    %59 = arith.mulf %37, %58 : vector<100x4xf32>
    %60 = math.exp %59 : vector<100x4xf32>
    %61 = arith.mulf %60, %45 : vector<100x4xf32>
    %cst_50 = arith.constant 5.000000e-01 : f32
    %62 = vector.broadcast %cst_50 : f32 to vector<100x4xf32>
    %63 = arith.mulf %62, %57 : vector<100x4xf32>
    %64 = arith.subf %49, %63 : vector<100x4xf32>
    %c0_51 = arith.constant 0 : index
    %c0_52 = arith.constant 0 : index
    %c0_53 = arith.constant 0 : index
    %65 = vector.load %arg10[%c0_51, %c0_52, %c0_53] : memref<4x100x4xf32, #tpu.memory_space<vmem>>, vector<1x100x4xf32>
    %66 = vector.shape_cast %65 : vector<1x100x4xf32> to vector<100x4xf32>
    %67 = vector.shape_cast %64 : vector<100x4xf32> to vector<1x100x4xf32>
    tpu.vector_store %arg10[%c0_51, %c0_52, %c0_53], %67 {strides = array<i32>} : memref<4x100x4xf32, #tpu.memory_space<vmem>>, vector<1x100x4xf32>,
    %cst_54 = arith.constant 5.000000e-01 : f32
    %68 = vector.broadcast %cst_54 : f32 to vector<100x4xf32>
    %69 = arith.mulf %68, %61 : vector<100x4xf32>
    %70 = arith.subf %53, %69 : vector<100x4xf32>
    %c1_55 = arith.constant 1 : index
    %c0_56 = arith.constant 0 : index
    %c0_57 = arith.constant 0 : index
    %71 = vector.load %arg10[%c1_55, %c0_56, %c0_57] : memref<4x100x4xf32, #tpu.memory_space<vmem>>, vector<1x100x4xf32>
    %72 = vector.shape_cast %71 : vector<1x100x4xf32> to vector<100x4xf32>
    %73 = vector.shape_cast %70 : vector<100x4xf32> to vector<1x100x4xf32>
    tpu.vector_store %arg10[%c1_55, %c0_56, %c0_57], %73 {strides = array<i32>} : memref<4x100x4xf32, #tpu.memory_space<vmem>>, vector<1x100x4xf32>,
    %cst_58 = arith.constant 5.000000e-01 : f32
    %74 = vector.broadcast %cst_58 : f32 to vector<100x4xf32>
    %75 = arith.mulf %74, %57 : vector<100x4xf32>
    %76 = arith.addf %49, %75 : vector<100x4xf32>
    %c2_59 = arith.constant 2 : index
    %c0_60 = arith.constant 0 : index
    %c0_61 = arith.constant 0 : index
    %77 = vector.load %arg10[%c2_59, %c0_60, %c0_61] : memref<4x100x4xf32, #tpu.memory_space<vmem>>, vector<1x100x4xf32>
    %78 = vector.shape_cast %77 : vector<1x100x4xf32> to vector<100x4xf32>
    %79 = vector.shape_cast %76 : vector<100x4xf32> to vector<1x100x4xf32>
    tpu.vector_store %arg10[%c2_59, %c0_60, %c0_61], %79 {strides = array<i32>} : memref<4x100x4xf32, #tpu.memory_space<vmem>>, vector<1x100x4xf32>,
    %cst_62 = arith.constant 5.000000e-01 : f32
    %80 = vector.broadcast %cst_62 : f32 to vector<100x4xf32>
    %81 = arith.mulf %80, %61 : vector<100x4xf32>
    %82 = arith.addf %53, %81 : vector<100x4xf32>
    %c3_63 = arith.constant 3 : index
    %c0_64 = arith.constant 0 : index
    %c0_65 = arith.constant 0 : index
    %83 = vector.load %arg10[%c3_63, %c0_64, %c0_65] : memref<4x100x4xf32, #tpu.memory_space<vmem>>, vector<1x100x4xf32>
    %84 = vector.shape_cast %83 : vector<1x100x4xf32> to vector<100x4xf32>
    %85 = vector.shape_cast %82 : vector<100x4xf32> to vector<1x100x4xf32>
    tpu.vector_store %arg10[%c3_63, %c0_64, %c0_65], %85 {strides = array<i32>} : memref<4x100x4xf32, #tpu.memory_space<vmem>>, vector<1x100x4xf32>,
    %86 = tpu.iota {dimensions = array<i32: 1>} : vector<100x81xi32>
    %c0_66 = arith.constant 0 : index
    %c0_67 = arith.constant 0 : index
    %c0_68 = arith.constant 0 : index
    %87 = vector.load %arg7[%c0_66, %c0_67, %c0_68] : memref<4x32x81xf32, #tpu.memory_space<vmem>>, vector<1x32x81xf32>
    %88 = vector.shape_cast %87 : vector<1x32x81xf32> to vector<32x81xf32>
    %cst_69 = arith.constant dense<0.000000e+00> : vector<100x81xf32>
    %89 = tpu.matmul %9, %88, %cst_69 {dimension_numbers = #tpu.dot_dimension_numbers<[1], [0], [0], [1], [0, 0, 1, 1], [], []>} : vector<100x32xf32>, vector<32x81xf32>, vector<100x81xf32> -> vector<100x81xf32>
    %c0_70 = arith.constant 0 : index
    %c0_71 = arith.constant 0 : index
    %c0_72 = arith.constant 0 : index
    %90 = vector.load %arg8[%c0_70, %c0_71, %c0_72] : memref<4x1x81xf32, #tpu.memory_space<vmem>>, vector<1x1x81xf32>
    %91 = vector.shape_cast %90 : vector<1x1x81xf32> to vector<1x81xf32>
    %92 = vector.broadcast %91 : vector<1x81xf32> to vector<100x81xf32>
    %93 = arith.addf %89, %92 : vector<100x81xf32>
    %cst_73 = arith.constant dense<0xFF800000> : vector<100xf32>
    %94 = vector.multi_reduction <maximumf>, %93, %cst_73 [1] : vector<100x81xf32> to vector<100xf32>
    %95 = vector.shape_cast %94 : vector<100xf32> to vector<100x1xf32>
    %96 = vector.broadcast %95 : vector<100x1xf32> to vector<100x81xf32>
    %97 = arith.subf %93, %96 : vector<100x81xf32>
    %98 = math.exp %97 : vector<100x81xf32>
    %cst_74 = arith.constant dense<0.000000e+00> : vector<100xf32>
    %99 = vector.multi_reduction <add>, %98, %cst_74 [1] : vector<100x81xf32> to vector<100xf32>
    %100 = vector.shape_cast %99 : vector<100xf32> to vector<100x1xf32>
    %101 = vector.broadcast %100 : vector<100x1xf32> to vector<100x81xf32>
    %102 = arith.divf %98, %101 : vector<100x81xf32>
    %c1_i32 = arith.constant 1 : i32
    %103 = vector.broadcast %c1_i32 : i32 to vector<100x81xi32>
    %104 = arith.cmpi sge, %86, %103 : vector<100x81xi32>
    %cst_75 = arith.constant -1.000000e+00 : f32
    %105 = vector.broadcast %cst_75 : f32 to vector<100x81xf32>
    %106 = arith.select %104, %102, %105 : vector<100x81xi1>, vector<100x81xf32>
    %cst_76 = arith.constant dense<0xFF800000> : vector<100xf32>
    %107 = vector.multi_reduction <maximumf>, %106, %cst_76 [1] : vector<100x81xf32> to vector<100xf32>
    %108 = vector.shape_cast %107 : vector<100xf32> to vector<100x1xf32>
    %109 = vector.broadcast %108 : vector<100x1xf32> to vector<100x81xf32>
    %110 = arith.cmpf oge, %106, %109 : vector<100x81xf32>
    %c82_i32 = arith.constant 82 : i32
    %111 = vector.broadcast %c82_i32 : i32 to vector<100x81xi32>
    %112 = arith.select %110, %86, %111 : vector<100x81xi1>, vector<100x81xi32>
    %cst_77 = arith.constant dense<2147483647> : vector<100xi32>
    %113 = vector.multi_reduction <minsi>, %112, %cst_77 [1] : vector<100x81xi32> to vector<100xi32>
    %114 = vector.shape_cast %113 : vector<100xi32> to vector<100x1xi32>
    %c0_78 = arith.constant 0 : index
    %c0_79 = arith.constant 0 : index
    %c0_80 = arith.constant 0 : index
    %115 = vector.load %arg11[%c0_78, %c0_79, %c0_80] : memref<4x100x1xf32, #tpu.memory_space<vmem>>, vector<1x100x1xf32>
    %116 = vector.shape_cast %115 : vector<1x100x1xf32> to vector<100x1xf32>
    %117 = vector.shape_cast %108 : vector<100x1xf32> to vector<1x100x1xf32>
    tpu.vector_store %arg11[%c0_78, %c0_79, %c0_80], %117 {strides = array<i32>} : memref<4x100x1xf32, #tpu.memory_space<vmem>>, vector<1x100x1xf32>,
    %c0_81 = arith.constant 0 : index
    %c0_82 = arith.constant 0 : index
    %c0_83 = arith.constant 0 : index
    %118 = vector.load %arg12[%c0_81, %c0_82, %c0_83] : memref<4x100x1xi32, #tpu.memory_space<vmem>>, vector<1x100x1xi32>
    %119 = vector.shape_cast %118 : vector<1x100x1xi32> to vector<100x1xi32>
    %120 = vector.shape_cast %114 : vector<100x1xi32> to vector<1x100x1xi32>
    tpu.vector_store %arg12[%c0_81, %c0_82, %c0_83], %120 {strides = array<i32>} : memref<4x100x1xi32, #tpu.memory_space<vmem>>, vector<1x100x1xi32>,
    %c1_84 = arith.constant 1 : index
    %c0_85 = arith.constant 0 : index
    %c0_86 = arith.constant 0 : index
    %121 = vector.load %arg7[%c1_84, %c0_85, %c0_86] : memref<4x32x81xf32, #tpu.memory_space<vmem>>, vector<1x32x81xf32>
    %122 = vector.shape_cast %121 : vector<1x32x81xf32> to vector<32x81xf32>
    %cst_87 = arith.constant dense<0.000000e+00> : vector<100x81xf32>
    %123 = tpu.matmul %9, %122, %cst_87 {dimension_numbers = #tpu.dot_dimension_numbers<[1], [0], [0], [1], [0, 0, 1, 1], [], []>} : vector<100x32xf32>, vector<32x81xf32>, vector<100x81xf32> -> vector<100x81xf32>
    %c1_88 = arith.constant 1 : index
    %c0_89 = arith.constant 0 : index
    %c0_90 = arith.constant 0 : index
    %124 = vector.load %arg8[%c1_88, %c0_89, %c0_90] : memref<4x1x81xf32, #tpu.memory_space<vmem>>, vector<1x1x81xf32>
    %125 = vector.shape_cast %124 : vector<1x1x81xf32> to vector<1x81xf32>
    %126 = vector.broadcast %125 : vector<1x81xf32> to vector<100x81xf32>
    %127 = arith.addf %123, %126 : vector<100x81xf32>
    %cst_91 = arith.constant dense<0xFF800000> : vector<100xf32>
    %128 = vector.multi_reduction <maximumf>, %127, %cst_91 [1] : vector<100x81xf32> to vector<100xf32>
    %129 = vector.shape_cast %128 : vector<100xf32> to vector<100x1xf32>
    %130 = vector.broadcast %129 : vector<100x1xf32> to vector<100x81xf32>
    %131 = arith.subf %127, %130 : vector<100x81xf32>
    %132 = math.exp %131 : vector<100x81xf32>
    %cst_92 = arith.constant dense<0.000000e+00> : vector<100xf32>
    %133 = vector.multi_reduction <add>, %132, %cst_92 [1] : vector<100x81xf32> to vector<100xf32>
    %134 = vector.shape_cast %133 : vector<100xf32> to vector<100x1xf32>
    %135 = vector.broadcast %134 : vector<100x1xf32> to vector<100x81xf32>
    %136 = arith.divf %132, %135 : vector<100x81xf32>
    %c1_i32_93 = arith.constant 1 : i32
    %137 = vector.broadcast %c1_i32_93 : i32 to vector<100x81xi32>
    %138 = arith.cmpi sge, %86, %137 : vector<100x81xi32>
    %cst_94 = arith.constant -1.000000e+00 : f32
    %139 = vector.broadcast %cst_94 : f32 to vector<100x81xf32>
    %140 = arith.select %138, %136, %139 : vector<100x81xi1>, vector<100x81xf32>
    %cst_95 = arith.constant dense<0xFF800000> : vector<100xf32>
    %141 = vector.multi_reduction <maximumf>, %140, %cst_95 [1] : vector<100x81xf32> to vector<100xf32>
    %142 = vector.shape_cast %141 : vector<100xf32> to vector<100x1xf32>
    %143 = vector.broadcast %142 : vector<100x1xf32> to vector<100x81xf32>
    %144 = arith.cmpf oge, %140, %143 : vector<100x81xf32>
    %c82_i32_96 = arith.constant 82 : i32
    %145 = vector.broadcast %c82_i32_96 : i32 to vector<100x81xi32>
    %146 = arith.select %144, %86, %145 : vector<100x81xi1>, vector<100x81xi32>
    %cst_97 = arith.constant dense<2147483647> : vector<100xi32>
    %147 = vector.multi_reduction <minsi>, %146, %cst_97 [1] : vector<100x81xi32> to vector<100xi32>
    %148 = vector.shape_cast %147 : vector<100xi32> to vector<100x1xi32>
    %c1_98 = arith.constant 1 : index
    %c0_99 = arith.constant 0 : index
    %c0_100 = arith.constant 0 : index
    %149 = vector.load %arg11[%c1_98, %c0_99, %c0_100] : memref<4x100x1xf32, #tpu.memory_space<vmem>>, vector<1x100x1xf32>
    %150 = vector.shape_cast %149 : vector<1x100x1xf32> to vector<100x1xf32>
    %151 = vector.shape_cast %142 : vector<100x1xf32> to vector<1x100x1xf32>
    tpu.vector_store %arg11[%c1_98, %c0_99, %c0_100], %151 {strides = array<i32>} : memref<4x100x1xf32, #tpu.memory_space<vmem>>, vector<1x100x1xf32>,
    %c1_101 = arith.constant 1 : index
    %c0_102 = arith.constant 0 : index
    %c0_103 = arith.constant 0 : index
    %152 = vector.load %arg12[%c1_101, %c0_102, %c0_103] : memref<4x100x1xi32, #tpu.memory_space<vmem>>, vector<1x100x1xi32>
    %153 = vector.shape_cast %152 : vector<1x100x1xi32> to vector<100x1xi32>
    %154 = vector.shape_cast %148 : vector<100x1xi32> to vector<1x100x1xi32>
    tpu.vector_store %arg12[%c1_101, %c0_102, %c0_103], %154 {strides = array<i32>} : memref<4x100x1xi32, #tpu.memory_space<vmem>>, vector<1x100x1xi32>,
    %c2_104 = arith.constant 2 : index
    %c0_105 = arith.constant 0 : index
    %c0_106 = arith.constant 0 : index
    %155 = vector.load %arg7[%c2_104, %c0_105, %c0_106] : memref<4x32x81xf32, #tpu.memory_space<vmem>>, vector<1x32x81xf32>
    %156 = vector.shape_cast %155 : vector<1x32x81xf32> to vector<32x81xf32>
    %cst_107 = arith.constant dense<0.000000e+00> : vector<100x81xf32>
    %157 = tpu.matmul %9, %156, %cst_107 {dimension_numbers = #tpu.dot_dimension_numbers<[1], [0], [0], [1], [0, 0, 1, 1], [], []>} : vector<100x32xf32>, vector<32x81xf32>, vector<100x81xf32> -> vector<100x81xf32>
    %c2_108 = arith.constant 2 : index
    %c0_109 = arith.constant 0 : index
    %c0_110 = arith.constant 0 : index
    %158 = vector.load %arg8[%c2_108, %c0_109, %c0_110] : memref<4x1x81xf32, #tpu.memory_space<vmem>>, vector<1x1x81xf32>
    %159 = vector.shape_cast %158 : vector<1x1x81xf32> to vector<1x81xf32>
    %160 = vector.broadcast %159 : vector<1x81xf32> to vector<100x81xf32>
    %161 = arith.addf %157, %160 : vector<100x81xf32>
    %cst_111 = arith.constant dense<0xFF800000> : vector<100xf32>
    %162 = vector.multi_reduction <maximumf>, %161, %cst_111 [1] : vector<100x81xf32> to vector<100xf32>
    %163 = vector.shape_cast %162 : vector<100xf32> to vector<100x1xf32>
    %164 = vector.broadcast %163 : vector<100x1xf32> to vector<100x81xf32>
    %165 = arith.subf %161, %164 : vector<100x81xf32>
    %166 = math.exp %165 : vector<100x81xf32>
    %cst_112 = arith.constant dense<0.000000e+00> : vector<100xf32>
    %167 = vector.multi_reduction <add>, %166, %cst_112 [1] : vector<100x81xf32> to vector<100xf32>
    %168 = vector.shape_cast %167 : vector<100xf32> to vector<100x1xf32>
    %169 = vector.broadcast %168 : vector<100x1xf32> to vector<100x81xf32>
    %170 = arith.divf %166, %169 : vector<100x81xf32>
    %c1_i32_113 = arith.constant 1 : i32
    %171 = vector.broadcast %c1_i32_113 : i32 to vector<100x81xi32>
    %172 = arith.cmpi sge, %86, %171 : vector<100x81xi32>
    %cst_114 = arith.constant -1.000000e+00 : f32
    %173 = vector.broadcast %cst_114 : f32 to vector<100x81xf32>
    %174 = arith.select %172, %170, %173 : vector<100x81xi1>, vector<100x81xf32>
    %cst_115 = arith.constant dense<0xFF800000> : vector<100xf32>
    %175 = vector.multi_reduction <maximumf>, %174, %cst_115 [1] : vector<100x81xf32> to vector<100xf32>
    %176 = vector.shape_cast %175 : vector<100xf32> to vector<100x1xf32>
    %177 = vector.broadcast %176 : vector<100x1xf32> to vector<100x81xf32>
    %178 = arith.cmpf oge, %174, %177 : vector<100x81xf32>
    %c82_i32_116 = arith.constant 82 : i32
    %179 = vector.broadcast %c82_i32_116 : i32 to vector<100x81xi32>
    %180 = arith.select %178, %86, %179 : vector<100x81xi1>, vector<100x81xi32>
    %cst_117 = arith.constant dense<2147483647> : vector<100xi32>
    %181 = vector.multi_reduction <minsi>, %180, %cst_117 [1] : vector<100x81xi32> to vector<100xi32>
    %182 = vector.shape_cast %181 : vector<100xi32> to vector<100x1xi32>
    %c2_118 = arith.constant 2 : index
    %c0_119 = arith.constant 0 : index
    %c0_120 = arith.constant 0 : index
    %183 = vector.load %arg11[%c2_118, %c0_119, %c0_120] : memref<4x100x1xf32, #tpu.memory_space<vmem>>, vector<1x100x1xf32>
    %184 = vector.shape_cast %183 : vector<1x100x1xf32> to vector<100x1xf32>
    %185 = vector.shape_cast %176 : vector<100x1xf32> to vector<1x100x1xf32>
    tpu.vector_store %arg11[%c2_118, %c0_119, %c0_120], %185 {strides = array<i32>} : memref<4x100x1xf32, #tpu.memory_space<vmem>>, vector<1x100x1xf32>,
    %c2_121 = arith.constant 2 : index
    %c0_122 = arith.constant 0 : index
    %c0_123 = arith.constant 0 : index
    %186 = vector.load %arg12[%c2_121, %c0_122, %c0_123] : memref<4x100x1xi32, #tpu.memory_space<vmem>>, vector<1x100x1xi32>
    %187 = vector.shape_cast %186 : vector<1x100x1xi32> to vector<100x1xi32>
    %188 = vector.shape_cast %182 : vector<100x1xi32> to vector<1x100x1xi32>
    tpu.vector_store %arg12[%c2_121, %c0_122, %c0_123], %188 {strides = array<i32>} : memref<4x100x1xi32, #tpu.memory_space<vmem>>, vector<1x100x1xi32>,
    %c3_124 = arith.constant 3 : index
    %c0_125 = arith.constant 0 : index
    %c0_126 = arith.constant 0 : index
    %189 = vector.load %arg7[%c3_124, %c0_125, %c0_126] : memref<4x32x81xf32, #tpu.memory_space<vmem>>, vector<1x32x81xf32>
    %190 = vector.shape_cast %189 : vector<1x32x81xf32> to vector<32x81xf32>
    %cst_127 = arith.constant dense<0.000000e+00> : vector<100x81xf32>
    %191 = tpu.matmul %9, %190, %cst_127 {dimension_numbers = #tpu.dot_dimension_numbers<[1], [0], [0], [1], [0, 0, 1, 1], [], []>} : vector<100x32xf32>, vector<32x81xf32>, vector<100x81xf32> -> vector<100x81xf32>
    %c3_128 = arith.constant 3 : index
    %c0_129 = arith.constant 0 : index
    %c0_130 = arith.constant 0 : index
    %192 = vector.load %arg8[%c3_128, %c0_129, %c0_130] : memref<4x1x81xf32, #tpu.memory_space<vmem>>, vector<1x1x81xf32>
    %193 = vector.shape_cast %192 : vector<1x1x81xf32> to vector<1x81xf32>
    %194 = vector.broadcast %193 : vector<1x81xf32> to vector<100x81xf32>
    %195 = arith.addf %191, %194 : vector<100x81xf32>
    %cst_131 = arith.constant dense<0xFF800000> : vector<100xf32>
    %196 = vector.multi_reduction <maximumf>, %195, %cst_131 [1] : vector<100x81xf32> to vector<100xf32>
    %197 = vector.shape_cast %196 : vector<100xf32> to vector<100x1xf32>
    %198 = vector.broadcast %197 : vector<100x1xf32> to vector<100x81xf32>
    %199 = arith.subf %195, %198 : vector<100x81xf32>
    %200 = math.exp %199 : vector<100x81xf32>
    %cst_132 = arith.constant dense<0.000000e+00> : vector<100xf32>
    %201 = vector.multi_reduction <add>, %200, %cst_132 [1] : vector<100x81xf32> to vector<100xf32>
    %202 = vector.shape_cast %201 : vector<100xf32> to vector<100x1xf32>
    %203 = vector.broadcast %202 : vector<100x1xf32> to vector<100x81xf32>
    %204 = arith.divf %200, %203 : vector<100x81xf32>
    %c1_i32_133 = arith.constant 1 : i32
    %205 = vector.broadcast %c1_i32_133 : i32 to vector<100x81xi32>
    %206 = arith.cmpi sge, %86, %205 : vector<100x81xi32>
    %cst_134 = arith.constant -1.000000e+00 : f32
    %207 = vector.broadcast %cst_134 : f32 to vector<100x81xf32>
    %208 = arith.select %206, %204, %207 : vector<100x81xi1>, vector<100x81xf32>
    %cst_135 = arith.constant dense<0xFF800000> : vector<100xf32>
    %209 = vector.multi_reduction <maximumf>, %208, %cst_135 [1] : vector<100x81xf32> to vector<100xf32>
    %210 = vector.shape_cast %209 : vector<100xf32> to vector<100x1xf32>
    %211 = vector.broadcast %210 : vector<100x1xf32> to vector<100x81xf32>
    %212 = arith.cmpf oge, %208, %211 : vector<100x81xf32>
    %c82_i32_136 = arith.constant 82 : i32
    %213 = vector.broadcast %c82_i32_136 : i32 to vector<100x81xi32>
    %214 = arith.select %212, %86, %213 : vector<100x81xi1>, vector<100x81xi32>
    %cst_137 = arith.constant dense<2147483647> : vector<100xi32>
    %215 = vector.multi_reduction <minsi>, %214, %cst_137 [1] : vector<100x81xi32> to vector<100xi32>
    %216 = vector.shape_cast %215 : vector<100xi32> to vector<100x1xi32>
    %c3_138 = arith.constant 3 : index
    %c0_139 = arith.constant 0 : index
    %c0_140 = arith.constant 0 : index
    %217 = vector.load %arg11[%c3_138, %c0_139, %c0_140] : memref<4x100x1xf32, #tpu.memory_space<vmem>>, vector<1x100x1xf32>
    %218 = vector.shape_cast %217 : vector<1x100x1xf32> to vector<100x1xf32>
    %219 = vector.shape_cast %210 : vector<100x1xf32> to vector<1x100x1xf32>
    tpu.vector_store %arg11[%c3_138, %c0_139, %c0_140], %219 {strides = array<i32>} : memref<4x100x1xf32, #tpu.memory_space<vmem>>, vector<1x100x1xf32>,
    %c3_141 = arith.constant 3 : index
    %c0_142 = arith.constant 0 : index
    %c0_143 = arith.constant 0 : index
    %220 = vector.load %arg12[%c3_141, %c0_142, %c0_143] : memref<4x100x1xi32, #tpu.memory_space<vmem>>, vector<1x100x1xi32>
    %221 = vector.shape_cast %220 : vector<1x100x1xi32> to vector<100x1xi32>
    %222 = vector.shape_cast %216 : vector<100x1xi32> to vector<1x100x1xi32>
    tpu.vector_store %arg12[%c3_141, %c0_142, %c0_143], %222 {strides = array<i32>} : memref<4x100x1xi32, #tpu.memory_space<vmem>>, vector<1x100x1xi32>,
    return
  }
  func.func @transform_0(%arg0: i32) -> (i32, i32) {
    %c0_i32 = arith.constant 0 : i32
    %c0_i32_0 = arith.constant 0 : i32
    %c0_i32_1 = arith.constant 0 : i32
    return %c0_i32, %c0_i32_0 : i32, i32
  }
  func.func @transform_1(%arg0: i32) -> (i32, i32) {
    %c0_i32 = arith.constant 0 : i32
    %c0_i32_0 = arith.constant 0 : i32
    %c0_i32_1 = arith.constant 0 : i32
    return %c0_i32, %c0_i32_0 : i32, i32
  }
  func.func @transform_2(%arg0: i32) -> (i32, i32) {
    %c0_i32 = arith.constant 0 : i32
    %c0_i32_0 = arith.constant 0 : i32
    %c0_i32_1 = arith.constant 0 : i32
    return %c0_i32, %c0_i32_0 : i32, i32
  }
  func.func @transform_3(%arg0: i32) -> (i32, i32) {
    %c0_i32 = arith.constant 0 : i32
    %c0_i32_0 = arith.constant 0 : i32
    %c0_i32_1 = arith.constant 0 : i32
    return %c0_i32, %c0_i32_0 : i32, i32
  }
  func.func @transform_4(%arg0: i32) -> (i32, i32, i32) {
    %c0_i32 = arith.constant 0 : i32
    %c0_i32_0 = arith.constant 0 : i32
    %c0_i32_1 = arith.constant 0 : i32
    %c0_i32_2 = arith.constant 0 : i32
    return %c0_i32, %c0_i32_0, %c0_i32_1 : i32, i32, i32
  }
  func.func @transform_5(%arg0: i32) -> (i32, i32, i32) {
    %c0_i32 = arith.constant 0 : i32
    %c0_i32_0 = arith.constant 0 : i32
    %c0_i32_1 = arith.constant 0 : i32
    %c0_i32_2 = arith.constant 0 : i32
    return %c0_i32, %c0_i32_0, %c0_i32_1 : i32, i32, i32
  }
  func.func @transform_6(%arg0: i32) -> (i32, i32, i32) {
    %c0_i32 = arith.constant 0 : i32
    %c0_i32_0 = arith.constant 0 : i32
    %c0_i32_1 = arith.constant 0 : i32
    %c0_i32_2 = arith.constant 0 : i32
    return %c0_i32, %c0_i32_0, %c0_i32_1 : i32, i32, i32
  }
  func.func @transform_7(%arg0: i32) -> (i32, i32, i32) {
    %c0_i32 = arith.constant 0 : i32
    %c0_i32_0 = arith.constant 0 : i32
    %c0_i32_1 = arith.constant 0 : i32
    %c0_i32_2 = arith.constant 0 : i32
    return %c0_i32, %c0_i32_0, %c0_i32_1 : i32, i32, i32
  }
  func.func @transform_8(%arg0: i32) -> (i32, i32, i32) {
    %c0_i32 = arith.constant 0 : i32
    %c0_i32_0 = arith.constant 0 : i32
    %c0_i32_1 = arith.constant 0 : i32
    %c0_i32_2 = arith.constant 0 : i32
    return %c0_i32, %c0_i32_0, %c0_i32_1 : i32, i32, i32
  }
  func.func @transform_9(%arg0: i32) -> (i32, i32, i32) {
    %c0_i32 = arith.constant 0 : i32
    %c0_i32_0 = arith.constant 0 : i32
    %c0_i32_1 = arith.constant 0 : i32
    %c0_i32_2 = arith.constant 0 : i32
    return %c0_i32, %c0_i32_0, %c0_i32_1 : i32, i32, i32
  }
  func.func @transform_10(%arg0: i32) -> (i32, i32, i32) {
    %c0_i32 = arith.constant 0 : i32
    %c0_i32_0 = arith.constant 0 : i32
    %c0_i32_1 = arith.constant 0 : i32
    %c0_i32_2 = arith.constant 0 : i32
    return %c0_i32, %c0_i32_0, %c0_i32_1 : i32, i32, i32
  }
  func.func @transform_11(%arg0: i32) -> (i32, i32, i32) {
    %c0_i32 = arith.constant 0 : i32
    %c0_i32_0 = arith.constant 0 : i32
    %c0_i32_1 = arith.constant 0 : i32
    %c0_i32_2 = arith.constant 0 : i32
    return %c0_i32, %c0_i32_0, %c0_i32_1 : i32, i32, i32
  }
}

</mosaic_0001>

<bundles_post_ra>
// kernel: _lambda_.1
= control target key start
LH: loop header
LB: loop body
LE: loop exit
PB: predicated region body
PF: predicated region fallthrough
CT: control target
= control target key end

     0   :  { %17 = vsyncpa [#allocation3], 0  ;;  %s8700_s0 = inlined_call_operand.vmem [shape: f32[256,3], index: 0, kind: input, shape index: {}]   ;;  %s8701_s1 = inlined_call_operand.vmem [shape: f32[100,256], index: 1, kind: input, shape index: {}]   ;;  %s8702_s2 = inlined_call_operand.vmem [shape: f32[3,32], index: 2, kind: input, shape index: {}]   ;;  %s8703_s3 = inlined_call_operand.vmem [shape: f32[1,32], index: 3, kind: input, shape index: {}]   ;;  %s8704_s4 = inlined_call_operand.hbm [shape: f32[4,32,4], index: 4, kind: input, shape index: {}]   ;;  %s8705_s5 = inlined_call_operand.vmem [shape: f32[4,1,4], index: 5, kind: input, shape index: {}]   ;;  %s8706_s6 = inlined_call_operand.hbm [shape: f32[4,32,81], index: 6, kind: input, shape index: {}]   ;;  %s8707_s7 = inlined_call_operand.vmem [shape: f32[4,1,81], index: 7, kind: input, shape index: {}]   ;;  %s8708_s8 = inlined_call_operand.hbm [shape: f32[4,100,4], index: 8, kind: input, shape index: {}]   ;;  %s8709_s9 = inlined_call_operand.vmem [shape: f32[4,100,4], index: 9, kind: output, shape index: {0}]   ;;  %s8710_s10 = inlined_call_operand.vmem [shape: f32[4,100,1], index: 10, kind: output, shape index: {1}]   ;;  %s8711_s11 = inlined_call_operand.vmem [shape: s32[4,100,1], index: 11, kind: output, shape index: {2}]  }
   0x1   :  { %18 = vsyncpa [#allocation5], 0  ;;  %s5256_s17 = smov [#allocation4]   ;;  %s5257_s19 = smov [#allocation2]  }
   0x2   :  { %s46_s18 = sshll.u32 %s5256_s17, 4  ;;  %s32_s20 = sshll.u32 %s5257_s19, 4  ;;  %s47_s18 = int_to_ptr.vmem [resolvable:$true] %s46_s18  ;;  %s33_s20 = int_to_ptr.vmem [resolvable:$true] %s32_s20 }
   0x3   :  { %s5200_s21 = scalar_lea.vmem %s47_s18, 2048  ;;  %p5205_p1 = scmp.lt.s32.totalorder %s47_s18, %s47_s18 }
   0x4   :  { %p5201_p0 = scmp.ne.s32.totalorder %s47_s18, %s5200_s21  ;;  %p5206_p2 = scmp.lt.s32.totalorder %s5200_s21, %s5200_s21 }
   0x6   :  { %p5207_p3 = por %p5206_p2, %p5205_p1 }
   0x8   :  { %p5208_p4 = pnand %p5207_p3, %p5201_p0 }
   0xa   :  { %5211 = shalt.err (!%p5208_p4)
}
   0xb   :  { %s5258_s22 = smov 128   ;;  %s5259_s23 = smov 8  }
   0xc   :  { %52 = dma.hbm_to_vmem [thread:$0]  %s8706_s6, 2048, %s47_s18, [#allocation5], %s5258_s22, %s5258_s22, %s5259_s23  }
   0xd   :  { %s5220_s26 = scalar_lea.vmem %s33_s20, 2048  ;;  %p5225_p6 = scmp.lt.s32.totalorder %s33_s20, %s33_s20 }
   0xe   :  { %p5221_p5 = scmp.ne.s32.totalorder %s33_s20, %s5220_s26  ;;  %p5226_p7 = scmp.lt.s32.totalorder %s5220_s26, %s5220_s26 }
  0x10   :  { %p5227_p8 = por %p5226_p7, %p5225_p6 }
  0x12   :  { %p5228_p9 = pnand %p5227_p8, %p5221_p5 }
  0x14   :  { %5231 = shalt.err (!%p5228_p9)
}
  0x15   :  { %38 = dma.hbm_to_vmem [thread:$0]  %s8704_s4, 2048, %s33_s20, [#allocation3], %s5258_s22, %s5258_s22, %s5259_s23  }
  0x16   :  { %s5260_s29 = smov [#allocation6]  }
  0x17   :  { %s60_s30 = sshll.u32 %s5260_s29, 4  ;;  %s61_s30 = int_to_ptr.vmem [resolvable:$true] %s60_s30 }
  0x18   :  { %s5240_s12 = scalar_lea.vmem %s61_s30, 6656  ;;  %p5245_p11 = scmp.lt.s32.totalorder %s61_s30, %s61_s30 }
  0x19   :  { %p5241_p10 = scmp.ne.s32.totalorder %s61_s30, %s5240_s12  ;;  %p5246_p12 = scmp.lt.s32.totalorder %s5240_s12, %s5240_s12 }
  0x1b   :  { %p5247_p13 = por %p5246_p12, %p5245_p11 }
  0x1d   :  { %p5248_p0 = pnand %p5247_p13, %p5241_p10 }
  0x1f   :  { %5251 = shalt.err (!%p5248_p0)
}
  0x20   :  { %66 = dma.hbm_to_vmem [thread:$0]  %s8708_s8, 6656, %s61_s30, [#allocation5], %s5258_s22, %s5258_s22, %s5259_s23  }
  0x21   :  { %5252 = dma.done.wait [#allocation3], 2048  }
  0x22   :  { %5253 = vsyncadd [#allocation3], 4294965248 }
  0x23   :  { %5254 = dma.done.wait [#allocation5], 8704  }
  0x24   :  { %5255 = vsyncadd [#allocation5], 4294958592  ;;  %vm206_vm0 = vcmask 1042432   ;;  %vm109_vm1 = vcmask 23552   ;;  %v108_v0 = vld [vmem:[%s8702_s2] sm:$0x7] }
  0x25   :  { %v76_v1 = vld [vmem:[%s8700_s0] sm:$0xff]  ;;  %v77_v2 = vld [vmem:[%s8700_s0 + $0x8] sm:$0xff]  ;;  %4467 = vmatprep.subr.msk.mxu0 %vm206_vm0, %v108_v0  ;;  %v78_v3 = vld [vmem:[%s8700_s0 + $0x10] sm:$0xff]  ;;  %vm5262_vm2 = vmmov 0   ;;  %vm622_vm3 = vcmask 261120   ;;  %vm1484_vm4 = vcmask 31744  }
  0x26   :  { %4469 = vmatprep.mubr.msk.f32.mxu0 %vm109_vm1, %v76_v1  ;;  %4468 = vmatpush3.msk.msra.mxu0 %vm206_vm0, %v108_v0  ;;  %v79_v4 = vld [vmem:[%s8700_s0 + $0x18] sm:$0xff]  ;;  %v80_v5 = vld [vmem:[%s8700_s0 + $0x20] sm:$0xff]  ;;  %v81_v6 = vld [vmem:[%s8700_s0 + $0x28] sm:$0xff]  ;;  %vm1736_vm5 = vcmask 662528   ;;  %vm1497_vm6 = vcmask 27648   ;;  %vm1773_vm7 = vcmask 658432  }
  0x27   :  { %4470 = vmatmul.mubr.msk.f32.vlgmr.msra.gmra.mxu0 %vm109_vm1, %v77_v2  ;;  %v82_v7 = vld [vmem:[%s8700_s0 + $0x30] sm:$0xff]  ;;  %v83_v8 = vld [vmem:[%s8700_s0 + $0x38] sm:$0xff]  ;;  %v84_v9 = vld [vmem:[%s8700_s0 + $0x40] sm:$0xff]  ;;  %vm2155_vm9 = vcmask 7168  }
  0x28   :  { %4472 = vmatprep.mubr.msk.f32.mxu0 %vm109_vm1, %v78_v3  ;;  %v85_v10 = vld [vmem:[%s8700_s0 + $0x48] sm:$0xff]  ;;  %v86_v11 = vld [vmem:[%s8700_s0 + $0x50] sm:$0xff]  ;;  %v87_v12 = vld [vmem:[%s8700_s0 + $0x58] sm:$0xff] }
  0x29   :  { %v88_v13 = vld [vmem:[%s8700_s0 + $0x60] sm:$0xff]  ;;  %v89_v14 = vld [vmem:[%s8700_s0 + $0x68] sm:$0xff]  ;;  %v90_v15 = vld [vmem:[%s8700_s0 + $0x70] sm:$0xff] }
  0x2a   :  { %v91_v16 = vld [vmem:[%s8700_s0 + $0x78] sm:$0xff]  ;;  %v92_v17 = vld [vmem:[%s8700_s0 + $0x80] sm:$0xff]  ;;  %v93_v18 = vld [vmem:[%s8700_s0 + $0x88] sm:$0xff] }
  0x2b   :  { %4473 = vmatmul.mubr.msk.f32.gmra.mxu0 %vm109_vm1, %v79_v4  ;;  %v94_v19 = vld [vmem:[%s8700_s0 + $0x90] sm:$0xff]  ;;  %v95_v20 = vld [vmem:[%s8700_s0 + $0x98] sm:$0xff]  ;;  %v96_v21 = vld [vmem:[%s8700_s0 + $0xa0] sm:$0xff] }
  0x2c   :  { %4475 = vmatprep.mubr.msk.f32.mxu0 %vm109_vm1, %v80_v5  ;;  %v97_v22 = vld [vmem:[%s8700_s0 + $0xa8] sm:$0xff]  ;;  %v98_v23 = vld [vmem:[%s8700_s0 + $0xb0] sm:$0xff]  ;;  %v99_v24 = vld [vmem:[%s8700_s0 + $0xb8] sm:$0xff] }
  0x2d   :  { %v100_v25 = vld [vmem:[%s8700_s0 + $0xc0] sm:$0xff]  ;;  %v101_v26 = vld [vmem:[%s8700_s0 + $0xc8] sm:$0xff]  ;;  %v102_v27 = vld [vmem:[%s8700_s0 + $0xd0] sm:$0xff] }
  0x2e   :  { %v103_v28 = vld [vmem:[%s8700_s0 + $0xd8] sm:$0xff]  ;;  %v104_v29 = vld [vmem:[%s8700_s0 + $0xe0] sm:$0xff]  ;;  %v105_v30 = vld [vmem:[%s8700_s0 + $0xe8] sm:$0xff] }
  0x2f   :  { %4476 = vmatmul.mubr.msk.f32.gmra.mxu0 %vm109_vm1, %v81_v6  ;;  %v106_v31 = vld [vmem:[%s8700_s0 + $0xf0] sm:$0xff]  ;;  %v107_v32 = vld [vmem:[%s8700_s0 + $0xf8] sm:$0xff]  ;;  %v436_v33 = vld [vmem:[%s8701_s1 + $0x8] sm:$0xff] }
  0x30   :  { %4478 = vmatprep.mubr.msk.f32.mxu0 %vm109_vm1, %v82_v7  ;;  %v440_v34 = vld [vmem:[%s8701_s1 + $0x28] sm:$0xff]  ;;  %v435_v3 = vld [vmem:[%s8701_s1] sm:$0xff]  ;;  %v438_v5 = vld [vmem:[%s8701_s1 + $0x18] sm:$0xff] }
  0x31   :  { %542 = vmatprep.mubr.f32.mxu1 %v440_v34  ;;  %v439_v4 = vld [vmem:[%s8701_s1 + $0x20] sm:$0xff]  ;;  %v442_v6 = vld [vmem:[%s8701_s1 + $0x38] sm:$0xff]  ;;  %v437_v7 = vld [vmem:[%s8701_s1 + $0x10] sm:$0xff] }
  0x32   :  { %v611_v34 = vld [vmem:[#allocation2] sm:$0xff] }
  0x33   :  { %4479 = vmatmul.mubr.msk.f32.gmra.mxu0 %vm109_vm1, %v83_v8  ;;  %v441_v8 = vld [vmem:[%s8701_s1 + $0x30] sm:$0xff] }
  0x34   :  { %4481 = vmatprep.mubr.msk.f32.mxu0 %vm109_vm1, %v84_v9  ;;  %v444_v9 = vld [vmem:[%s8701_s1 + $0x48] sm:$0xff] }
  0x37   :  { %4482 = vmatmul.mubr.msk.f32.gmra.mxu0 %vm109_vm1, %v85_v10  ;;  %v443_v10 = vld [vmem:[%s8701_s1 + $0x40] sm:$0xff] }
  0x38   :  { %4484 = vmatprep.mubr.msk.f32.mxu0 %vm109_vm1, %v86_v11  ;;  %v446_v11 = vld [vmem:[%s8701_s1 + $0x58] sm:$0xff] }
  0x3b   :  { %4485 = vmatmul.mubr.msk.f32.gmra.mxu0 %vm109_vm1, %v87_v12  ;;  %v445_v12 = vld [vmem:[%s8701_s1 + $0x50] sm:$0xff] }
  0x3c   :  { %4487 = vmatprep.mubr.msk.f32.mxu0 %vm109_vm1, %v88_v13  ;;  %v448_v13 = vld [vmem:[%s8701_s1 + $0x68] sm:$0xff] }
  0x3f   :  { %4488 = vmatmul.mubr.msk.f32.gmra.mxu0 %vm109_vm1, %v89_v14  ;;  %v447_v14 = vld [vmem:[%s8701_s1 + $0x60] sm:$0xff] }
  0x40   :  { %4490 = vmatprep.mubr.msk.f32.mxu0 %vm109_vm1, %v90_v15  ;;  %v450_v15 = vld [vmem:[%s8701_s1 + $0x78] sm:$0xff] }
  0x43   :  { %4491 = vmatmul.mubr.msk.f32.gmra.mxu0 %vm109_vm1, %v91_v16  ;;  %v449_v16 = vld [vmem:[%s8701_s1 + $0x70] sm:$0xff] }
  0x44   :  { %4493 = vmatprep.mubr.msk.f32.mxu0 %vm109_vm1, %v92_v17  ;;  %v452_v17 = vld [vmem:[%s8701_s1 + $0x88] sm:$0xff] }
  0x47   :  { %4494 = vmatmul.mubr.msk.f32.gmra.mxu0 %vm109_vm1, %v93_v18  ;;  %v451_v18 = vld [vmem:[%s8701_s1 + $0x80] sm:$0xff] }
  0x48   :  { %4496 = vmatprep.mubr.msk.f32.mxu0 %vm109_vm1, %v94_v19  ;;  %v454_v19 = vld [vmem:[%s8701_s1 + $0x98] sm:$0xff] }
  0x4b   :  { %4497 = vmatmul.mubr.msk.f32.gmra.mxu0 %vm109_vm1, %v95_v20  ;;  %v453_v20 = vld [vmem:[%s8701_s1 + $0x90] sm:$0xff] }
  0x4c   :  { %4499 = vmatprep.mubr.msk.f32.mxu0 %vm109_vm1, %v96_v21  ;;  %v456_v21 = vld [vmem:[%s8701_s1 + $0xa8] sm:$0xff] }
  0x4f   :  { %4500 = vmatmul.mubr.msk.f32.gmra.mxu0 %vm109_vm1, %v97_v22  ;;  %v455_v22 = vld [vmem:[%s8701_s1 + $0xa0] sm:$0xff] }
  0x50   :  { %4502 = vmatprep.mubr.msk.f32.mxu0 %vm109_vm1, %v98_v23  ;;  %v458_v23 = vld [vmem:[%s8701_s1 + $0xb8] sm:$0xff] }
  0x53   :  { %4503 = vmatmul.mubr.msk.f32.gmra.mxu0 %vm109_vm1, %v99_v24  ;;  %v457_v24 = vld [vmem:[%s8701_s1 + $0xb0] sm:$0xff] }
  0x54   :  { %4505 = vmatprep.mubr.msk.f32.mxu0 %vm109_vm1, %v100_v25  ;;  %v460_v25 = vld [vmem:[%s8701_s1 + $0xc8] sm:$0xf] }
  0x57   :  { %4506 = vmatmul.mubr.msk.f32.gmra.mxu0 %vm109_vm1, %v101_v26  ;;  %v459_v26 = vld [vmem:[%s8701_s1 + $0xc0] sm:$0xf] }
  0x58   :  { %4508 = vmatprep.mubr.msk.f32.mxu0 %vm109_vm1, %v102_v27  ;;  %v5261_v27 = vmov 0.0  }
  0x5b   :  { %4509 = vmatmul.mubr.msk.f32.gmra.mxu0 %vm109_vm1, %v103_v28  ;;  %v614_v28 = vld [vmem:[#allocation2 + $0x18] sm:$0xff] }
  0x5c   :  { %4511 = vmatprep.mubr.msk.f32.mxu0 %vm109_vm1, %v104_v29  ;;  %v796_v29 = vld [vmem:[#allocation2 + $0x38] sm:$0xff] }
  0x5f   :  { %4512 = vmatmul.mubr.msk.f32.gmra.mxu0 %vm109_vm1, %v105_v30  ;;  %v613_v30 = vld [vmem:[#allocation2 + $0x10] sm:$0xff] }
  0x60   :  { %4514 = vmatprep.mubr.msk.f32.mxu0 %vm109_vm1, %v106_v31  ;;  %v795_v31 = vld [vmem:[#allocation2 + $0x30] sm:$0xff] }
  0x63   :  { %4515 = vmatmul.mubr.msk.f32.gmra.mxu0 %vm109_vm1, %v107_v32  ;;  %v612_v32 = vld [vmem:[#allocation2 + $0x8] sm:$0xff] }
  0x64   :  { %532 = vmatprep.mubr.f32.mxu0 %v436_v33  ;;  %v794_v33 = vld [vmem:[#allocation2 + $0x28] sm:$0xff] }
  0xe7   :  { %v5469_v35 = vpop.f32.mrf.mxu0 }
  0xe9   :  { %v5471_v36 = vpop.f32.mrf.mxu0 }
  0xeb   :  { %v5473_v37 = vpop.f32.mrf.mxu0 }
  0xed   :  { %v5475_v38 = vpop.f32.mrf.mxu0 }
  0xef   :  { %v5477_v39 = vpop.f32.mrf.mxu0 }
  0xf1   :  { %v5479_v40 = vpop.f32.mrf.mxu0 }
  0xf3   :  { %v4480_v41 = vpop.f32.mrf.mxu0 }
  0xf5   :  { %v5481_v42 = vpop.f32.mrf.mxu0 }
  0xf7   :  { %v4483_v43 = vpop.f32.mrf.mxu0 }
  0xf9   :  { %v316_v44 = vpop.f32.mrf.mxu0 }
  0xfb   :  { %v4486_v45 = vpop.f32.mrf.mxu0 }
  0xfd   :  { %v326_v46 = vpop.f32.mrf.mxu0 }
  0xff   :  { %v4489_v47 = vpop.f32.mrf.mxu0 }
 0x101   :  { %v336_v48 = vpop.f32.mrf.mxu0 }
 0x103   :  { %v4492_v49 = vpop.f32.mrf.mxu0 }
 0x105   :  { %v346_v50 = vpop.f32.mrf.mxu0 }
 0x107   :  { %v5483_v51 = vpop.f32.mrf.mxu0 }
 0x109   :  { %v5485_v52 = vpop.f32.mrf.mxu0 }
 0x10b   :  { %v4498_v53 = vpop.f32.mrf.mxu0 }
 0x10d   :  { %v5487_v54 = vpop.f32.mrf.mxu0 }
 0x10f   :  { %v4501_v55 = vpop.f32.mrf.mxu0 }
 0x111   :  { %v376_v56 = vpop.f32.mrf.mxu0 }
 0x113   :  { %v4504_v57 = vpop.f32.mrf.mxu0 }
 0x115   :  { %v386_v58 = vpop.f32.mrf.mxu0 }
 0x117   :  { %v4507_v59 = vpop.f32.mrf.mxu0 }
 0x119   :  { %v396_v60 = vpop.f32.mrf.mxu0 }
 0x11b   :  { %v4510_v61 = vpop.f32.mrf.mxu0 }
 0x11d   :  { %v406_v62 = vpop.f32.mrf.mxu0 }
 0x11f   :  { %v4513_v63 = vpop.f32.mrf.mxu0 }
 0x121   :  { %v416_v0 = vpop.f32.mrf.mxu0 }
 0x123   :  { %v4516_v1 = vpop.f32.mrf.mxu0 }
 0x124   :  { %4260 = vmatprep.subr.mxu0 %v4516_v1  ;;  %4893 = vmatprep.subr.mxu1 %v4516_v1 }
 0x125   :  { %v426_v2 = vpop.f32.mrf.mxu0  ;;  %4261 = vmatpush3.msra.mxu0 %v4492_v49  ;;  %4909 = vmatpush3.msra.mxu1 %v4492_v49 }
 0x126   :  { %4262 = vmatprep.subr.mxu0 %v426_v2  ;;  %4894 = vmatprep.subr.mxu1 %v426_v2  ;;  %v937_v2 = vld [vmem:[#allocation2 + $0x48] sm:$0xff] }
 0x127   :  { %4263 = vmatpush3.msra.mxu0 %v346_v50  ;;  %4910 = vmatpush3.msra.mxu1 %v346_v50 }
 0x128   :  { %4264 = vmatprep.subr.mxu0 %v4513_v63  ;;  %4895 = vmatprep.subr.mxu1 %v4513_v63 }
 0x129   :  { %4265 = vmatpush3.msra.mxu0 %v4489_v47  ;;  %4911 = vmatpush3.msra.mxu1 %v4489_v47 }
 0x12a   :  { %4266 = vmatprep.subr.mxu0 %v416_v0  ;;  %4896 = vmatprep.subr.mxu1 %v416_v0 }
 0x12b   :  { %4267 = vmatpush3.msra.mxu0 %v336_v48  ;;  %4912 = vmatpush3.msra.mxu1 %v336_v48 }
 0x12c   :  { %4268 = vmatprep.subr.mxu0 %v4510_v61  ;;  %4897 = vmatprep.subr.mxu1 %v4510_v61 }
 0x12d   :  { %4269 = vmatpush3.msra.mxu0 %v4486_v45  ;;  %4913 = vmatpush3.msra.mxu1 %v4486_v45 }
 0x12e   :  { %4270 = vmatprep.subr.mxu0 %v406_v62  ;;  %4898 = vmatprep.subr.mxu1 %v406_v62 }
 0x12f   :  { %4271 = vmatpush3.msra.mxu0 %v326_v46  ;;  %4914 = vmatpush3.msra.mxu1 %v326_v46 }
 0x130   :  { %4272 = vmatprep.subr.mxu0 %v4507_v59  ;;  %4899 = vmatprep.subr.mxu1 %v4507_v59  ;;  %v938_v59 = vld [vmem:[#allocation2 + $0x50] sm:$0xff] }
 0x131   :  { %4273 = vmatpush3.msra.mxu0 %v4483_v43  ;;  %4915 = vmatpush3.msra.mxu1 %v4483_v43 }
 0x132   :  { %4274 = vmatprep.subr.mxu0 %v396_v60  ;;  %4900 = vmatprep.subr.mxu1 %v396_v60  ;;  %v1081_v60 = vld [vmem:[#allocation2 + $0x70] sm:$0xff] }
 0x133   :  { %4275 = vmatpush3.msra.mxu0 %v316_v44  ;;  %4916 = vmatpush3.msra.mxu1 %v316_v44 }
 0x134   :  { %4276 = vmatprep.subr.mxu0 %v4504_v57  ;;  %4901 = vmatprep.subr.mxu1 %v4504_v57 }
 0x135   :  { %4277 = vmatpush3.msra.mxu0 %v4480_v41  ;;  %4917 = vmatpush3.msra.mxu1 %v4480_v41 }
 0x136   :  { %4278 = vmatprep.subr.mxu0 %v386_v58  ;;  %4902 = vmatprep.subr.mxu1 %v386_v58 }
 0x137   :  { %4279 = vmatpush3.msra.mxu0 %v5481_v42  ;;  %4918 = vmatpush3.msra.mxu1 %v5481_v42 }
 0x138   :  { %4280 = vmatprep.subr.mxu0 %v4501_v55  ;;  %4903 = vmatprep.subr.mxu1 %v4501_v55 }
 0x139   :  { %4281 = vmatpush3.msra.mxu0 %v5477_v39  ;;  %4919 = vmatpush3.msra.mxu1 %v5477_v39 }
 0x13a   :  { %4282 = vmatprep.subr.mxu0 %v376_v56  ;;  %4904 = vmatprep.subr.mxu1 %v376_v56 }
 0x13b   :  { %4283 = vmatpush3.msra.mxu0 %v5479_v40  ;;  %4920 = vmatpush3.msra.mxu1 %v5479_v40 }
 0x13c   :  { %4284 = vmatprep.subr.mxu0 %v4498_v53  ;;  %4905 = vmatprep.subr.mxu1 %v4498_v53 }
 0x13d   :  { %4285 = vmatpush3.msra.mxu0 %v5473_v37  ;;  %4921 = vmatpush3.msra.mxu1 %v5473_v37 }
 0x13e   :  { %4286 = vmatprep.subr.mxu0 %v5487_v54  ;;  %4906 = vmatprep.subr.mxu1 %v5487_v54 }
 0x13f   :  { %4287 = vmatpush3.msra.mxu0 %v5475_v38  ;;  %4922 = vmatpush3.msra.mxu1 %v5475_v38  ;;  %v5598_v38 = vld [vmem:[%s8703_s3] ss:$0 sm:$0xff] }
 0x140   :  { %4288 = vmatprep.subr.mxu0 %v5483_v51  ;;  %4907 = vmatprep.subr.mxu1 %v5483_v51  ;;  %v939_v51 = vld [vmem:[#allocation2 + $0x58] sm:$0xff] }
 0x141   :  { %4289 = vmatpush3.msra.mxu0 %v5469_v35  ;;  %4923 = vmatpush3.msra.mxu1 %v5469_v35  ;;  %v793_v35 = vld [vmem:[#allocation2 + $0x20] sm:$0xff] }
 0x142   :  { %4290 = vmatprep.subr.mxu0 %v5485_v52  ;;  %4908 = vmatprep.subr.mxu1 %v5485_v52  ;;  %v1082_v52 = vld [vmem:[#allocation2 + $0x78] sm:$0xff] }
 0x143   :  { %4291 = vmatpush3.msra.mxu0 %v5471_v36  ;;  %4924 = vmatpush3.msra.mxu1 %v5471_v36 }
 0x144   :  { %533 = vmatmul.mubr.f32.vlgmr.msra.gmra.mxu0 %v435_v3  ;;  %543 = vmatmul.mubr.f32.vlgmr.msra.gmra.mxu1 %v439_v4  ;;  %v1080_v3 = vld [vmem:[#allocation2 + $0x68] sm:$0xff] }
 0x145   :  { %537 = vmatprep.mubr.f32.mxu0 %v438_v5  ;;  %547 = vmatprep.mubr.f32.mxu1 %v442_v6 }
 0x146   :  { %4517 = vmatprep.subr.mxu0 %v5261_v27  ;;  %4564 = vmatprep.subr.mxu1 %v5261_v27 }
 0x147   :  { %4518 = vmatpush3.msra.mxu0 %v614_v28  ;;  %4565 = vmatpush3.msra.mxu1 %v796_v29 }
 0x148   :  { %538 = vmatmul.mubr.f32.gmra.mxu0 %v437_v7  ;;  %548 = vmatmul.mubr.f32.gmra.mxu1 %v441_v8 }
 0x149   :  { %552 = vmatprep.mubr.f32.mxu1 %v444_v9  ;;  %4519 = vmatprep.subr.mxu0 %v5261_v27  ;;  %v936_v9 = vld [vmem:[#allocation2 + $0x40] sm:$0xff] }
 0x14a   :  { %4566 = vmatprep.subr.mxu1 %v5261_v27  ;;  %4520 = vmatpush3.msra.mxu0 %v613_v30 }
 0x14b   :  { %4567 = vmatpush3.msra.mxu1 %v795_v31  ;;  %4521 = vmatprep.subr.mxu0 %v5261_v27 }
 0x14c   :  { %553 = vmatmul.mubr.f32.gmra.mxu1 %v443_v10  ;;  %4568 = vmatprep.subr.mxu1 %v5261_v27  ;;  %v1079_v10 = vld [vmem:[#allocation2 + $0x60] sm:$0xff] }
 0x14d   :  { %557 = vmatprep.mubr.f32.mxu1 %v446_v11  ;;  %4522 = vmatpush3.msra.mxu0 %v612_v32 }
 0x14e   :  { %4569 = vmatpush3.msra.mxu1 %v794_v33  ;;  %4523 = vmatprep.subr.mxu0 %v5261_v27 }
 0x14f   :  { %4570 = vmatprep.subr.mxu1 %v5261_v27  ;;  %4524 = vmatpush3.msra.mxu0 %v611_v34 }
 0x150   :  { %558 = vmatmul.mubr.f32.gmra.mxu1 %v445_v12  ;;  %4525 = vmatprep.mubr.msk.f32.mxu0 %vm5262_vm2, %v5261_v27 }
 0x151   :  { %562 = vmatprep.mubr.f32.mxu1 %v448_v13  ;;  %4571 = vmatpush3.msra.mxu1 %v793_v35 }
 0x152   :  { %4611 = vmatprep.subr.mxu0 %v5261_v27  ;;  %4658 = vmatprep.subr.mxu1 %v5261_v27 }
 0x154   :  { %563 = vmatmul.mubr.f32.gmra.mxu1 %v447_v14 }
 0x155   :  { %567 = vmatprep.mubr.f32.mxu1 %v450_v15 }
 0x158   :  { %568 = vmatmul.mubr.f32.gmra.mxu1 %v449_v16 }
 0x159   :  { %572 = vmatprep.mubr.f32.mxu1 %v452_v17 }
 0x15c   :  { %573 = vmatmul.mubr.f32.gmra.mxu1 %v451_v18 }
 0x15d   :  { %577 = vmatprep.mubr.f32.mxu1 %v454_v19 }
 0x160   :  { %578 = vmatmul.mubr.f32.gmra.mxu1 %v453_v20 }
 0x161   :  { %582 = vmatprep.mubr.f32.mxu1 %v456_v21 }
 0x164   :  { %583 = vmatmul.mubr.f32.gmra.mxu1 %v455_v22 }
 0x165   :  { %587 = vmatprep.mubr.f32.mxu1 %v458_v23 }
 0x168   :  { %588 = vmatmul.mubr.f32.gmra.mxu1 %v457_v24 }
 0x169   :  { %592 = vmatprep.mubr.f32.mxu1 %v460_v25 }
 0x16c   :  { %593 = vmatmul.mubr.f32.gmra.mxu1 %v459_v26 }
 0x16d   :  { %4572 = vmatprep.mubr.msk.f32.mxu1 %vm5262_vm2, %v5261_v27 }
 0x204   :  { %v4292_v36 = vpop.f32.mrf.mxu0  ;;  %v4298_v37 = vpop.f32.mrf.mxu1 }
 0x206   :  { %v4293_v39 = vpop.f32.mrf.mxu0  ;;  %v4299_v40 = vpop.f32.mrf.mxu1 }
 0x207   :  { %v4294_v41 = vadd.f32 %v4293_v39, %v4292_v36  ;;  %v4300_v49 = vadd.f32 %v4299_v40, %v4298_v37 }
 0x208   :  { %v4295_v42 = vpop.f32.mrf.mxu0  ;;  %v4301_v43 = vpop.f32.mrf.mxu1 }
 0x209   :  { %v535_v44 = vadd.f32 %v4294_v41, %v5598_v38  ;;  %v545_v56 = vadd.f32 %v4300_v49, %v5598_v38  ;;  %v2187_v49 = vld [vmem:[#allocation4 + $0x38] sm:$0xff] }
 0x20a   :  { %v4296_v45 = vpop.f32.mrf.mxu0  ;;  %v4302_v46 = vpop.f32.mrf.mxu1 }
 0x20b   :  { %v5601_v47 = vmax.f32 %v535_v44, 0.0  ;;  %v4297_v48 = vadd.f32 %v4296_v45, %v4295_v42  ;;  %v4303_v57 = vadd.f32 %v4302_v46, %v4301_v43  ;;  %v5625_v62 = vmax.f32 %v545_v56, 0.0  ;;  %v2184_v56 = vld [vmem:[#allocation4 + $0x20] sm:$0xff] }
 0x20c   :  { %v4304_v50 = vpop.f32.mrf.mxu1 }
 0x20d   :  { %v540_v53 = vadd.f32 %v4297_v48, %v5598_v38  ;;  %4526 = vmatmul.mubr.msk.f32.vlgmr.msra.gmra.mxu0 %vm622_vm3, %v5601_v47  ;;  %4573 = vmatmul.mubr.msk.f32.vlgmr.msra.gmra.mxu1 %vm622_vm3, %v5601_v47  ;;  %v550_v63 = vadd.f32 %v4303_v57, %v5598_v38  ;;  %v2774_v57 = vld [vmem:[#allocation4 + $0x58] sm:$0xff] }
 0x20e   :  { %4528 = vmatprep.mubr.msk.f32.mxu0 %vm5262_vm2, %v5261_v27  ;;  %4575 = vmatprep.mubr.msk.f32.mxu1 %vm5262_vm2, %v5261_v27  ;;  %v4305_v54 = vpop.f32.mrf.mxu1 }
 0x20f   :  { %v5612_v55 = vmax.f32 %v540_v53, 0.0  ;;  %4612 = vmatpush3.msra.mxu0 %v939_v51  ;;  %4659 = vmatpush3.msra.mxu1 %v1082_v52  ;;  %v4306_v0 = vadd.f32 %v4305_v54, %v4304_v50  ;;  %v5638_v5 = vmax.f32 %v550_v63, 0.0  ;;  %v1597_v50 = vld [vmem:[#allocation4 + $0x10] sm:$0xff]  ;;  %v1596_v52 = vld [vmem:[#allocation4 + $0x8] sm:$0xff]  ;;  %v1595_v54 = vld [vmem:[#allocation4] sm:$0xff] }
 0x210   :  { %v4307_v58 = vpop.f32.mrf.mxu1  ;;  %4613 = vmatprep.subr.mxu0 %v5261_v27  ;;  %4660 = vmatprep.subr.mxu1 %v5261_v27  ;;  %v2186_v51 = vld [vmem:[#allocation4 + $0x30] sm:$0xff]  ;;  %v2185_v53 = vld [vmem:[#allocation4 + $0x28] sm:$0xff] }
 0x211   :  { %4529 = vmatmul.mubr.msk.f32.gmra.mxu0 %vm622_vm3, %v5612_v55  ;;  %4576 = vmatmul.mubr.msk.f32.gmra.mxu1 %vm622_vm3, %v5612_v55  ;;  %v555_v6 = vadd.f32 %v4306_v0, %v5598_v38  ;;  %v3359_v63 = vld [vmem:[#allocation4 + $0x68] sm:$0xff]  ;;  %v2771_v0 = vld [vmem:[#allocation4 + $0x40] sm:$0xff] }
 0x212   :  { %4531 = vmatprep.mubr.msk.f32.mxu0 %vm5262_vm2, %v5261_v27  ;;  %4578 = vmatprep.mubr.msk.f32.mxu1 %vm5262_vm2, %v5261_v27  ;;  %v4308_v61 = vpop.f32.mrf.mxu1 }
 0x213   :  { %4614 = vmatpush3.msra.mxu0 %v938_v59  ;;  %4661 = vmatpush3.msra.mxu1 %v1081_v60  ;;  %v4309_v7 = vadd.f32 %v4308_v61, %v4307_v58  ;;  %v5651_v12 = vmax.f32 %v555_v6, 0.0  ;;  %v3361_v58 = vld [vmem:[#allocation4 + $0x78] sm:$0xff]  ;;  %v2773_v59 = vld [vmem:[#allocation4 + $0x50] sm:$0xff]  ;;  %v2772_v61 = vld [vmem:[#allocation4 + $0x48] sm:$0xff] }
 0x214   :  { %v4310_v1 = vpop.f32.mrf.mxu1  ;;  %4615 = vmatprep.subr.mxu0 %v5261_v27  ;;  %4662 = vmatprep.subr.mxu1 %v5261_v27  ;;  %v3360_v60 = vld [vmem:[#allocation4 + $0x70] sm:$0xff] }
 0x215   :  { %4532 = vmatmul.mubr.msk.f32.gmra.mxu0 %vm622_vm3, %v5625_v62  ;;  %4579 = vmatmul.mubr.msk.f32.gmra.mxu1 %vm622_vm3, %v5625_v62  ;;  %v560_v13 = vadd.f32 %v4309_v7, %v5598_v38 }
 0x216   :  { %4534 = vmatprep.mubr.msk.f32.mxu0 %vm5262_vm2, %v5261_v27  ;;  %4581 = vmatprep.mubr.msk.f32.mxu1 %vm5262_vm2, %v5261_v27  ;;  %v4311_v4 = vpop.f32.mrf.mxu1 }
 0x217   :  { %4616 = vmatpush3.msra.mxu0 %v937_v2  ;;  %4663 = vmatpush3.msra.mxu1 %v1080_v3  ;;  %v4312_v14 = vadd.f32 %v4311_v4, %v4310_v1  ;;  %v5664_v17 = vmax.f32 %v560_v13, 0.0  ;;  %v3358_v1 = vld [vmem:[#allocation4 + $0x60] sm:$0xff] }
 0x218   :  { %v4313_v8 = vpop.f32.mrf.mxu1  ;;  %4617 = vmatprep.subr.mxu0 %v5261_v27  ;;  %4664 = vmatprep.subr.mxu1 %v5261_v27 }
 0x219   :  { %4535 = vmatmul.mubr.msk.f32.gmra.mxu0 %vm622_vm3, %v5638_v5  ;;  %4582 = vmatmul.mubr.msk.f32.gmra.mxu1 %vm622_vm3, %v5638_v5  ;;  %v565_v18 = vadd.f32 %v4312_v14, %v5598_v38 }
 0x21a   :  { %4537 = vmatprep.mubr.msk.f32.mxu0 %vm5262_vm2, %v5261_v27  ;;  %4584 = vmatprep.mubr.msk.f32.mxu1 %vm5262_vm2, %v5261_v27  ;;  %v4314_v11 = vpop.f32.mrf.mxu1 }
 0x21b   :  { %4618 = vmatpush3.msra.mxu0 %v936_v9  ;;  %4665 = vmatpush3.msra.mxu1 %v1079_v10  ;;  %v4315_v19 = vadd.f32 %v4314_v11, %v4313_v8  ;;  %v5675_v22 = vmax.f32 %v565_v18, 0.0 }
 0x21c   :  { %v4316_v15 = vpop.f32.mrf.mxu1  ;;  %4705 = vmatprep.subr.mxu0 %v5261_v27  ;;  %4752 = vmatprep.subr.mxu1 %v5261_v27 }
 0x21d   :  { %4538 = vmatmul.mubr.msk.f32.gmra.mxu0 %vm622_vm3, %v5651_v12  ;;  %4585 = vmatmul.mubr.msk.f32.gmra.mxu1 %vm622_vm3, %v5651_v12  ;;  %v570_v23 = vadd.f32 %v4315_v19, %v5598_v38 }
 0x21e   :  { %4540 = vmatprep.mubr.msk.f32.mxu0 %vm5262_vm2, %v5261_v27  ;;  %4587 = vmatprep.mubr.msk.f32.mxu1 %vm5262_vm2, %v5261_v27  ;;  %v4317_v16 = vpop.f32.mrf.mxu1 }
 0x21f   :  { %v4318_v24 = vadd.f32 %v4317_v16, %v4316_v15  ;;  %v5686_v28 = vmax.f32 %v570_v23, 0.0 }
 0x220   :  { %v4319_v20 = vpop.f32.mrf.mxu1 }
 0x221   :  { %4541 = vmatmul.mubr.msk.f32.gmra.mxu0 %vm622_vm3, %v5664_v17  ;;  %4588 = vmatmul.mubr.msk.f32.gmra.mxu1 %vm622_vm3, %v5664_v17  ;;  %v575_v29 = vadd.f32 %v4318_v24, %v5598_v38 }
 0x222   :  { %4543 = vmatprep.mubr.msk.f32.mxu0 %vm5262_vm2, %v5261_v27  ;;  %4590 = vmatprep.mubr.msk.f32.mxu1 %vm5262_vm2, %v5261_v27  ;;  %v4320_v21 = vpop.f32.mrf.mxu1 }
 0x223   :  { %v4321_v30 = vadd.f32 %v4320_v21, %v4319_v20  ;;  %v5697_v33 = vmax.f32 %v575_v29, 0.0 }
 0x224   :  { %v4322_v25 = vpop.f32.mrf.mxu1 }
 0x225   :  { %4544 = vmatmul.mubr.msk.f32.gmra.mxu0 %vm622_vm3, %v5675_v22  ;;  %4591 = vmatmul.mubr.msk.f32.gmra.mxu1 %vm622_vm3, %v5675_v22  ;;  %v580_v34 = vadd.f32 %v4321_v30, %v5598_v38 }
 0x226   :  { %4546 = vmatprep.mubr.msk.f32.mxu0 %vm5262_vm2, %v5261_v27  ;;  %4593 = vmatprep.mubr.msk.f32.mxu1 %vm5262_vm2, %v5261_v27  ;;  %v4323_v26 = vpop.f32.mrf.mxu1 }
 0x227   :  { %v4324_v35 = vadd.f32 %v4323_v26, %v4322_v25  ;;  %v5708_v37 = vmax.f32 %v580_v34, 0.0 }
 0x228   :  { %v4325_v31 = vpop.f32.mrf.mxu1 }
 0x229   :  { %4547 = vmatmul.mubr.msk.f32.gmra.mxu0 %vm622_vm3, %v5686_v28  ;;  %4594 = vmatmul.mubr.msk.f32.gmra.mxu1 %vm622_vm3, %v5686_v28  ;;  %v585_v39 = vadd.f32 %v4324_v35, %v5598_v38  ;;  %v6088_v35 = vld [vmem:[%s8705_s5] ss:$0 sm:$0xff] }
 0x22a   :  { %4549 = vmatprep.mubr.msk.f32.mxu0 %vm5262_vm2, %v5261_v27  ;;  %4596 = vmatprep.mubr.msk.f32.mxu1 %vm5262_vm2, %v5261_v27  ;;  %v4326_v32 = vpop.f32.mrf.mxu1 }
 0x22b   :  { %v4327_v40 = vadd.f32 %v4326_v32, %v4325_v31  ;;  %v5719_v42 = vmax.f32 %v585_v39, 0.0 }
 0x22c   :  { %v4328_v36 = vpop.f32.mrf.mxu1 }
 0x22d   :  { %4550 = vmatmul.mubr.msk.f32.gmra.mxu0 %vm622_vm3, %v5697_v33  ;;  %4597 = vmatmul.mubr.msk.f32.gmra.mxu1 %vm622_vm3, %v5697_v33  ;;  %v590_v43 = vadd.f32 %v4327_v40, %v5598_v38 }
 0x22e   :  { %4552 = vmatprep.mubr.msk.f32.mxu0 %vm5262_vm2, %v5261_v27  ;;  %4599 = vmatprep.mubr.msk.f32.mxu1 %vm5262_vm2, %v5261_v27  ;;  %v4329_v41 = vpop.f32.mrf.mxu1 }
 0x22f   :  { %v4330_v44 = vadd.f32 %v4329_v41, %v4328_v36  ;;  %v5730_v45 = vmax.f32 %v590_v43, 0.0  ;;  %v6093_v36 = vld [vmem:[%s8705_s5 + $0x1] ss:$0 sm:$0xff] }
 0x231   :  { %4553 = vmatmul.mubr.msk.f32.gmra.mxu0 %vm622_vm3, %v5708_v37  ;;  %4600 = vmatmul.mubr.msk.f32.gmra.mxu1 %vm622_vm3, %v5708_v37  ;;  %v595_v46 = vadd.f32 %v4330_v44, %v5598_v38  ;;  %v1598_v38 = vld [vmem:[#allocation4 + $0x18] sm:$0xff] }
 0x232   :  { %4555 = vmatprep.mubr.msk.f32.mxu0 %vm5262_vm2, %v5261_v27  ;;  %4602 = vmatprep.mubr.msk.f32.mxu1 %vm5262_vm2, %v5261_v27 }
 0x233   :  { %v5741_v48 = vmax.f32 %v595_v46, 0.0 }
 0x235   :  { %4556 = vmatmul.mubr.msk.f32.gmra.mxu0 %vm622_vm3, %v5719_v42  ;;  %4603 = vmatmul.mubr.msk.f32.gmra.mxu1 %vm622_vm3, %v5719_v42 }
 0x236   :  { %4558 = vmatprep.mubr.msk.f32.mxu0 %vm5262_vm2, %v5261_v27  ;;  %4605 = vmatprep.mubr.msk.f32.mxu1 %vm5262_vm2, %v5261_v27 }
 0x239   :  { %4559 = vmatmul.mubr.msk.f32.gmra.mxu0 %vm622_vm3, %v5730_v45  ;;  %4606 = vmatmul.mubr.msk.f32.gmra.mxu1 %vm622_vm3, %v5730_v45 }
 0x23a   :  { %4561 = vmatprep.mubr.msk.f32.mxu0 %vm5262_vm2, %v5261_v27  ;;  %4608 = vmatprep.mubr.msk.f32.mxu1 %vm5262_vm2, %v5261_v27 }
 0x23d   :  { %4562 = vmatmul.mubr.msk.f32.gmra.mxu0 %vm622_vm3, %v5741_v48  ;;  %4609 = vmatmul.mubr.msk.f32.gmra.mxu1 %vm622_vm3, %v5741_v48 }
 0x23e   :  { %4619 = vmatprep.mubr.msk.f32.mxu0 %vm5262_vm2, %v5261_v27  ;;  %4666 = vmatprep.mubr.msk.f32.mxu1 %vm5262_vm2, %v5261_v27 }
 0x241   :  { %4620 = vmatmul.mubr.msk.f32.vlgmr.msra.gmra.mxu0 %vm622_vm3, %v5601_v47  ;;  %4667 = vmatmul.mubr.msk.f32.vlgmr.msra.gmra.mxu1 %vm622_vm3, %v5601_v47 }
 0x242   :  { %4622 = vmatprep.mubr.msk.f32.mxu0 %vm5262_vm2, %v5261_v27  ;;  %4669 = vmatprep.mubr.msk.f32.mxu1 %vm5262_vm2, %v5261_v27 }
 0x243   :  { %4706 = vmatpush3.msra.mxu0 %v1598_v38  ;;  %4753 = vmatpush3.msra.mxu1 %v2187_v49 }
 0x244   :  { %4707 = vmatprep.subr.mxu0 %v5261_v27  ;;  %4754 = vmatprep.subr.mxu1 %v5261_v27 }
 0x245   :  { %4623 = vmatmul.mubr.msk.f32.gmra.mxu0 %vm622_vm3, %v5612_v55  ;;  %4670 = vmatmul.mubr.msk.f32.gmra.mxu1 %vm622_vm3, %v5612_v55 }
 0x246   :  { %4625 = vmatprep.mubr.msk.f32.mxu0 %vm5262_vm2, %v5261_v27  ;;  %4672 = vmatprep.mubr.msk.f32.mxu1 %vm5262_vm2, %v5261_v27 }
 0x247   :  { %4708 = vmatpush3.msra.mxu0 %v1597_v50  ;;  %4755 = vmatpush3.msra.mxu1 %v2186_v51 }
 0x248   :  { %4709 = vmatprep.subr.mxu0 %v5261_v27  ;;  %4756 = vmatprep.subr.mxu1 %v5261_v27 }
 0x249   :  { %4626 = vmatmul.mubr.msk.f32.gmra.mxu0 %vm622_vm3, %v5625_v62  ;;  %4673 = vmatmul.mubr.msk.f32.gmra.mxu1 %vm622_vm3, %v5625_v62 }
 0x24a   :  { %4628 = vmatprep.mubr.msk.f32.mxu0 %vm5262_vm2, %v5261_v27  ;;  %4675 = vmatprep.mubr.msk.f32.mxu1 %vm5262_vm2, %v5261_v27 }
 0x24b   :  { %4710 = vmatpush3.msra.mxu0 %v1596_v52  ;;  %4757 = vmatpush3.msra.mxu1 %v2185_v53 }
 0x24c   :  { %4711 = vmatprep.subr.mxu0 %v5261_v27  ;;  %4758 = vmatprep.subr.mxu1 %v5261_v27 }
 0x24d   :  { %4629 = vmatmul.mubr.msk.f32.gmra.mxu0 %vm622_vm3, %v5638_v5  ;;  %4676 = vmatmul.mubr.msk.f32.gmra.mxu1 %vm622_vm3, %v5638_v5 }
 0x24e   :  { %4631 = vmatprep.mubr.msk.f32.mxu0 %vm5262_vm2, %v5261_v27  ;;  %4678 = vmatprep.mubr.msk.f32.mxu1 %vm5262_vm2, %v5261_v27 }
 0x24f   :  { %4712 = vmatpush3.msra.mxu0 %v1595_v54  ;;  %4759 = vmatpush3.msra.mxu1 %v2184_v56  ;;  %v6110_v56 = vld [vmem:[#allocation6 + $0xd0] sm:$0xff] }
 0x250   :  { %4799 = vmatprep.subr.mxu0 %v5261_v27  ;;  %4846 = vmatprep.subr.mxu1 %v5261_v27 }
 0x251   :  { %4632 = vmatmul.mubr.msk.f32.gmra.mxu0 %vm622_vm3, %v5651_v12  ;;  %4679 = vmatmul.mubr.msk.f32.gmra.mxu1 %vm622_vm3, %v5651_v12 }
 0x252   :  { %4634 = vmatprep.mubr.msk.f32.mxu0 %vm5262_vm2, %v5261_v27  ;;  %4681 = vmatprep.mubr.msk.f32.mxu1 %vm5262_vm2, %v5261_v27 }
 0x255   :  { %4635 = vmatmul.mubr.msk.f32.gmra.mxu0 %vm622_vm3, %v5664_v17  ;;  %4682 = vmatmul.mubr.msk.f32.gmra.mxu1 %vm622_vm3, %v5664_v17 }
 0x256   :  { %4637 = vmatprep.mubr.msk.f32.mxu0 %vm5262_vm2, %v5261_v27  ;;  %4684 = vmatprep.mubr.msk.f32.mxu1 %vm5262_vm2, %v5261_v27 }
 0x259   :  { %4638 = vmatmul.mubr.msk.f32.gmra.mxu0 %vm622_vm3, %v5675_v22  ;;  %4685 = vmatmul.mubr.msk.f32.gmra.mxu1 %vm622_vm3, %v5675_v22 }
 0x25a   :  { %4640 = vmatprep.mubr.msk.f32.mxu0 %vm5262_vm2, %v5261_v27  ;;  %4687 = vmatprep.mubr.msk.f32.mxu1 %vm5262_vm2, %v5261_v27 }
 0x25d   :  { %4641 = vmatmul.mubr.msk.f32.gmra.mxu0 %vm622_vm3, %v5686_v28  ;;  %4688 = vmatmul.mubr.msk.f32.gmra.mxu1 %vm622_vm3, %v5686_v28 }
 0x25e   :  { %4643 = vmatprep.mubr.msk.f32.mxu0 %vm5262_vm2, %v5261_v27  ;;  %4690 = vmatprep.mubr.msk.f32.mxu1 %vm5262_vm2, %v5261_v27 }
 0x261   :  { %4644 = vmatmul.mubr.msk.f32.gmra.mxu0 %vm622_vm3, %v5697_v33  ;;  %4691 = vmatmul.mubr.msk.f32.gmra.mxu1 %vm622_vm3, %v5697_v33 }
 0x262   :  { %4646 = vmatprep.mubr.msk.f32.mxu0 %vm5262_vm2, %v5261_v27  ;;  %4693 = vmatprep.mubr.msk.f32.mxu1 %vm5262_vm2, %v5261_v27 }
 0x265   :  { %4647 = vmatmul.mubr.msk.f32.gmra.mxu0 %vm622_vm3, %v5708_v37  ;;  %4694 = vmatmul.mubr.msk.f32.gmra.mxu1 %vm622_vm3, %v5708_v37 }
 0x266   :  { %4649 = vmatprep.mubr.msk.f32.mxu0 %vm5262_vm2, %v5261_v27  ;;  %4696 = vmatprep.mubr.msk.f32.mxu1 %vm5262_vm2, %v5261_v27 }
 0x269   :  { %4650 = vmatmul.mubr.msk.f32.gmra.mxu0 %vm622_vm3, %v5719_v42  ;;  %4697 = vmatmul.mubr.msk.f32.gmra.mxu1 %vm622_vm3, %v5719_v42 }
 0x26a   :  { %4652 = vmatprep.mubr.msk.f32.mxu0 %vm5262_vm2, %v5261_v27  ;;  %4699 = vmatprep.mubr.msk.f32.mxu1 %vm5262_vm2, %v5261_v27 }
 0x26d   :  { %4653 = vmatmul.mubr.msk.f32.gmra.mxu0 %vm622_vm3, %v5730_v45  ;;  %4700 = vmatmul.mubr.msk.f32.gmra.mxu1 %vm622_vm3, %v5730_v45 }
 0x26e   :  { %4655 = vmatprep.mubr.msk.f32.mxu0 %vm5262_vm2, %v5261_v27  ;;  %4702 = vmatprep.mubr.msk.f32.mxu1 %vm5262_vm2, %v5261_v27 }
 0x271   :  { %4656 = vmatmul.mubr.msk.f32.gmra.mxu0 %vm622_vm3, %v5741_v48  ;;  %4703 = vmatmul.mubr.msk.f32.gmra.mxu1 %vm622_vm3, %v5741_v48 }
 0x272   :  { %4713 = vmatprep.mubr.msk.f32.mxu0 %vm5262_vm2, %v5261_v27  ;;  %4760 = vmatprep.mubr.msk.f32.mxu1 %vm5262_vm2, %v5261_v27 }
 0x275   :  { %4714 = vmatmul.mubr.msk.f32.vlgmr.msra.gmra.mxu0 %vm622_vm3, %v5601_v47  ;;  %4761 = vmatmul.mubr.msk.f32.vlgmr.msra.gmra.mxu1 %vm622_vm3, %v5601_v47 }
 0x276   :  { %4716 = vmatprep.mubr.msk.f32.mxu0 %vm5262_vm2, %v5261_v27  ;;  %4763 = vmatprep.mubr.msk.f32.mxu1 %vm5262_vm2, %v5261_v27 }
 0x277   :  { %4800 = vmatpush3.msra.mxu0 %v2774_v57  ;;  %4847 = vmatpush3.msra.mxu1 %v3361_v58  ;;  %v6112_v57 = vld [vmem:[#allocation6 + $0x138] sm:$0xff] }
 0x278   :  { %4801 = vmatprep.subr.mxu0 %v5261_v27  ;;  %4848 = vmatprep.subr.mxu1 %v5261_v27 }
 0x279   :  { %4717 = vmatmul.mubr.msk.f32.gmra.mxu0 %vm622_vm3, %v5612_v55  ;;  %4764 = vmatmul.mubr.msk.f32.gmra.mxu1 %vm622_vm3, %v5612_v55 }
 0x27a   :  { %4719 = vmatprep.mubr.msk.f32.mxu0 %vm5262_vm2, %v5261_v27  ;;  %4766 = vmatprep.mubr.msk.f32.mxu1 %vm5262_vm2, %v5261_v27 }
 0x27b   :  { %4802 = vmatpush3.msra.mxu0 %v2773_v59  ;;  %4849 = vmatpush3.msra.mxu1 %v3360_v60 }
 0x27c   :  { %4803 = vmatprep.subr.mxu0 %v5261_v27  ;;  %4850 = vmatprep.subr.mxu1 %v5261_v27 }
 0x27d   :  { %4720 = vmatmul.mubr.msk.f32.gmra.mxu0 %vm622_vm3, %v5625_v62  ;;  %4767 = vmatmul.mubr.msk.f32.gmra.mxu1 %vm622_vm3, %v5625_v62 }
 0x27e   :  { %4722 = vmatprep.mubr.msk.f32.mxu0 %vm5262_vm2, %v5261_v27  ;;  %4769 = vmatprep.mubr.msk.f32.mxu1 %vm5262_vm2, %v5261_v27 }
 0x27f   :  { %4804 = vmatpush3.msra.mxu0 %v2772_v61  ;;  %4851 = vmatpush3.msra.mxu1 %v3359_v63 }
 0x280   :  { %4805 = vmatprep.subr.mxu0 %v5261_v27  ;;  %4852 = vmatprep.subr.mxu1 %v5261_v27 }
 0x281   :  { %4723 = vmatmul.mubr.msk.f32.gmra.mxu0 %vm622_vm3, %v5638_v5  ;;  %4770 = vmatmul.mubr.msk.f32.gmra.mxu1 %vm622_vm3, %v5638_v5 }
 0x282   :  { %4725 = vmatprep.mubr.msk.f32.mxu0 %vm5262_vm2, %v5261_v27  ;;  %4772 = vmatprep.mubr.msk.f32.mxu1 %vm5262_vm2, %v5261_v27 }
 0x283   :  { %4806 = vmatpush3.msra.mxu0 %v2771_v0  ;;  %4853 = vmatpush3.msra.mxu1 %v3358_v1  ;;  %v6121_v0 = vld [vmem:[#allocation6 + $0xd8] sm:$0xff] }
 0x285   :  { %4726 = vmatmul.mubr.msk.f32.gmra.mxu0 %vm622_vm3, %v5651_v12  ;;  %4773 = vmatmul.mubr.msk.f32.gmra.mxu1 %vm622_vm3, %v5651_v12 }
 0x286   :  { %4728 = vmatprep.mubr.msk.f32.mxu0 %vm5262_vm2, %v5261_v27  ;;  %4775 = vmatprep.mubr.msk.f32.mxu1 %vm5262_vm2, %v5261_v27 }
 0x289   :  { %4729 = vmatmul.mubr.msk.f32.gmra.mxu0 %vm622_vm3, %v5664_v17  ;;  %4776 = vmatmul.mubr.msk.f32.gmra.mxu1 %vm622_vm3, %v5664_v17 }
 0x28a   :  { %4731 = vmatprep.mubr.msk.f32.mxu0 %vm5262_vm2, %v5261_v27  ;;  %4778 = vmatprep.mubr.msk.f32.mxu1 %vm5262_vm2, %v5261_v27 }
 0x28d   :  { %4732 = vmatmul.mubr.msk.f32.gmra.mxu0 %vm622_vm3, %v5675_v22  ;;  %4779 = vmatmul.mubr.msk.f32.gmra.mxu1 %vm622_vm3, %v5675_v22 }
 0x28e   :  { %4734 = vmatprep.mubr.msk.f32.mxu0 %vm5262_vm2, %v5261_v27  ;;  %4781 = vmatprep.mubr.msk.f32.mxu1 %vm5262_vm2, %v5261_v27 }
 0x291   :  { %4735 = vmatmul.mubr.msk.f32.gmra.mxu0 %vm622_vm3, %v5686_v28  ;;  %4782 = vmatmul.mubr.msk.f32.gmra.mxu1 %vm622_vm3, %v5686_v28 }
 0x292   :  { %4737 = vmatprep.mubr.msk.f32.mxu0 %vm5262_vm2, %v5261_v27  ;;  %4784 = vmatprep.mubr.msk.f32.mxu1 %vm5262_vm2, %v5261_v27 }
 0x295   :  { %4738 = vmatmul.mubr.msk.f32.gmra.mxu0 %vm622_vm3, %v5697_v33  ;;  %4785 = vmatmul.mubr.msk.f32.gmra.mxu1 %vm622_vm3, %v5697_v33 }
 0x296   :  { %4740 = vmatprep.mubr.msk.f32.mxu0 %vm5262_vm2, %v5261_v27  ;;  %4787 = vmatprep.mubr.msk.f32.mxu1 %vm5262_vm2, %v5261_v27 }
 0x299   :  { %4741 = vmatmul.mubr.msk.f32.gmra.mxu0 %vm622_vm3, %v5708_v37  ;;  %4788 = vmatmul.mubr.msk.f32.gmra.mxu1 %vm622_vm3, %v5708_v37 }
 0x29a   :  { %4743 = vmatprep.mubr.msk.f32.mxu0 %vm5262_vm2, %v5261_v27  ;;  %4790 = vmatprep.mubr.msk.f32.mxu1 %vm5262_vm2, %v5261_v27 }
 0x29d   :  { %4744 = vmatmul.mubr.msk.f32.gmra.mxu0 %vm622_vm3, %v5719_v42  ;;  %4791 = vmatmul.mubr.msk.f32.gmra.mxu1 %vm622_vm3, %v5719_v42 }
 0x29e   :  { %4746 = vmatprep.mubr.msk.f32.mxu0 %vm5262_vm2, %v5261_v27  ;;  %4793 = vmatprep.mubr.msk.f32.mxu1 %vm5262_vm2, %v5261_v27 }
 0x2a1   :  { %4747 = vmatmul.mubr.msk.f32.gmra.mxu0 %vm622_vm3, %v5730_v45  ;;  %4794 = vmatmul.mubr.msk.f32.gmra.mxu1 %vm622_vm3, %v5730_v45 }
 0x2a2   :  { %4749 = vmatprep.mubr.msk.f32.mxu0 %vm5262_vm2, %v5261_v27  ;;  %4796 = vmatprep.mubr.msk.f32.mxu1 %vm5262_vm2, %v5261_v27 }
 0x2a5   :  { %4750 = vmatmul.mubr.msk.f32.gmra.mxu0 %vm622_vm3, %v5741_v48  ;;  %4797 = vmatmul.mubr.msk.f32.gmra.mxu1 %vm622_vm3, %v5741_v48 }
 0x2a6   :  { %4807 = vmatprep.mubr.msk.f32.mxu0 %vm5262_vm2, %v5261_v27  ;;  %4854 = vmatprep.mubr.msk.f32.mxu1 %vm5262_vm2, %v5261_v27 }
 0x2a9   :  { %4808 = vmatmul.mubr.msk.f32.vlgmr.msra.gmra.mxu0 %vm622_vm3, %v5601_v47  ;;  %4855 = vmatmul.mubr.msk.f32.vlgmr.msra.gmra.mxu1 %vm622_vm3, %v5601_v47 }
 0x2aa   :  { %4810 = vmatprep.mubr.msk.f32.mxu0 %vm5262_vm2, %v5261_v27  ;;  %4857 = vmatprep.mubr.msk.f32.mxu1 %vm5262_vm2, %v5261_v27 }
 0x2ad   :  { %4811 = vmatmul.mubr.msk.f32.gmra.mxu0 %vm622_vm3, %v5612_v55  ;;  %4858 = vmatmul.mubr.msk.f32.gmra.mxu1 %vm622_vm3, %v5612_v55 }
 0x2ae   :  { %4813 = vmatprep.mubr.msk.f32.mxu0 %vm5262_vm2, %v5261_v27  ;;  %4860 = vmatprep.mubr.msk.f32.mxu1 %vm5262_vm2, %v5261_v27 }
 0x2b1   :  { %4814 = vmatmul.mubr.msk.f32.gmra.mxu0 %vm622_vm3, %v5625_v62  ;;  %4861 = vmatmul.mubr.msk.f32.gmra.mxu1 %vm622_vm3, %v5625_v62 }
 0x2b2   :  { %4816 = vmatprep.mubr.msk.f32.mxu0 %vm5262_vm2, %v5261_v27  ;;  %4863 = vmatprep.mubr.msk.f32.mxu1 %vm5262_vm2, %v5261_v27 }
 0x2b5   :  { %4817 = vmatmul.mubr.msk.f32.gmra.mxu0 %vm622_vm3, %v5638_v5  ;;  %4864 = vmatmul.mubr.msk.f32.gmra.mxu1 %vm622_vm3, %v5638_v5 }
 0x2b6   :  { %4819 = vmatprep.mubr.msk.f32.mxu0 %vm5262_vm2, %v5261_v27  ;;  %4866 = vmatprep.mubr.msk.f32.mxu1 %vm5262_vm2, %v5261_v27 }
 0x2b9   :  { %4820 = vmatmul.mubr.msk.f32.gmra.mxu0 %vm622_vm3, %v5651_v12  ;;  %4867 = vmatmul.mubr.msk.f32.gmra.mxu1 %vm622_vm3, %v5651_v12 }
 0x2ba   :  { %4822 = vmatprep.mubr.msk.f32.mxu0 %vm5262_vm2, %v5261_v27  ;;  %4869 = vmatprep.mubr.msk.f32.mxu1 %vm5262_vm2, %v5261_v27 }
 0x2bd   :  { %4823 = vmatmul.mubr.msk.f32.gmra.mxu0 %vm622_vm3, %v5664_v17  ;;  %4870 = vmatmul.mubr.msk.f32.gmra.mxu1 %vm622_vm3, %v5664_v17 }
 0x2be   :  { %4825 = vmatprep.mubr.msk.f32.mxu0 %vm5262_vm2, %v5261_v27  ;;  %4872 = vmatprep.mubr.msk.f32.mxu1 %vm5262_vm2, %v5261_v27 }
 0x2c1   :  { %4826 = vmatmul.mubr.msk.f32.gmra.mxu0 %vm622_vm3, %v5675_v22  ;;  %4873 = vmatmul.mubr.msk.f32.gmra.mxu1 %vm622_vm3, %v5675_v22 }
 0x2c2   :  { %4828 = vmatprep.mubr.msk.f32.mxu0 %vm5262_vm2, %v5261_v27  ;;  %4875 = vmatprep.mubr.msk.f32.mxu1 %vm5262_vm2, %v5261_v27 }
 0x2c5   :  { %4829 = vmatmul.mubr.msk.f32.gmra.mxu0 %vm622_vm3, %v5686_v28  ;;  %4876 = vmatmul.mubr.msk.f32.gmra.mxu1 %vm622_vm3, %v5686_v28 }
 0x2c6   :  { %4831 = vmatprep.mubr.msk.f32.mxu0 %vm5262_vm2, %v5261_v27  ;;  %4878 = vmatprep.mubr.msk.f32.mxu1 %vm5262_vm2, %v5261_v27 }
 0x2c9   :  { %4832 = vmatmul.mubr.msk.f32.gmra.mxu0 %vm622_vm3, %v5697_v33  ;;  %4879 = vmatmul.mubr.msk.f32.gmra.mxu1 %vm622_vm3, %v5697_v33 }
 0x2ca   :  { %4834 = vmatprep.mubr.msk.f32.mxu0 %vm5262_vm2, %v5261_v27  ;;  %4881 = vmatprep.mubr.msk.f32.mxu1 %vm5262_vm2, %v5261_v27 }
 0x2cd   :  { %v728_v47 = vpop.f32.mrf.mxu0  ;;  %v871_v55 = vpop.f32.mrf.mxu1  ;;  %4835 = vmatmul.mubr.msk.f32.gmra.mxu0 %vm622_vm3, %v5708_v37  ;;  %4882 = vmatmul.mubr.msk.f32.gmra.mxu1 %vm622_vm3, %v5708_v37 }
 0x2ce   :  { %4837 = vmatprep.mubr.msk.f32.mxu0 %vm5262_vm2, %v5261_v27  ;;  %4884 = vmatprep.mubr.msk.f32.mxu1 %vm5262_vm2, %v5261_v27  ;;  %v872_v43 = vadd.f32 %v6093_v36, %v871_v55  ;;  %v1221_v55 = vld [vmem:[#allocation6] sm:$0xff] }
 0x2cf   :  { %v4527_v62 = vpop.f32.mrf.mxu0  ;;  %v4574_v2 = vpop.f32.mrf.mxu1 }
 0x2d0   :  { %v1315_v53 = vmul.f32 0.1, %v872_v43  ;;  %v1235_v62 = vld [vmem:[#allocation6 + $0x68] sm:$0xff]  ;;  %v6123_v2 = vld [vmem:[#allocation6 + $0x140] sm:$0xff] }
 0x2d1   :  { %v733_v3 = vpop.f32.mrf.mxu0  ;;  %v876_v4 = vpop.f32.mrf.mxu1  ;;  %4838 = vmatmul.mubr.msk.f32.gmra.mxu0 %vm622_vm3, %v5719_v42  ;;  %4885 = vmatmul.mubr.msk.f32.gmra.mxu1 %vm622_vm3, %v5719_v42  ;;  %v729_v42 = vadd.f32 %v6088_v35, %v728_v47 }
 0x2d2   :  { %4840 = vmatprep.mubr.msk.f32.mxu0 %vm5262_vm2, %v5261_v27  ;;  %4887 = vmatprep.mubr.msk.f32.mxu1 %vm5262_vm2, %v5261_v27  ;;  %v734_v46 = vadd.f32 %v6088_v35, %v733_v3  ;;  %v6125_v3 = vld [vmem:[#allocation6 + $0xe0] sm:$0xff] }
 0x2d3   :  { %v4530_v5 = vpop.f32.mrf.mxu0  ;;  %v4577_v6 = vpop.f32.mrf.mxu1  ;;  %v1276_v52 = vmul.f32 0.1, %v729_v42 }
 0x2d4   :  { %v1277_v1 = vmul.f32 0.1, %v734_v46 }
 0x2d5   :  { %v738_v7 = vpop.f32.mrf.mxu0  ;;  %v881_v8 = vpop.f32.mrf.mxu1  ;;  %4841 = vmatmul.mubr.msk.f32.gmra.mxu0 %vm622_vm3, %v5730_v45  ;;  %4888 = vmatmul.mubr.msk.f32.gmra.mxu1 %vm622_vm3, %v5730_v45 }
 0x2d6   :  { %4843 = vmatprep.mubr.msk.f32.mxu0 %vm5262_vm2, %v5261_v27  ;;  %4890 = vmatprep.mubr.msk.f32.mxu1 %vm5262_vm2, %v5261_v27  ;;  %v739_v38 = vadd.f32 %v6088_v35, %v738_v7  ;;  %v882_v49 = vadd.f32 %v6093_v36, %v881_v8 }
 0x2d7   :  { %v4533_v9 = vpop.f32.mrf.mxu0  ;;  %v4580_v10 = vpop.f32.mrf.mxu1 }
 0x2d8   :  { %v1317_v5 = vmul.f32 0.1, %v882_v49  ;;  %v1289_v10 = vmul.f32 %v1276_v52, %v6110_v56 }
 0x2d9   :  { %v743_v11 = vpop.f32.mrf.mxu0  ;;  %v886_v12 = vpop.f32.mrf.mxu1  ;;  %4844 = vmatmul.mubr.msk.f32.gmra.mxu0 %vm622_vm3, %v5741_v48  ;;  %4891 = vmatmul.mubr.msk.f32.gmra.mxu1 %vm622_vm3, %v5741_v48  ;;  %v877_v48 = vadd.f32 %v6093_v36, %v876_v4  ;;  %v1278_v4 = vmul.f32 0.1, %v739_v38  ;;  %v6157_v38 = vld [vmem:[%s8705_s5 + $0x3] ss:$0 sm:$0xff] }
 0x2da   :  { %v744_v54 = vadd.f32 %v6088_v35, %v743_v11  ;;  %v887_v58 = vadd.f32 %v6093_v36, %v886_v12  ;;  %v1328_v11 = vmul.f32 %v1315_v53, %v6112_v57  ;;  %v6131_v12 = vld [vmem:[#allocation6 + $0x148] sm:$0xff]  ;;  %v6159_v49 = vadd.f32 %v1289_v10, %v1221_v55  ;;  %v6164_v53 = vld [vmem:[#allocation6 + $0xf8] sm:$0xff] }
 0x2db   :  { %v4536_v13 = vpop.f32.mrf.mxu0  ;;  %v4583_v14 = vpop.f32.mrf.mxu1  ;;  %v1316_v47 = vmul.f32 0.1, %v877_v48 }
 0x2dc   :  { %v6133_v13 = vld [vmem:[#allocation6 + $0xe8] sm:$0xff]  ;;  %v1279_v14 = vmul.f32 0.1, %v744_v54  ;;  %v6166_v54 = vld [vmem:[#allocation6 + $0x160] sm:$0xff] }
 0x2dd   :  { %v748_v15 = vpop.f32.mrf.mxu0  ;;  %v891_v16 = vpop.f32.mrf.mxu1 }
 0x2de   :  { %v749_v59 = vadd.f32 %v6088_v35, %v748_v15  ;;  %v892_v60 = vadd.f32 %v6093_v36, %v891_v16  ;;  %v6135_v15 = vld [vmem:[#allocation6 + $0x150] sm:$0xff]  ;;  %v1222_v16 = vld [vmem:[#allocation6 + $0x8] sm:$0xff]  ;;  %v1292_v52 = vmul.f32 %v1279_v14, %v6133_v13 }
 0x2df   :  { %v4539_v17 = vpop.f32.mrf.mxu0  ;;  %v4586_v18 = vpop.f32.mrf.mxu1 }
 0x2e0   :  { %v1236_v17 = vld [vmem:[#allocation6 + $0x70] sm:$0xff]  ;;  %v1318_v18 = vmul.f32 0.1, %v887_v58  ;;  %v1224_v58 = vld [vmem:[#allocation6 + $0x18] sm:$0xff] }
 0x2e1   :  { %v753_v19 = vpop.f32.mrf.mxu0  ;;  %v896_v20 = vpop.f32.mrf.mxu1 }
 0x2e2   :  { %v754_v6 = vadd.f32 %v6088_v35, %v753_v19  ;;  %v897_v7 = vadd.f32 %v6093_v36, %v896_v20  ;;  %v1319_v19 = vmul.f32 0.1, %v892_v60 }
 0x2e3   :  { %v4542_v21 = vpop.f32.mrf.mxu0  ;;  %v4589_v22 = vpop.f32.mrf.mxu1 }
 0x2e4   :  { %v1280_v21 = vmul.f32 0.1, %v749_v59  ;;  %v1281_v42 = vmul.f32 0.1, %v754_v6  ;;  %v1320_v43 = vmul.f32 0.1, %v897_v7  ;;  %v1331_v59 = vmul.f32 %v1318_v18, %v6135_v15 }
 0x2e5   :  { %v6073_v23 = vpop.f32.mrf.mxu0  ;;  %v6075_v27 = vpop.f32.mrf.mxu1  ;;  %v1238_v6 = vld [vmem:[#allocation6 + $0x80] sm:$0xff] }
 0x2e6   :  { %v1225_v7 = vld [vmem:[#allocation6 + $0x20] sm:$0xff]  ;;  %v1294_v18 = vmul.f32 %v1281_v42, %v6164_v53 }
 0x2e7   :  { %v4545_v24 = vpop.f32.mrf.mxu0  ;;  %v4592_v25 = vpop.f32.mrf.mxu1 }
 0x2e8   :  { %v1290_v24 = vmul.f32 %v1277_v1, %v6121_v0  ;;  %v1329_v25 = vmul.f32 %v1316_v47, %v6123_v2  ;;  %v759_v47 = vadd.f32 %v6088_v35, %v6073_v23  ;;  %v1333_v23 = vmul.f32 %v1320_v43, %v6166_v54 }
 0x2e9   :  { %v6077_v26 = vpop.f32.mrf.mxu0  ;;  %v6079_v28 = vpop.f32.mrf.mxu1 }
 0x2eb   :  { %v4548_v29 = vpop.f32.mrf.mxu0  ;;  %v4595_v30 = vpop.f32.mrf.mxu1 }
 0x2ec   :  { %v1223_v29 = vld [vmem:[#allocation6 + $0x10] sm:$0xff] }
 0x2ed   :  { %v6081_v31 = vpop.f32.mrf.mxu0  ;;  %v6083_v32 = vpop.f32.mrf.mxu1  ;;  %v6143_v30 = vld [vmem:[#allocation6 + $0xf0] sm:$0xff] }
 0x2ee   :  { %v1293_v60 = vmul.f32 %v1280_v21, %v6143_v30 }
 0x2ef   :  { %v4551_v33 = vpop.f32.mrf.mxu0  ;;  %v4598_v34 = vpop.f32.mrf.mxu1 }
 0x2f0   :  { %v6145_v33 = vld [vmem:[#allocation6 + $0x158] sm:$0xff]  ;;  %v6150_v34 = vld [vmem:[%s8705_s5 + $0x2] ss:$0 sm:$0xff] }
 0x2f1   :  { %v6095_v37 = vpop.f32.mrf.mxu0  ;;  %v6097_v39 = vpop.f32.mrf.mxu1  ;;  %v1332_v1 = vmul.f32 %v1319_v19, %v6145_v33  ;;  %v6185_v19 = vadd.f32 %v1292_v52, %v1224_v58 }
 0x2f3   :  { %v4554_v40 = vpop.f32.mrf.mxu0  ;;  %v4601_v41 = vpop.f32.mrf.mxu1 }
 0x2f4   :  { %v1291_v40 = vmul.f32 %v1278_v4, %v6125_v3  ;;  %v1330_v41 = vmul.f32 %v1317_v5, %v6131_v12  ;;  %v6173_v4 = vadd.f32 %v1290_v24, %v1222_v16  ;;  %v6175_v5 = vadd.f32 %v1329_v25, %v1236_v17  ;;  %v1226_v17 = vld [vmem:[#allocation6 + $0x28] sm:$0xff]  ;;  %v1240_v24 = vld [vmem:[#allocation6 + $0x90] sm:$0xff] }
 0x2f5   :  { %v6101_v44 = vpop.f32.mrf.mxu0  ;;  %v6103_v45 = vpop.f32.mrf.mxu1  ;;  %v902_v25 = vadd.f32 %v6093_v36, %v6075_v27  ;;  %v6199_v27 = vadd.f32 %v1294_v18, %v1226_v17  ;;  %v769_v18 = vadd.f32 %v6088_v35, %v6081_v31  ;;  %v917_v31 = vadd.f32 %v6093_v36, %v6097_v39  ;;  %v6227_v39 = vld [vmem:[#allocation6 + $0x110] sm:$0xff] }
 0x2f6   :  { %8782 = vst [vmem:[#allocation14_spill] sm:$0xff] %v6227_v39 }
 0x2f7   :  { %v4557_v50 = vpop.f32.mrf.mxu0  ;;  %v4604_v51 = vpop.f32.mrf.mxu1 }
 0x2f8   :  { %v6161_v50 = vadd.f32 %v1328_v11, %v1235_v62  ;;  %v1237_v51 = vld [vmem:[#allocation6 + $0x78] sm:$0xff]  ;;  %v6179_v11 = vadd.f32 %v1291_v40, %v1223_v29  ;;  %v6191_v29 = vadd.f32 %v1293_v60, %v1225_v7  ;;  %v907_v60 = vadd.f32 %v6093_v36, %v6079_v28  ;;  %v1227_v28 = vld [vmem:[#allocation6 + $0x30] sm:$0xff] }
 0x2f9   :  { %v6117_v61 = vpop.f32.mrf.mxu0  ;;  %v6119_v63 = vpop.f32.mrf.mxu1  ;;  %v6181_v14 = vadd.f32 %v1330_v41, %v1237_v51  ;;  %v1282_v41 = vmul.f32 0.1, %v759_v47  ;;  %v6195_v51 = vld [vmem:[#allocation6 + $0x100] sm:$0xff] }
 0x2fb   :  { %v4560_v8 = vpop.f32.mrf.mxu0  ;;  %v4607_v9 = vpop.f32.mrf.mxu1 }
 0x2fc   :  { %v1239_v8 = vld [vmem:[#allocation6 + $0x88] sm:$0xff] }
 0x2fd   :  { %v6137_v22 = vpop.f32.mrf.mxu0  ;;  %v6139_v20 = vpop.f32.mrf.mxu1  ;;  %v6193_v40 = vadd.f32 %v1332_v1, %v1239_v8 }
 0x2fe   :  { %8777 = vst [vmem:[#allocation9_spill] sm:$0xff] %v6137_v22  ;;  %8778 = vst [vmem:[#allocation10_spill] sm:$0xff] %v6139_v20 }
 0x2ff   :  { %v4563_v46 = vpop.f32.mrf.mxu0  ;;  %v4610_v48 = vpop.f32.mrf.mxu1 }
 0x301   :  { %v1014_v55 = vpop.f32.mrf.mxu0  ;;  %v1157_v62 = vpop.f32.mrf.mxu1 }
 0x302   :  { %v1015_v9 = vadd.f32 %v6150_v34, %v1014_v55  ;;  %v1158_v10 = vadd.f32 %v6157_v38, %v1157_v62  ;;  %v6189_v55 = vadd.f32 %v1331_v59, %v1238_v6  ;;  %v764_v59 = vadd.f32 %v6088_v35, %v6077_v26 }
 0x303   :  { %v4621_v21 = vpop.f32.mrf.mxu0  ;;  %v4668_v16 = vpop.f32.mrf.mxu1  ;;  %v1321_v6 = vmul.f32 0.1, %v902_v25 }
 0x304   :  { %v1354_v46 = vmul.f32 0.2, %v1015_v9  ;;  %v1406_v48 = vmul.f32 0.2, %v1158_v10  ;;  %v6201_v9 = vadd.f32 %v1333_v23, %v1240_v24  ;;  %v1295_v10 = vmul.f32 %v1282_v41, %v6195_v51  ;;  %v6208_v16 = vld [vmem:[#allocation6 + $0x168] sm:$0xff] }
 0x305   :  { %v1019_v42 = vpop.f32.mrf.mxu0  ;;  %v1162_v43 = vpop.f32.mrf.mxu1  ;;  %v912_v23 = vadd.f32 %v6093_v36, %v6083_v32  ;;  %v1322_v41 = vmul.f32 0.1, %v907_v60  ;;  %v1284_v60 = vmul.f32 0.1, %v769_v18 }
 0x306   :  { %v1367_v52 = vmul.f32 1.442695, %v1354_v46  ;;  %v1419_v58 = vmul.f32 1.442695, %v1406_v48  ;;  %v1020_v62 = vadd.f32 %v6150_v34, %v1019_v42  ;;  %v1163_v21 = vadd.f32 %v6157_v38, %v1162_v43 }
 0x307   :  { %v4624_v1 = vpop.f32.mrf.mxu0  ;;  %v4671_v47 = vpop.f32.mrf.mxu1  ;;  %v1283_v42 = vmul.f32 0.1, %v764_v59  ;;  %v774_v43 = vadd.f32 %v6088_v35, %v6095_v37  ;;  %v1241_v59 = vld [vmem:[#allocation6 + $0x98] sm:$0xff] }
 0x308   :  { %4932 = vpow2.f32 %v1367_v52  ;;  %v1355_v7 = vmul.f32 0.2, %v1020_v62  ;;  %v1407_v8 = vmul.f32 0.2, %v1163_v21  ;;  %v6221_v62 = vld [vmem:[#allocation6 + $0x108] sm:$0xff]  ;;  %v6223_v21 = vld [vmem:[#allocation6 + $0x170] sm:$0xff] }
 0x309   :  { %4934 = vpow2.f32 %v1419_v58  ;;  %v1024_v26 = vpop.f32.mrf.mxu0  ;;  %v1167_v17 = vpop.f32.mrf.mxu1  ;;  %v1334_v58 = vmul.f32 %v1321_v6, %v6208_v16  ;;  %8779 = vst [vmem:[#allocation11_spill] sm:$0xff] %v6221_v62  ;;  %8780 = vst [vmem:[#allocation12_spill] sm:$0xff] %v6223_v21  ;;  %v1335_v18 = vmul.f32 %v1322_v41, %v6223_v21  ;;  %v779_v41 = vadd.f32 %v6088_v35, %v6101_v44 }
 0x30a   :  { %v1369_v24 = vmul.f32 1.442695, %v1355_v7  ;;  %v1421_v46 = vmul.f32 1.442695, %v1407_v8  ;;  %v1025_v25 = vadd.f32 %v6150_v34, %v1024_v26  ;;  %v1168_v48 = vadd.f32 %v6157_v38, %v1167_v17  ;;  %v6229_v17 = vld [vmem:[#allocation6 + $0x178] sm:$0xff] }
 0x30b   :  { %v4627_v52 = vpop.f32.mrf.mxu0  ;;  %v4674_v32 = vpop.f32.mrf.mxu1  ;;  %v6225_v7 = vadd.f32 %v1295_v10, %v1227_v28  ;;  %v1323_v8 = vmul.f32 0.1, %v912_v23  ;;  %8783 = vst [vmem:[#allocation15_spill] sm:$0xff] %v6229_v17  ;;  %v1296_v10 = vmul.f32 %v1283_v42, %v6221_v62  ;;  %v1242_v28 = vld [vmem:[#allocation6 + $0xa0] sm:$0xff]  ;;  %v1285_v23 = vmul.f32 0.1, %v774_v43 }
 0x30c   :  { %4936 = vpow2.f32 %v1369_v24  ;;  %v1356_v1 = vmul.f32 0.2, %v1025_v25  ;;  %v1408_v47 = vmul.f32 0.2, %v1168_v48  ;;  %v1228_v25 = vld [vmem:[#allocation6 + $0x38] sm:$0xff]  ;;  %v6235_v22 = vadd.f32 %v1334_v58, %v1241_v59  ;;  %v1243_v58 = vld [vmem:[#allocation6 + $0xa8] sm:$0xff] }
 0x30d   :  { %8781 = vst [vmem:[#allocation13_spill] sm:$0xff] %v6225_v7  ;;  %4938 = vpow2.f32 %v1421_v46  ;;  %v1029_v37 = vpop.f32.mrf.mxu0  ;;  %v1172_v26 = vpop.f32.mrf.mxu1  ;;  %v1324_v46 = vmul.f32 0.1, %v917_v31  ;;  %v6237_v7 = vld [vmem:[#allocation6 + $0x118] sm:$0xff]  ;;  %v1336_v42 = vmul.f32 %v1323_v8, %v6229_v17  ;;  %v1229_v31 = vld [vmem:[#allocation6 + $0x40] sm:$0xff]  ;;  %v1230_v17 = vld [vmem:[#allocation6 + $0x48] sm:$0xff] }
 0x30e   :  { %v1371_v6 = vmul.f32 1.442695, %v1356_v1  ;;  %v1423_v52 = vmul.f32 1.442695, %v1408_v47  ;;  %v1030_v32 = vadd.f32 %v6150_v34, %v1029_v37  ;;  %v1173_v24 = vadd.f32 %v6157_v38, %v1172_v26  ;;  %v6239_v1 = vld [vmem:[#allocation6 + $0x180] sm:$0xff] }
 0x30f   :  { %v4630_v48 = vpop.f32.mrf.mxu0  ;;  %v4677_v20 = vpop.f32.mrf.mxu1  ;;  %8784 = vst [vmem:[#allocation16_spill] sm:$0xff] %v6239_v1  ;;  %v1297_v26 = vmul.f32 %v1284_v60, %v6227_v39  ;;  %v6249_v60 = vadd.f32 %v1335_v18, %v1242_v28  ;;  %v1298_v8 = vmul.f32 %v1285_v23, %v6237_v7  ;;  %v1337_v44 = vmul.f32 %v1324_v46, %v6239_v1  ;;  %v1244_v39 = vld [vmem:[#allocation6 + $0xb0] sm:$0xff]  ;;  %v6259_v46 = vld [vmem:[#allocation6 + $0x120] sm:$0xff] }
 0x310   :  { %4940 = vpow2.f32 %v1371_v6  ;;  %v1357_v47 = vmul.f32 0.2, %v1030_v32  ;;  %v1409_v37 = vmul.f32 0.2, %v1173_v24  ;;  %v6247_v32 = vadd.f32 %v1296_v10, %v1228_v25 }
 0x311   :  { %4942 = vpow2.f32 %v1423_v52  ;;  %v1034_v43 = vpop.f32.mrf.mxu0  ;;  %v1177_v20 = vpop.f32.mrf.mxu1  ;;  %v6257_v25 = vadd.f32 %v1336_v42, %v1243_v58  ;;  %v1286_v10 = vmul.f32 0.1, %v779_v41 }
 0x312   :  { %v1373_v59 = vmul.f32 1.442695, %v1357_v47  ;;  %v1425_v48 = vmul.f32 1.442695, %v1409_v37  ;;  %v1035_v21 = vadd.f32 %v6150_v34, %v1034_v43  ;;  %v1178_v6 = vadd.f32 %v6157_v38, %v1177_v20 }
 0x313   :  { %v4633_v24 = vpop.f32.mrf.mxu0  ;;  %v4680_v52 = vpop.f32.mrf.mxu1  ;;  %v922_v47 = vadd.f32 %v6093_v36, %v6103_v45  ;;  %v6255_v20 = vadd.f32 %v1297_v26, %v1229_v31  ;;  %8785 = vst [vmem:[#allocation17_spill] sm:$0xff] %v6257_v25 }
 0x314   :  { %4944 = vpow2.f32 %v1373_v59  ;;  %v1358_v37 = vmul.f32 0.2, %v1035_v21  ;;  %v1410_v43 = vmul.f32 0.2, %v1178_v6  ;;  %v6263_v21 = vadd.f32 %v1298_v8, %v1230_v17 }
 0x315   :  { %v4933_v62 = vpop.eup %4932  ;;  %4946 = vpow2.f32 %v1425_v48  ;;  %v1039_v28 = vpop.f32.mrf.mxu0  ;;  %v6265_v59 = vadd.f32 %v1337_v44, %v1244_v39  ;;  %v1325_v58 = vmul.f32 0.1, %v922_v47  ;;  %v6270_v44 = vld [vmem:[#allocation6 + $0x188] sm:$0xff] }
 0x316   :  { %v1182_v18 = vpop.f32.mrf.mxu1  ;;  %v4935_v23 = vpop.eup %4934  ;;  %v1393_v24 = vmul.f32 %v4933_v62, %v6110_v56  ;;  %v1375_v52 = vmul.f32 1.442695, %v1358_v37  ;;  %v1427_v1 = vmul.f32 1.442695, %v1410_v43  ;;  %v1040_v45 = vadd.f32 %v6150_v34, %v1039_v28 }
 0x317   :  { %v1445_v26 = vmul.f32 %v4935_v23, %v6112_v57  ;;  %v1183_v42 = vadd.f32 %v6157_v38, %v1182_v18  ;;  %v4636_v41 = vpop.f32.mrf.mxu0  ;;  %v1299_v56 = vmul.f32 %v1286_v10, %v6259_v46 }
 0x318   :  { %v4683_v31 = vpop.f32.mrf.mxu1  ;;  %v1458_v48 = vmul.f32 0.5, %v1393_v24  ;;  %4948 = vpow2.f32 %v1375_v52  ;;  %v1359_v6 = vmul.f32 0.2, %v1040_v45  ;;  %v784_v45 = vadd.f32 %v6088_v35, %v6117_v61 }
 0x319   :  { %v4937_v25 = vpop.eup %4936  ;;  %v1499_v62 = vmul.f32 0.5, %v1445_v26  ;;  %4950 = vpow2.f32 %v1427_v1  ;;  %v1411_v37 = vmul.f32 0.2, %v1183_v42  ;;  %v1044_v17 = vpop.f32.mrf.mxu0 }
 0x31a   :  { %v1187_v8 = vpop.f32.mrf.mxu1  ;;  %v4939_v39 = vpop.eup %4938  ;;  %v1471_v57 = vsub.f32 %v6159_v49, %v1458_v48  ;;  %v1539_v43 = vadd.f32 %v1458_v48, %v6159_v49  ;;  %v1394_v47 = vmul.f32 %v4937_v25, %v6121_v0  ;;  %v1377_v28 = vmul.f32 1.442695, %v1359_v6  ;;  %v1231_v48 = vld [vmem:[#allocation6 + $0x50] sm:$0xff] }
 0x31b   :  { %v1512_v18 = vsub.f32 %v6161_v50, %v1499_v62  ;;  %v1566_v23 = vadd.f32 %v1499_v62, %v6161_v50  ;;  %v1446_v10 = vmul.f32 %v4939_v39, %v6123_v2  ;;  %v1429_v1 = vmul.f32 1.442695, %v1411_v37  ;;  %v4639_v24 = vpop.f32.mrf.mxu0 }
 0x31c   :  { %v4686_v52 = vpop.f32.mrf.mxu1  ;;  %1485 = vst.msk [vmem:[%s8709_s9] sm:$0xff] %vm1484_vm4, %v1471_v57  ;;  %4064 = vst.msk [vmem:[%s8709_s9 + $0xd0] sm:$0xff] %vm1484_vm4, %v1539_v43  ;;  %v1459_v0 = vmul.f32 0.5, %v1394_v47  ;;  %4952 = vpow2.f32 %v1377_v28  ;;  %v1045_v49 = vadd.f32 %v6150_v34, %v1044_v17  ;;  %v1188_v50 = vadd.f32 %v6157_v38, %v1187_v8 }
 0x31d   :  { %v4941_v2 = vpop.eup %4940  ;;  %v1338_v25 = vmul.f32 %v1325_v58, %v6270_v44  ;;  %4051 = vst.msk [vmem:[%s8709_s9 + $0x68] sm:$0xff] %vm1484_vm4, %v1512_v18  ;;  %4077 = vst.msk [vmem:[%s8709_s9 + $0x138] sm:$0xff] %vm1484_vm4, %v1566_v23  ;;  %v1500_v26 = vmul.f32 0.5, %v1446_v10  ;;  %4954 = vpow2.f32 %v1429_v1  ;;  %v1049_v42 = vpop.f32.mrf.mxu0  ;;  %v6315_v28 = vadd.f32 %v1299_v56, %v1231_v48  ;;  %v1245_v52 = vld [vmem:[#allocation6 + $0xb8] sm:$0xff] }
 0x31e   :  { %v1192_v41 = vpop.f32.mrf.mxu1  ;;  %v4943_v31 = vpop.eup %4942  ;;  %v1472_v58 = vsub.f32 %v6173_v4, %v1459_v0  ;;  %v1540_v61 = vadd.f32 %v1459_v0, %v6173_v4  ;;  %v1395_v6 = vmul.f32 %v4941_v2, %v6125_v3  ;;  %v1360_v62 = vmul.f32 0.2, %v1045_v49 }
 0x31f   :  { %v1513_v37 = vsub.f32 %v6175_v5, %v1500_v26  ;;  %v1567_v17 = vadd.f32 %v1500_v26, %v6175_v5  ;;  %v1447_v8 = vmul.f32 %v4943_v31, %v6131_v12  ;;  %v1412_v39 = vmul.f32 0.2, %v1188_v50  ;;  %v4642_v57 = vpop.f32.mrf.mxu0 }
 0x320   :  { %v4689_v43 = vpop.f32.mrf.mxu1  ;;  %1486 = vst.msk [vmem:[%s8709_s9 + $0x8] sm:$0xff] %vm1484_vm4, %v1472_v58  ;;  %4065 = vst.msk [vmem:[%s8709_s9 + $0xd8] sm:$0xff] %vm1484_vm4, %v1540_v61  ;;  %v1460_v3 = vmul.f32 0.5, %v1395_v6  ;;  %v1379_v4 = vmul.f32 1.442695, %v1360_v62  ;;  %v1050_v47 = vadd.f32 %v6150_v34, %v1049_v42  ;;  %v1193_v5 = vadd.f32 %v6157_v38, %v1192_v41 }
 0x321   :  { %v4945_v12 = vpop.eup %4944  ;;  %v6319_v18 = vadd.f32 %v6093_v36, %v6119_v63  ;;  %4052 = vst.msk [vmem:[%s8709_s9 + $0x70] sm:$0xff] %vm1484_vm4, %v1513_v37  ;;  %4078 = vst.msk [vmem:[%s8709_s9 + $0x140] sm:$0xff] %vm1484_vm4, %v1567_v17  ;;  %v1501_v23 = vmul.f32 0.5, %v1447_v8  ;;  %v1431_v10 = vmul.f32 1.442695, %v1412_v39  ;;  %v1054_v1 = vpop.f32.mrf.mxu0 }
 0x322   :  { %v1197_v24 = vpop.f32.mrf.mxu1  ;;  %v4947_v56 = vpop.eup %4946  ;;  %v1473_v0 = vsub.f32 %v6179_v11, %v1460_v3  ;;  %v1541_v63 = vadd.f32 %v1460_v3, %v6179_v11  ;;  %v1396_v49 = vmul.f32 %v4945_v12, %v6133_v13  ;;  %4956 = vpow2.f32 %v1379_v4 }
 0x323   :  { %v1514_v50 = vsub.f32 %v6181_v14, %v1501_v23  ;;  %v1568_v2 = vadd.f32 %v1501_v23, %v6181_v14  ;;  %v1448_v26 = vmul.f32 %v4947_v56, %v6135_v15  ;;  %4958 = vpow2.f32 %v1431_v10  ;;  %v4645_v42 = vpop.f32.mrf.mxu0 }
 0x324   :  { %v4692_v41 = vpop.f32.mrf.mxu1  ;;  %1487 = vst.msk [vmem:[%s8709_s9 + $0x10] sm:$0xff] %vm1484_vm4, %v1473_v0  ;;  %4066 = vst.msk [vmem:[%s8709_s9 + $0xe0] sm:$0xff] %vm1484_vm4, %v1541_v63  ;;  %v1461_v13 = vmul.f32 0.5, %v1396_v49  ;;  %v1361_v11 = vmul.f32 0.2, %v1050_v47  ;;  %v1055_v14 = vadd.f32 %v6150_v34, %v1054_v1  ;;  %v6344_v15 = vadd.f32 %v1338_v25, %v1245_v52 }
 0x325   :  { %v1413_v31 = vmul.f32 0.2, %v1193_v5  ;;  %v4949_v48 = vpop.eup %4948  ;;  %v6346_v58 = vmul.f32 0.1, %v784_v45  ;;  %4053 = vst.msk [vmem:[%s8709_s9 + $0x78] sm:$0xff] %vm1484_vm4, %v1514_v50  ;;  %4079 = vst.msk [vmem:[%s8709_s9 + $0x148] sm:$0xff] %vm1484_vm4, %v1568_v2  ;;  %v1198_v6 = vadd.f32 %v6157_v38, %v1197_v24  ;;  %v1059_v62 = vpop.f32.mrf.mxu0 }
 0x326   :  { %v1502_v61 = vmul.f32 0.5, %v1448_v26  ;;  %v1202_v37 = vpop.f32.mrf.mxu1  ;;  %v4951_v17 = vpop.eup %4950  ;;  %v1474_v25 = vsub.f32 %v6185_v19, %v1461_v13  ;;  %v1542_v45 = vadd.f32 %v1461_v13, %v6185_v19  ;;  %v1397_v8 = vmul.f32 %v4949_v48, %v6143_v30 }
 0x327   :  { %v1381_v39 = vmul.f32 1.442695, %v1361_v11  ;;  %v1449_v3 = vmul.f32 %v4951_v17, %v6145_v33  ;;  %v1433_v4 = vmul.f32 1.442695, %v1413_v31  ;;  %v4648_v47 = vpop.f32.mrf.mxu0  ;;  %v1362_v19 = vmul.f32 0.2, %v1055_v14 }
 0x328   :  { %v1515_v57 = vsub.f32 %v6189_v55, %v1502_v61  ;;  %v1569_v43 = vadd.f32 %v1502_v61, %v6189_v55  ;;  %v4695_v5 = vpop.f32.mrf.mxu1  ;;  %1488 = vst.msk [vmem:[%s8709_s9 + $0x18] sm:$0xff] %vm1484_vm4, %v1474_v25  ;;  %4067 = vst.msk [vmem:[%s8709_s9 + $0xe8] sm:$0xff] %vm1484_vm4, %v1542_v45  ;;  %v1462_v30 = vmul.f32 0.5, %v1397_v8  ;;  %v1414_v12 = vmul.f32 0.2, %v1198_v6 }
 0x329   :  { %4960 = vpow2.f32 %v1381_v39  ;;  %v4953_v55 = vpop.eup %4952  ;;  %v1503_v33 = vmul.f32 0.5, %v1449_v3  ;;  %v1060_v23 = vadd.f32 %v6150_v34, %v1059_v62  ;;  %v1203_v10 = vadd.f32 %v6157_v38, %v1202_v37  ;;  %v1064_v1 = vpop.f32.mrf.mxu0 }
 0x32a   :  { %4054 = vst.msk [vmem:[%s8709_s9 + $0x80] sm:$0xff] %vm1484_vm4, %v1515_v57  ;;  %4080 = vst.msk [vmem:[%s8709_s9 + $0x150] sm:$0xff] %vm1484_vm4, %v1569_v43  ;;  %4962 = vpow2.f32 %v1433_v4  ;;  %v1207_v24 = vpop.f32.mrf.mxu1  ;;  %v4955_v56 = vpop.eup %4954  ;;  %v1475_v52 = vsub.f32 %v6191_v29, %v1462_v30  ;;  %v1543_v0 = vadd.f32 %v1462_v30, %v6191_v29  ;;  %v1398_v63 = vmul.f32 %v4953_v55, %v6164_v53 }
 0x32b   :  { %v1383_v49 = vmul.f32 1.442695, %v1362_v19  ;;  %v1516_v50 = vsub.f32 %v6193_v40, %v1503_v33  ;;  %v1570_v2 = vadd.f32 %v1503_v33, %v6193_v40  ;;  %v1450_v26 = vmul.f32 %v4955_v56, %v6166_v54  ;;  %v4651_v41 = vpop.f32.mrf.mxu0 }
 0x32c   :  { %v1435_v42 = vmul.f32 1.442695, %v1414_v12  ;;  %v4698_v13 = vpop.f32.mrf.mxu1  ;;  %1489 = vst.msk [vmem:[%s8709_s9 + $0x20] sm:$0xff] %vm1484_vm4, %v1475_v52  ;;  %4068 = vst.msk [vmem:[%s8709_s9 + $0xf0] sm:$0xff] %vm1484_vm4, %v1543_v0  ;;  %v1463_v53 = vmul.f32 0.5, %v1398_v63  ;;  %v1065_v40 = vadd.f32 %v6150_v34, %v1064_v1  ;;  %v1208_v31 = vadd.f32 %v6157_v38, %v1207_v24  ;;  %v6437_v0 = vld [vmem:[#allocation6 + $0x128] sm:$0xff] }
 0x32d   :  { %4964 = vpow2.f32 %v1383_v49  ;;  %v1363_v29 = vmul.f32 0.2, %v1060_v23  ;;  %v1415_v11 = vmul.f32 0.2, %v1203_v10  ;;  %4055 = vst.msk [vmem:[%s8709_s9 + $0x88] sm:$0xff] %vm1484_vm4, %v1516_v50  ;;  %4081 = vst.msk [vmem:[%s8709_s9 + $0x158] sm:$0xff] %vm1484_vm4, %v1570_v2  ;;  %v1069_v14 = vpop.f32.mrf.mxu0 }
 0x32e   :  { %v1504_v54 = vmul.f32 0.5, %v1450_v26  ;;  %4966 = vpow2.f32 %v1435_v42  ;;  %v1212_v48 = vpop.f32.mrf.mxu1  ;;  %v1476_v61 = vsub.f32 %v6199_v27, %v1463_v53  ;;  %v1544_v6 = vadd.f32 %v1463_v53, %v6199_v27  ;;  %v8786_v63 = vld [vmem:[#allocation13_spill] sm:$0xff] }
 0x32f   :  { %v1385_v62 = vmul.f32 1.442695, %v1363_v29  ;;  %v1437_v37 = vmul.f32 1.442695, %v1415_v11  ;;  %v4957_v17 = vpop.eup %4956  ;;  %v1364_v8 = vmul.f32 0.2, %v1065_v40  ;;  %v4654_v57 = vpop.f32.mrf.mxu0  ;;  %v1213_v4 = vadd.f32 %v6157_v38, %v1212_v48 }
 0x330   :  { %v1517_v25 = vsub.f32 %v6201_v9, %v1504_v54  ;;  %v1571_v45 = vadd.f32 %v1504_v54, %v6201_v9  ;;  %v1416_v39 = vmul.f32 0.2, %v1208_v31  ;;  %v4701_v43 = vpop.f32.mrf.mxu1  ;;  %v4959_v3 = vpop.eup %4958  ;;  %1490 = vst.msk [vmem:[%s8709_s9 + $0x28] sm:$0xff] %vm1484_vm4, %v1476_v61  ;;  %4069 = vst.msk [vmem:[%s8709_s9 + $0xf8] sm:$0xff] %vm1484_vm4, %v1544_v6  ;;  %v1399_v27 = vmul.f32 %v4957_v17, %v6195_v51  ;;  %v6446_v13 = vld [vmem:[%s8707_s7 + $0x1] ss:$0 sm:$0xff] }
 0x331   :  { %4968 = vpow2.f32 %v1385_v62  ;;  %v1070_v9 = vadd.f32 %v6150_v34, %v1069_v14  ;;  %v1451_v47 = vmul.f32 %v4959_v3, %v6208_v16  ;;  %v1387_v5 = vmul.f32 1.442695, %v1364_v8  ;;  %v1074_v30 = vpop.f32.mrf.mxu0  ;;  %v6435_v16 = vld [vmem:[%s8707_s7] ss:$0 sm:$0xff]  ;;  %v6448_v11 = vld [vmem:[#allocation6 + $0x190] sm:$0xff]  ;;  %v8788_v48 = vld [vmem:[#allocation12_spill] sm:$0xff] }
 0x332   :  { %4056 = vst.msk [vmem:[%s8709_s9 + $0x90] sm:$0xff] %vm1484_vm4, %v1517_v25  ;;  %4082 = vst.msk [vmem:[%s8709_s9 + $0x160] sm:$0xff] %vm1484_vm4, %v1571_v45  ;;  %4970 = vpow2.f32 %v1437_v37  ;;  %v1439_v51 = vmul.f32 1.442695, %v1416_v39  ;;  %v1217_v19 = vpop.f32.mrf.mxu1  ;;  %v1464_v12 = vmul.f32 0.5, %v1399_v27  ;;  %v1075_v23 = vadd.f32 %v6150_v34, %v1074_v30  ;;  %v8789_v57 = vld [vmem:[#allocation9_spill] sm:$0xff] }
 0x333   :  { %v1365_v55 = vmul.f32 0.2, %v1070_v9  ;;  %v1417_v33 = vmul.f32 0.2, %v1213_v4  ;;  %v1326_v10 = vmul.f32 0.1, %v6319_v18  ;;  %4972 = vpow2.f32 %v1387_v5  ;;  %v4657_v56 = vpop.f32.mrf.mxu0 }
 0x334   :  { %v1505_v1 = vmul.f32 0.5, %v1451_v47  ;;  %v1218_v24 = vadd.f32 %v6157_v38, %v1217_v19  ;;  %v4704_v52 = vpop.f32.mrf.mxu1  ;;  %v1477_v49 = vsub.f32 %v8786_v63, %v1464_v12  ;;  %v1545_v50 = vadd.f32 %v1464_v12, %v8786_v63  ;;  %v1232_v47 = vld [vmem:[#allocation6 + $0x58] sm:$0xff]  ;;  %v8790_v30 = vld [vmem:[#allocation14_spill] sm:$0xff]  ;;  %v1246_v12 = vld [vmem:[#allocation6 + $0xc0] sm:$0xff] }
 0x335   :  { %4974 = vpow2.f32 %v1439_v51  ;;  %v1389_v34 = vmul.f32 1.442695, %v1365_v55  ;;  %v1441_v26 = vmul.f32 1.442695, %v1417_v33  ;;  %v1366_v42 = vmul.f32 0.2, %v1075_v23  ;;  %v1672_v41 = vpop.f32.mrf.mxu0 }
 0x336   :  { %v4961_v18 = vpop.eup %4960  ;;  %v1518_v2 = vsub.f32 %v6235_v22, %v1505_v1  ;;  %v1572_v38 = vadd.f32 %v1505_v1, %v6235_v22  ;;  %v2262_v53 = vpop.f32.mrf.mxu1  ;;  %1491 = vst.msk [vmem:[%s8709_s9 + $0x30] sm:$0xff] %vm1484_vm4, %v1477_v49  ;;  %4070 = vst.msk [vmem:[%s8709_s9 + $0x100] sm:$0xff] %vm1484_vm4, %v1545_v50  ;;  %v8787_v22 = vld [vmem:[#allocation11_spill] sm:$0xff]  ;;  %v1418_v40 = vmul.f32 0.2, %v1218_v24  ;;  %v6460_v31 = vadd.f32 %v6435_v16, %v1672_v41  ;;  %v8792_v56 = vld [vmem:[#allocation10_spill] sm:$0xff] }
 0x337   :  { %v4963_v29 = vpop.eup %4962  ;;  %v1400_v54 = vmul.f32 %v4961_v18, %v8787_v22  ;;  %4976 = vpow2.f32 %v1389_v34  ;;  %v1300_v14 = vmul.f32 %v6346_v58, %v6437_v0  ;;  %v1391_v6 = vmul.f32 1.442695, %v1366_v42  ;;  %v4715_v62 = vpop.f32.mrf.mxu0  ;;  %v6519_v41 = vld [vmem:[#allocation6 + $0x130] sm:$0xf] }
 0x338   :  { %4057 = vst.msk [vmem:[%s8709_s9 + $0x98] sm:$0xff] %vm1484_vm4, %v1518_v2  ;;  %4083 = vst.msk [vmem:[%s8709_s9 + $0x168] sm:$0xff] %vm1484_vm4, %v1572_v38  ;;  %v1452_v61 = vmul.f32 %v4963_v29, %v8788_v48  ;;  %4978 = vpow2.f32 %v1441_v26  ;;  %v4762_v37 = vpop.f32.mrf.mxu1  ;;  %v1443_v25 = vmul.f32 1.442695, %v1418_v40  ;;  %v6474_v58 = vadd.f32 %v6446_v13, %v2262_v53  ;;  %v8794_v48 = vld [vmem:[#allocation16_spill] sm:$0xff] }
 0x339   :  { %v1465_v17 = vmul.f32 0.5, %v1400_v54  ;;  %v1737_v45 = vsel %vm1736_vm5, %v6460_v31, -inf  ;;  %v1339_v39 = vmul.f32 %v1326_v10, %v6448_v11  ;;  %v789_v43 = vadd.f32 %v6088_v35, %v8789_v57  ;;  %v1677_v9 = vpop.f32.mrf.mxu0  ;;  %v8791_v35 = vld [vmem:[#allocation15_spill] sm:$0xff]  ;;  %v8793_v54 = vld [vmem:[#allocation17_spill] sm:$0xff]  ;;  %v1275_v57 = vld [vmem:[#allocation6 + $0x198] sm:$0xf] }
 0x33a   :  { %v4965_v8 = vpop.eup %4964  ;;  %v1506_v3 = vmul.f32 0.5, %v1452_v61  ;;  %4980 = vpow2.f32 %v1391_v6  ;;  %v2267_v27 = vpop.f32.mrf.mxu1  ;;  %1738 = vmax.xlane.f32.xlu0 %v1737_v45  ;;  %v932_v52 = vadd.f32 %v6093_v36, %v8792_v56  ;;  %v2326_v63 = vsel %vm1736_vm5, %v6474_v58, -inf }
 0x33b   :  { %v4967_v4 = vpop.eup %4966  ;;  %v1478_v5 = vsub.f32 %v6247_v32, %v1465_v17  ;;  %v1546_v51 = vadd.f32 %v1465_v17, %v6247_v32  ;;  %v1401_v19 = vmul.f32 %v4965_v8, %v8790_v30  ;;  %4982 = vpow2.f32 %v1443_v25  ;;  %v4718_v1 = vpop.f32.mrf.mxu0 }
 0x33c   :  { %v1519_v55 = vsub.f32 %v6249_v60, %v1506_v3  ;;  %v1573_v33 = vadd.f32 %v1506_v3, %v6249_v60  ;;  %v1453_v23 = vmul.f32 %v4967_v4, %v8791_v35  ;;  %v6488_v10 = vadd.f32 %v6446_v13, %v2267_v27  ;;  %v4765_v24 = vpop.f32.mrf.mxu1 }
 0x33d   :  { %1492 = vst.msk [vmem:[%s8709_s9 + $0x38] sm:$0xff] %vm1484_vm4, %v1478_v5  ;;  %4071 = vst.msk [vmem:[%s8709_s9 + $0x108] sm:$0xff] %vm1484_vm4, %v1546_v51  ;;  %v1466_v32 = vmul.f32 0.5, %v1401_v19  ;;  %v6501_v60 = vadd.f32 %v6435_v16, %v1677_v9  ;;  %v6505_v50 = vadd.f32 %v1300_v14, %v1232_v47  ;;  %v1288_v36 = vmul.f32 0.1, %v789_v43  ;;  %v1682_v38 = vpop.f32.mrf.mxu0 }
 0x33e   :  { %v4969_v49 = vpop.eup %4968  ;;  %4058 = vst.msk [vmem:[%s8709_s9 + $0xa0] sm:$0xff] %vm1484_vm4, %v1519_v55  ;;  %4084 = vst.msk [vmem:[%s8709_s9 + $0x170] sm:$0xff] %vm1484_vm4, %v1573_v33  ;;  %v1507_v34 = vmul.f32 0.5, %v1453_v23  ;;  %v2329_v18 = vsel %vm1736_vm5, %v6488_v10, -inf  ;;  %v2272_v2 = vpop.f32.mrf.mxu1  ;;  %2327 = vmax.xlane.f32.xlu0 %v2326_v63  ;;  %v6517_v42 = vadd.f32 %v1339_v39, %v1246_v12  ;;  %v6528_v6 = vadd.f32 %v6435_v16, %v1682_v38  ;;  %v1233_v12 = vld [vmem:[#allocation6 + $0x60] sm:$0xf] }
 0x33f   :  { %v4971_v26 = vpop.eup %4970  ;;  %v1479_v53 = vsub.f32 %v6255_v20, %v1466_v32  ;;  %v1547_v29 = vadd.f32 %v1466_v32, %v6255_v20  ;;  %v1402_v22 = vmul.f32 %v4969_v49, %v6237_v7  ;;  %2330 = vmax.xlane.f32.xlu1 %v2329_v18  ;;  %v4721_v62 = vpop.f32.mrf.mxu0  ;;  %v1327_v25 = vmul.f32 0.1, %v932_v52 }
 0x340   :  { %v1520_v40 = vsub.f32 %v8793_v54, %v1507_v34  ;;  %v1574_v14 = vadd.f32 %v1507_v34, %v8793_v54  ;;  %v1454_v61 = vmul.f32 %v4971_v26, %v8794_v48  ;;  %v4768_v37 = vpop.f32.mrf.mxu1  ;;  %v4973_v17 = vpop.eup %4972  ;;  %v6539_v20 = vadd.f32 %v6446_v13, %v2272_v2 }
 0x341   :  { %1493 = vst.msk [vmem:[%s8709_s9 + $0x40] sm:$0xff] %vm1484_vm4, %v1479_v53  ;;  %4072 = vst.msk [vmem:[%s8709_s9 + $0x110] sm:$0xff] %vm1484_vm4, %v1547_v29  ;;  %v1467_v7 = vmul.f32 0.5, %v1402_v22  ;;  %v1740_v45 = vsel %vm1736_vm5, %v6501_v60, -inf  ;;  %v1301_v39 = vmul.f32 %v1288_v36, %v6519_v41  ;;  %v1403_v3 = vmul.f32 %v4973_v17, %v6259_v46  ;;  %v1687_v4 = vpop.f32.mrf.mxu0  ;;  %v1247_v29 = vld [vmem:[#allocation6 + $0xc8] sm:$0xf] }
 0x342   :  { %v4975_v8 = vpop.eup %4974  ;;  %4059 = vst.msk [vmem:[%s8709_s9 + $0xa8] sm:$0xff] %vm1484_vm4, %v1520_v40  ;;  %4085 = vst.msk [vmem:[%s8709_s9 + $0x178] sm:$0xff] %vm1484_vm4, %v1574_v14  ;;  %v1508_v43 = vmul.f32 0.5, %v1454_v61  ;;  %v2277_v27 = vpop.f32.mrf.mxu1  ;;  %1741 = vmax.xlane.f32.xlu0 %v1740_v45  ;;  %v1743_v9 = vsel %vm1736_vm5, %v6528_v6, -inf  ;;  %v6564_v35 = vadd.f32 %v6435_v16, %v1687_v4  ;;  %v2332_v56 = vsel %vm1736_vm5, %v6539_v20, -inf }
 0x343   :  { %v1480_v47 = vsub.f32 %v6263_v21, %v1467_v7  ;;  %v1548_v5 = vadd.f32 %v1467_v7, %v6263_v21  ;;  %v1455_v51 = vmul.f32 %v4975_v8, %v6270_v44  ;;  %v6559_v30 = vadd.f32 %v6446_v13, %v2277_v27  ;;  %1744 = vmax.xlane.f32.xlu1 %v1743_v9  ;;  %v4724_v23 = vpop.f32.mrf.mxu0 }
 0x344   :  { %v4977_v19 = vpop.eup %4976  ;;  %v1521_v46 = vsub.f32 %v6265_v59, %v1508_v43  ;;  %v1575_v55 = vadd.f32 %v1508_v43, %v6265_v59  ;;  %v1468_v33 = vmul.f32 0.5, %v1403_v3  ;;  %v4771_v1 = vpop.f32.mrf.mxu1  ;;  %v1340_v21 = vmul.f32 %v1327_v25, %v1275_v57 }
 0x345   :  { %v4979_v24 = vpop.eup %4978  ;;  %1494 = vst.msk [vmem:[%s8709_s9 + $0x48] sm:$0xff] %vm1484_vm4, %v1480_v47  ;;  %4073 = vst.msk [vmem:[%s8709_s9 + $0x118] sm:$0xff] %vm1484_vm4, %v1548_v5  ;;  %v1509_v44 = vmul.f32 0.5, %v1455_v51  ;;  %v1404_v59 = vmul.f32 %v4977_v19, %v6437_v0  ;;  %v1746_v49 = vsel %vm1736_vm5, %v6564_v35, -inf  ;;  %v1692_v36 = vpop.f32.mrf.mxu0  ;;  %v1314_v18 = vadd.f32 %v1301_v39, %v1233_v12 }
 0x346   :  { %4060 = vst.msk [vmem:[%s8709_s9 + $0xb0] sm:$0xff] %vm1484_vm4, %v1521_v46  ;;  %4086 = vst.msk [vmem:[%s8709_s9 + $0x180] sm:$0xff] %vm1484_vm4, %v1575_v55  ;;  %v1481_v52 = vsub.f32 %v6315_v28, %v1468_v33  ;;  %v1549_v32 = vadd.f32 %v1468_v33, %v6315_v28  ;;  %v1456_v63 = vmul.f32 %v4979_v24, %v6448_v11  ;;  %v2282_v0 = vpop.f32.mrf.mxu1  ;;  %2333 = vmax.xlane.f32.xlu0 %v2332_v56 }
 0x347   :  { %v4981_v34 = vpop.eup %4980  ;;  %v1522_v2 = vsub.f32 %v6344_v15, %v1509_v44  ;;  %v1576_v38 = vadd.f32 %v1509_v44, %v6344_v15  ;;  %v1469_v26 = vmul.f32 0.5, %v1404_v59  ;;  %1747 = vmax.xlane.f32.xlu1 %v1746_v49  ;;  %v6602_v22 = vadd.f32 %v6435_v16, %v1692_v36  ;;  %v4727_v15 = vpop.f32.mrf.mxu0 }
 0x348   :  { %v4983_v53 = vpop.eup %4982  ;;  %1495 = vst.msk [vmem:[%s8709_s9 + $0x50] sm:$0xff] %vm1484_vm4, %v1481_v52  ;;  %4074 = vst.msk [vmem:[%s8709_s9 + $0x120] sm:$0xff] %vm1484_vm4, %v1549_v32  ;;  %v1510_v28 = vmul.f32 0.5, %v1456_v63  ;;  %v1405_v11 = vmul.f32 %v4981_v34, %v6519_v41  ;;  %v4774_v54 = vpop.f32.mrf.mxu1  ;;  %v2335_v40 = vsel %vm1736_vm5, %v6559_v30, -inf  ;;  %v6617_v61 = vadd.f32 %v6446_v13, %v2282_v0 }
 0x349   :  { %4061 = vst.msk [vmem:[%s8709_s9 + $0xb8] sm:$0xff] %vm1484_vm4, %v1522_v2  ;;  %4087 = vst.msk [vmem:[%s8709_s9 + $0x188] sm:$0xff] %vm1484_vm4, %v1576_v38  ;;  %v1482_v41 = vsub.f32 %v6505_v50, %v1469_v26  ;;  %v1550_v14 = vadd.f32 %v1469_v26, %v6505_v50  ;;  %v1457_v48 = vmul.f32 %v4983_v53, %v1275_v57  ;;  %v1749_v7 = vsel %vm1736_vm5, %v6602_v22, -inf  ;;  %v1697_v45 = vpop.f32.mrf.mxu0 }
 0x34a   :  { %v1523_v62 = vsub.f32 %v6517_v42, %v1510_v28  ;;  %v1577_v37 = vadd.f32 %v1510_v28, %v6517_v42  ;;  %v1470_v17 = vmul.f32 0.5, %v1405_v11  ;;  %v2287_v25 = vpop.f32.mrf.mxu1  ;;  %v1353_v8 = vadd.f32 %v1340_v21, %v1247_v29  ;;  %1750 = vmax.xlane.f32.xlu0 %v1749_v7 }
 0x34b   :  { %1496 = vst.msk [vmem:[%s8709_s9 + $0x58] sm:$0xff] %vm1484_vm4, %v1482_v41  ;;  %4075 = vst.msk [vmem:[%s8709_s9 + $0x128] sm:$0xff] %vm1484_vm4, %v1550_v14  ;;  %v1511_v50 = vmul.f32 0.5, %v1457_v48  ;;  %2336 = vmax.xlane.f32.xlu1 %v2335_v40  ;;  %v6632_v42 = vadd.f32 %v6435_v16, %v1697_v45  ;;  %v4730_v43 = vpop.f32.mrf.mxu0  ;;  %v6653_v47 = vadd.f32 %v6446_v13, %v2287_v25  ;;  %v2338_v51 = vsel %vm1736_vm5, %v6617_v61, -inf }
 0x34c   :  { %4062 = vst.msk [vmem:[%s8709_s9 + $0xc0] sm:$0xff] %vm1484_vm4, %v1523_v62  ;;  %4088 = vst.msk [vmem:[%s8709_s9 + $0x190] sm:$0xff] %vm1484_vm4, %v1577_v37  ;;  %v1483_v39 = vsub.f32 %v1314_v18, %v1470_v17  ;;  %v1551_v57 = vadd.f32 %v1470_v17, %v1314_v18  ;;  %v4777_v3 = vpop.f32.mrf.mxu1 }
 0x34d   :  { %v1524_v27 = vsub.f32 %v1353_v8, %v1511_v50  ;;  %v1578_v9 = vadd.f32 %v1511_v50, %v1353_v8  ;;  %v1752_v4 = vsel %vm1736_vm5, %v6632_v42, -inf  ;;  %v1702_v19 = vpop.f32.mrf.mxu0  ;;  %v2341_v24 = vsel %vm1736_vm5, %v6653_v47, -inf }
 0x34e   :  { %1498 = vst.msk [vmem:[%s8709_s9 + $0x60] sm:$0xf] %vm1497_vm6, %v1483_v39  ;;  %4076 = vst.msk [vmem:[%s8709_s9 + $0x130] sm:$0xf] %vm1497_vm6, %v1551_v57  ;;  %v2292_v5 = vpop.f32.mrf.mxu1  ;;  %2339 = vmax.xlane.f32.xlu0 %v2338_v51  ;;  %v6666_v12 = vadd.f32 %v6435_v16, %v1702_v19 }
 0x34f   :  { %4063 = vst.msk [vmem:[%s8709_s9 + $0xc8] sm:$0xf] %vm1497_vm6, %v1524_v27  ;;  %4089 = vst.msk [vmem:[%s8709_s9 + $0x198] sm:$0xf] %vm1497_vm6, %v1578_v9  ;;  %1753 = vmax.xlane.f32.xlu1 %v1752_v4  ;;  %v4733_v46 = vpop.f32.mrf.mxu0  ;;  %v6671_v23 = vadd.f32 %v6446_v13, %v2292_v5 }
 0x350   :  { %v4780_v55 = vpop.f32.mrf.mxu1  ;;  %v1755_v33 = vsel %vm1736_vm5, %v6666_v12, -inf }
 0x351   :  { %v1707_v21 = vpop.f32.mrf.mxu0  ;;  %v2344_v0 = vsel %vm1736_vm5, %v6671_v23, -inf  ;;  %v6731_v55 = vld [vmem:[%s8707_s7 + $0x2] ss:$0 sm:$0xff] }
 0x352   :  { %v2297_v1 = vpop.f32.mrf.mxu1  ;;  %1756 = vmax.xlane.f32.xlu0 %v1755_v33  ;;  %v6676_v44 = vadd.f32 %v6435_v16, %v1707_v21 }
 0x353   :  { %2342 = vmax.xlane.f32.xlu1 %v2341_v24  ;;  %v4736_v59 = vpop.f32.mrf.mxu0  ;;  %v6681_v32 = vadd.f32 %v6446_v13, %v2297_v1 }
 0x354   :  { %v4783_v56 = vpop.f32.mrf.mxu1  ;;  %v1758_v52 = vsel %vm1736_vm5, %v6676_v44, -inf }
 0x355   :  { %v1712_v49 = vpop.f32.mrf.mxu0  ;;  %v2347_v53 = vsel %vm1736_vm5, %v6681_v32, -inf }
 0x356   :  { %v2302_v63 = vpop.f32.mrf.mxu1  ;;  %2345 = vmax.xlane.f32.xlu0 %v2344_v0  ;;  %v6686_v36 = vadd.f32 %v6435_v16, %v1712_v49 }
 0x357   :  { %1759 = vmax.xlane.f32.xlu1 %v1758_v52  ;;  %v4739_v34 = vpop.f32.mrf.mxu0  ;;  %v6691_v38 = vadd.f32 %v6446_v13, %v2302_v63 }
 0x358   :  { %v4786_v18 = vpop.f32.mrf.mxu1  ;;  %v1761_v2 = vsel %vm1736_vm5, %v6686_v36, -inf }
 0x359   :  { %v1717_v29 = vpop.f32.mrf.mxu0  ;;  %v2350_v14 = vsel %vm1736_vm5, %v6691_v38, -inf }
 0x35a   :  { %v2307_v26 = vpop.f32.mrf.mxu1  ;;  %1762 = vmax.xlane.f32.xlu0 %v1761_v2  ;;  %v6696_v28 = vadd.f32 %v6435_v16, %v1717_v29 }
 0x35b   :  { %2348 = vmax.xlane.f32.xlu1 %v2347_v53  ;;  %v4742_v11 = vpop.f32.mrf.mxu0  ;;  %v6701_v40 = vadd.f32 %v6446_v13, %v2307_v26 }
 0x35c   :  { %v4789_v15 = vpop.f32.mrf.mxu1  ;;  %v1764_v54 = vsel %vm1736_vm5, %v6696_v28, -inf }
 0x35d   :  { %v1722_v48 = vpop.f32.mrf.mxu0  ;;  %v2353_v8 = vsel %vm1736_vm5, %v6701_v40, -inf }
 0x35e   :  { %v2312_v41 = vpop.f32.mrf.mxu1  ;;  %2351 = vmax.xlane.f32.xlu0 %v2350_v14  ;;  %v6706_v62 = vadd.f32 %v6435_v16, %v1722_v48 }
 0x35f   :  { %1765 = vmax.xlane.f32.xlu1 %v1764_v54  ;;  %v4745_v37 = vpop.f32.mrf.mxu0  ;;  %v6711_v7 = vadd.f32 %v6446_v13, %v2312_v41 }
 0x360   :  { %v4792_v17 = vpop.f32.mrf.mxu1  ;;  %v1767_v25 = vsel %vm1736_vm5, %v6706_v62, -inf }
 0x361   :  { %v1727_v50 = vpop.f32.mrf.mxu0  ;;  %v2356_v4 = vsel %vm1736_vm5, %v6711_v7, -inf }
 0x362   :  { %v2317_v45 = vpop.f32.mrf.mxu1  ;;  %1768 = vmax.xlane.f32.xlu0 %v1767_v25  ;;  %v6716_v39 = vadd.f32 %v6435_v16, %v1727_v50 }
 0x363   :  { %2354 = vmax.xlane.f32.xlu1 %v2353_v8  ;;  %v4748_v57 = vpop.f32.mrf.mxu0  ;;  %v6721_v27 = vadd.f32 %v6446_v13, %v2317_v45 }
 0x364   :  { %v4795_v43 = vpop.f32.mrf.mxu1  ;;  %v1770_v3 = vsel %vm1736_vm5, %v6716_v39, -inf }
 0x365   :  { %v1732_v5 = vpop.f32.mrf.mxu0  ;;  %v2359_v21 = vsel %vm1736_vm5, %v6721_v27, -inf }
 0x366   :  { %v2322_v9 = vpop.f32.mrf.mxu1  ;;  %2357 = vmax.xlane.f32.xlu0 %v2356_v4  ;;  %v6726_v51 = vadd.f32 %v6435_v16, %v1732_v5  ;;  %v6743_v16 = vld [vmem:[%s8707_s7 + $0x3] ss:$0 sm:$0xff] }
 0x367   :  { %1771 = vmax.xlane.f32.xlu1 %v1770_v3  ;;  %v4751_v19 = vpop.f32.mrf.mxu0  ;;  %v6736_v1 = vadd.f32 %v6446_v13, %v2322_v9 }
 0x368   :  { %v4798_v46 = vpop.f32.mrf.mxu1  ;;  %v1774_v33 = vsel %vm1773_vm7, %v6726_v51, -inf }
 0x369   :  { %v2849_v59 = vpop.f32.mrf.mxu0  ;;  %v2362_v34 = vsel %vm1773_vm7, %v6736_v1, -inf }
 0x36a   :  { %v3436_v24 = vpop.f32.mrf.mxu1  ;;  %1775 = vmax.xlane.f32.xlu0 %v1774_v33  ;;  %v6746_v56 = vadd.f32 %v6731_v55, %v2849_v59 }
 0x36b   :  { %2360 = vmax.xlane.f32.xlu1 %v2359_v21  ;;  %v4809_v52 = vpop.f32.mrf.mxu0  ;;  %v6751_v0 = vadd.f32 %v6743_v16, %v3436_v24 }
 0x36c   :  { %v4856_v63 = vpop.f32.mrf.mxu1  ;;  %v2913_v13 = vsel %vm1736_vm5, %v6746_v56, -inf }
 0x36d   :  { %v2854_v18 = vpop.f32.mrf.mxu0  ;;  %v3500_v54 = vsel %vm1736_vm5, %v6751_v0, -inf }
 0x36e   :  { %v3441_v49 = vpop.f32.mrf.mxu1  ;;  %2363 = vmax.xlane.f32.xlu0 %v2362_v34  ;;  %v6761_v11 = vadd.f32 %v6731_v55, %v2854_v18 }
 0x36f   :  { %v6756_v2 = vadd.f32 %v6743_v16, %v3441_v49  ;;  %2914 = vmax.xlane.f32.xlu1 %v2913_v13  ;;  %v4812_v26 = vpop.f32.mrf.mxu0 }
 0x370   :  { %v4859_v53 = vpop.f32.mrf.mxu1  ;;  %v2916_v8 = vsel %vm1736_vm5, %v6761_v11, -inf }
 0x371   :  { %v3503_v29 = vsel %vm1736_vm5, %v6756_v2, -inf  ;;  %v2859_v41 = vpop.f32.mrf.mxu0 }
 0x372   :  { %v3446_v15 = vpop.f32.mrf.mxu1  ;;  %3501 = vmax.xlane.f32.xlu0 %v3500_v54  ;;  %v6766_v14 = vadd.f32 %v6731_v55, %v2859_v41 }
 0x373   :  { %3504 = vmax.xlane.f32.xlu1 %v3503_v29  ;;  %v4815_v48 = vpop.f32.mrf.mxu0  ;;  %v6771_v25 = vadd.f32 %v6743_v16, %v3446_v15 }
 0x374   :  { %v4862_v37 = vpop.f32.mrf.mxu1  ;;  %v2919_v17 = vsel %vm1736_vm5, %v6766_v14, -inf }
 0x375   :  { %v2864_v50 = vpop.f32.mrf.mxu0  ;;  %v3506_v19 = vsel %vm1736_vm5, %v6771_v25, -inf }
 0x376   :  { %v3451_v45 = vpop.f32.mrf.mxu1  ;;  %2917 = vmax.xlane.f32.xlu0 %v2916_v8  ;;  %v6781_v4 = vadd.f32 %v6731_v55, %v2864_v50 }
 0x377   :  { %v6776_v57 = vadd.f32 %v6743_v16, %v3451_v45  ;;  %2920 = vmax.xlane.f32.xlu1 %v2919_v17  ;;  %v4818_v43 = vpop.f32.mrf.mxu0 }
 0x378   :  { %v4865_v3 = vpop.f32.mrf.mxu1  ;;  %v2922_v13 = vsel %vm1736_vm5, %v6781_v4, -inf }
 0x379   :  { %v3509_v9 = vsel %vm1736_vm5, %v6776_v57, -inf  ;;  %v2869_v46 = vpop.f32.mrf.mxu0 }
 0x37a   :  { %v3456_v5 = vpop.f32.mrf.mxu1  ;;  %3507 = vmax.xlane.f32.xlu0 %v3506_v19  ;;  %v6786_v33 = vadd.f32 %v6731_v55, %v2869_v46 }
 0x37b   :  { %3510 = vmax.xlane.f32.xlu1 %v3509_v9  ;;  %v4821_v24 = vpop.f32.mrf.mxu0  ;;  %v6791_v52 = vadd.f32 %v6743_v16, %v3456_v5 }
 0x37c   :  { %v4868_v21 = vpop.f32.mrf.mxu1  ;;  %v2925_v59 = vsel %vm1736_vm5, %v6786_v33, -inf }
 0x37d   :  { %v2874_v49 = vpop.f32.mrf.mxu0  ;;  %v3512_v54 = vsel %vm1736_vm5, %v6791_v52, -inf }
 0x37e   :  { %v3461_v63 = vpop.f32.mrf.mxu1  ;;  %2923 = vmax.xlane.f32.xlu0 %v2922_v13  ;;  %v6801_v29 = vadd.f32 %v6731_v55, %v2874_v49 }
 0x37f   :  { %v6796_v34 = vadd.f32 %v6743_v16, %v3461_v63  ;;  %2926 = vmax.xlane.f32.xlu1 %v2925_v59  ;;  %v4824_v18 = vpop.f32.mrf.mxu0 }
 0x380   :  { %v4871_v26 = vpop.f32.mrf.mxu1  ;;  %v2928_v43 = vsel %vm1736_vm5, %v6801_v29, -inf }
 0x381   :  { %v3515_v53 = vsel %vm1736_vm5, %v6796_v34, -inf  ;;  %v2879_v41 = vpop.f32.mrf.mxu0 }
 0x382   :  { %v3466_v15 = vpop.f32.mrf.mxu1  ;;  %3513 = vmax.xlane.f32.xlu0 %v3512_v54  ;;  %v6806_v48 = vadd.f32 %v6731_v55, %v2879_v41 }
 0x383   :  { %3516 = vmax.xlane.f32.xlu1 %v3515_v53  ;;  %v4827_v37 = vpop.f32.mrf.mxu0  ;;  %v6811_v8 = vadd.f32 %v6743_v16, %v3466_v15 }
 0x384   :  { %v4874_v17 = vpop.f32.mrf.mxu1  ;;  %v2931_v45 = vsel %vm1736_vm5, %v6806_v48, -inf }
 0x385   :  { %v2884_v3 = vpop.f32.mrf.mxu0  ;;  %v3518_v59 = vsel %vm1736_vm5, %v6811_v8, -inf }
 0x386   :  { %v3471_v50 = vpop.f32.mrf.mxu1  ;;  %2929 = vmax.xlane.f32.xlu0 %v2928_v43  ;;  %v6821_v24 = vadd.f32 %v6731_v55, %v2884_v3 }
 0x387   :  { %v6816_v9 = vadd.f32 %v6743_v16, %v3471_v50  ;;  %2932 = vmax.xlane.f32.xlu1 %v2931_v45  ;;  %v4830_v5 = vpop.f32.mrf.mxu0 }
 0x388   :  { %v4877_v19 = vpop.f32.mrf.mxu1  ;;  %v2934_v54 = vsel %vm1736_vm5, %v6821_v24, -inf }
 0x389   :  { %v3521_v46 = vsel %vm1736_vm5, %v6816_v9, -inf  ;;  %v2889_v63 = vpop.f32.mrf.mxu0 }
 0x38a   :  { %v3476_v21 = vpop.f32.mrf.mxu1  ;;  %3519 = vmax.xlane.f32.xlu0 %v3518_v59  ;;  %v6826_v13 = vadd.f32 %v6731_v55, %v2889_v63 }
 0x38b   :  { %3522 = vmax.xlane.f32.xlu1 %v3521_v46  ;;  %v4833_v49 = vpop.f32.mrf.mxu0  ;;  %v6831_v53 = vadd.f32 %v6743_v16, %v3476_v21 }
 0x38c   :  { %v4880_v18 = vpop.f32.mrf.mxu1  ;;  %v2937_v26 = vsel %vm1736_vm5, %v6826_v13, -inf }
 0x38d   :  { %v2894_v41 = vpop.f32.mrf.mxu0  ;;  %v3524_v5 = vsel %vm1736_vm5, %v6831_v53, -inf }
 0x38e   :  { %v3481_v15 = vpop.f32.mrf.mxu1  ;;  %2935 = vmax.xlane.f32.xlu0 %v2934_v54  ;;  %v6841_v43 = vadd.f32 %v6731_v55, %v2894_v41 }
 0x38f   :  { %v6836_v37 = vadd.f32 %v6743_v16, %v3481_v15  ;;  %2938 = vmax.xlane.f32.xlu1 %v2937_v26  ;;  %v4836_v17 = vpop.f32.mrf.mxu0 }
 0x390   :  { %v4883_v45 = vpop.f32.mrf.mxu1  ;;  %v2940_v26 = vsel %vm1736_vm5, %v6841_v43, -inf }
 0x391   :  { %v3527_v50 = vsel %vm1736_vm5, %v6836_v37, -inf  ;;  %v2899_v19 = vpop.f32.mrf.mxu0 }
 0x392   :  { %v3486_v3 = vpop.f32.mrf.mxu1  ;;  %3525 = vmax.xlane.f32.xlu0 %v3524_v5  ;;  %v6846_v46 = vadd.f32 %v6731_v55, %v2899_v19 }
 0x393   :  { %3528 = vmax.xlane.f32.xlu1 %v3527_v50  ;;  %v4839_v21 = vpop.f32.mrf.mxu0  ;;  %v6851_v49 = vadd.f32 %v6743_v16, %v3486_v3 }
 0x394   :  { %v4886_v59 = vpop.f32.mrf.mxu1  ;;  %v2943_v63 = vsel %vm1736_vm5, %v6846_v46, -inf }
 0x395   :  { %v2904_v15 = vpop.f32.mrf.mxu0  ;;  %v3530_v5 = vsel %vm1736_vm5, %v6851_v49, -inf }
 0x396   :  { %v3491_v18 = vpop.f32.mrf.mxu1  ;;  %2941 = vmax.xlane.f32.xlu0 %v2940_v26  ;;  %v6861_v50 = vadd.f32 %v6731_v55, %v2904_v15 }
 0x397   :  { %v6856_v54 = vadd.f32 %v6743_v16, %v3491_v18  ;;  %2944 = vmax.xlane.f32.xlu1 %v2943_v63  ;;  %v4842_v41 = vpop.f32.mrf.mxu0 }
 0x398   :  { %v4889_v17 = vpop.f32.mrf.mxu1  ;;  %v2946_v15 = vsel %vm1736_vm5, %v6861_v50, -inf }
 0x399   :  { %v3533_v45 = vsel %vm1736_vm5, %v6856_v54, -inf  ;;  %v2909_v19 = vpop.f32.mrf.mxu0 }
 0x39a   :  { %v3496_v3 = vpop.f32.mrf.mxu1  ;;  %3531 = vmax.xlane.f32.xlu0 %v3530_v5  ;;  %v6866_v21 = vadd.f32 %v6731_v55, %v2909_v19 }
 0x39b   :  { %3534 = vmax.xlane.f32.xlu1 %v3533_v45  ;;  %v4845_v59 = vpop.f32.mrf.mxu0  ;;  %v6871_v26 = vadd.f32 %v6743_v16, %v3496_v3 }
 0x39c   :  { %8795 = vst [vmem:[#allocation13_spill] sm:$0xff] %v6866_v21  ;;  %v4892_v63 = vpop.f32.mrf.mxu1  ;;  %v2949_v18 = vsel %vm1773_vm7, %v6866_v21, -inf }
 0x39d   :  { %8796 = vst [vmem:[#allocation11_spill] sm:$0xff] %v6871_v26  ;;  %v3536_v41 = vsel %vm1773_vm7, %v6871_v26, -inf }
 0x39e   :  { %2947 = vmax.xlane.f32.xlu0 %v2946_v15 }
 0x39f   :  { %2950 = vmax.xlane.f32.xlu1 %v2949_v18 }
 0x3a2   :  { %3537 = vmax.xlane.f32.xlu0 %v3536_v41 }
 0x3c3   :  { %v1739_v17 = vpop.xlane.xlu0 %1738 }
 0x3c4   :  { %v1777_v55 = vsub.f32 %v6460_v31, %v1739_v17 }
 0x3c6   :  { %v1790_v45 = vmul.f32 1.442695, %v1777_v55 }
 0x3c7   :  { %v2328_v5 = vpop.xlane.xlu0 %2327 }
 0x3c8   :  { %4984 = vpow2.f32 %v1790_v45  ;;  %v2331_v19 = vpop.xlane.xlu1 %2330  ;;  %v2365_v59 = vsub.f32 %v6474_v58, %v2328_v5 }
 0x3c9   :  { %v2366_v16 = vsub.f32 %v6488_v10, %v2331_v19 }
 0x3ca   :  { %v2378_v3 = vmul.f32 1.442695, %v2365_v59 }
 0x3cb   :  { %v2380_v63 = vmul.f32 1.442695, %v2366_v16  ;;  %v1742_v21 = vpop.xlane.xlu0 %1741 }
 0x3cc   :  { %4986 = vpow2.f32 %v2378_v3  ;;  %v1778_v18 = vsub.f32 %v6501_v60, %v1742_v21  ;;  %v1745_v15 = vpop.xlane.xlu1 %1744 }
 0x3cd   :  { %4988 = vpow2.f32 %v2380_v63  ;;  %v1779_v41 = vsub.f32 %v6528_v6, %v1745_v15 }
 0x3ce   :  { %v1792_v26 = vmul.f32 1.442695, %v1778_v18 }
 0x3cf   :  { %v1794_v31 = vmul.f32 1.442695, %v1779_v41  ;;  %v2334_v17 = vpop.xlane.xlu0 %2333 }
 0x3d0   :  { %4990 = vpow2.f32 %v1792_v26  ;;  %v2367_v55 = vsub.f32 %v6539_v20, %v2334_v17  ;;  %v1748_v45 = vpop.xlane.xlu1 %1747 }
 0x3d1   :  { %4992 = vpow2.f32 %v1794_v31  ;;  %v1780_v58 = vsub.f32 %v6564_v35, %v1748_v45 }
 0x3d2   :  { %v2382_v10 = vmul.f32 1.442695, %v2367_v55 }
 0x3d3   :  { %v1796_v5 = vmul.f32 1.442695, %v1780_v58  ;;  %v1751_v59 = vpop.xlane.xlu0 %1750 }
 0x3d4   :  { %4994 = vpow2.f32 %v2382_v10  ;;  %v2337_v19 = vpop.xlane.xlu1 %2336  ;;  %v1781_v6 = vsub.f32 %v6602_v22, %v1751_v59 }
 0x3d5   :  { %v6884_v60 = vpop.eup %4984  ;;  %v2368_v21 = vsub.f32 %v6559_v30, %v2337_v19  ;;  %4996 = vpow2.f32 %v1796_v5 }
 0x3d6   :  { %v1816_v26 = vsel %vm1736_vm5, %v6884_v60, 0.0  ;;  %v1798_v16 = vmul.f32 1.442695, %v1781_v6 }
 0x3d7   :  { %v2384_v20 = vmul.f32 1.442695, %v2368_v21  ;;  %1817 = vadd.xlane.f32.xlu1 %v1816_v26  ;;  %v2340_v3 = vpop.xlane.xlu0 %2339 }
 0x3d8   :  { %v1754_v35 = vpop.xlane.xlu1 %1753  ;;  %v2369_v18 = vsub.f32 %v6617_v61, %v2340_v3 }
 0x3d9   :  { %v6890_v63 = vpop.eup %4986  ;;  %4998 = vpow2.f32 %v2384_v20  ;;  %v1782_v15 = vsub.f32 %v6632_v42, %v1754_v35 }
 0x3da   :  { %v6894_v41 = vpop.eup %4988  ;;  %5000 = vpow2.f32 %v1798_v16  ;;  %v2404_v30 = vsel %vm1736_vm5, %v6890_v63, 0.0  ;;  %v2386_v22 = vmul.f32 1.442695, %v2369_v18 }
 0x3db   :  { %v1800_v31 = vmul.f32 1.442695, %v1782_v15  ;;  %2405 = vadd.xlane.f32.xlu0 %v2404_v30  ;;  %v2407_v17 = vsel %vm1736_vm5, %v6894_v41, 0.0  ;;  %v1757_v45 = vpop.xlane.xlu0 %1756 }
 0x3dc   :  { %v2343_v55 = vpop.xlane.xlu1 %2342  ;;  %2408 = vadd.xlane.f32.xlu1 %v2407_v17  ;;  %5002 = vpow2.f32 %v2386_v22  ;;  %v1783_v42 = vsub.f32 %v6666_v12, %v1757_v45 }
 0x3dd   :  { %v6900_v58 = vpop.eup %4990  ;;  %v2370_v61 = vsub.f32 %v6653_v47, %v2343_v55  ;;  %5004 = vpow2.f32 %v1800_v31 }
 0x3de   :  { %v6904_v10 = vpop.eup %4992  ;;  %v1819_v5 = vsel %vm1736_vm5, %v6900_v58, 0.0  ;;  %v1802_v59 = vmul.f32 1.442695, %v1783_v42 }
 0x3df   :  { %v2388_v19 = vmul.f32 1.442695, %v2370_v61  ;;  %1820 = vadd.xlane.f32.xlu0 %v1819_v5  ;;  %v1822_v21 = vsel %vm1736_vm5, %v6904_v10, 0.0  ;;  %v2346_v6 = vpop.xlane.xlu0 %2345 }
 0x3e0   :  { %v1760_v26 = vpop.xlane.xlu1 %1759  ;;  %1823 = vadd.xlane.f32.xlu1 %v1822_v21  ;;  %v2371_v47 = vsub.f32 %v6671_v23, %v2346_v6 }
 0x3e1   :  { %v6910_v20 = vpop.eup %4994  ;;  %5006 = vpow2.f32 %v2388_v19  ;;  %v1784_v12 = vsub.f32 %v6676_v44, %v1760_v26 }
 0x3e2   :  { %v2410_v16 = vsel %vm1736_vm5, %v6910_v20, 0.0  ;;  %v6916_v3 = vpop.eup %4996  ;;  %5008 = vpow2.f32 %v1802_v59  ;;  %v2390_v35 = vmul.f32 1.442695, %v2371_v47 }
 0x3e3   :  { %v1804_v18 = vmul.f32 1.442695, %v1784_v12  ;;  %2411 = vadd.xlane.f32.xlu0 %v2410_v16  ;;  %v1763_v30 = vpop.xlane.xlu0 %1762  ;;  %v1825_v23 = vsel %vm1736_vm5, %v6916_v3, 0.0 }
 0x3e4   :  { %v2349_v15 = vpop.xlane.xlu1 %2348  ;;  %5010 = vpow2.f32 %v2390_v35  ;;  %v1785_v31 = vsub.f32 %v6686_v36, %v1763_v30 }
 0x3e5   :  { %v2372_v22 = vsub.f32 %v6681_v32, %v2349_v15  ;;  %5012 = vpow2.f32 %v1804_v18 }
 0x3e6   :  { %v6920_v17 = vpop.eup %4998  ;;  %v1806_v45 = vmul.f32 1.442695, %v1785_v31 }
 0x3e7   :  { %v6924_v44 = vpop.eup %5000  ;;  %v2392_v55 = vmul.f32 1.442695, %v2372_v22  ;;  %1826 = vadd.xlane.f32.xlu0 %v1825_v23  ;;  %v2413_v61 = vsel %vm1736_vm5, %v6920_v17, 0.0  ;;  %v2352_v42 = vpop.xlane.xlu0 %2351 }
 0x3e8   :  { %v1766_v5 = vpop.xlane.xlu1 %1765  ;;  %2414 = vadd.xlane.f32.xlu1 %v2413_v61  ;;  %v2373_v32 = vsub.f32 %v6691_v38, %v2352_v42  ;;  %v1828_v59 = vsel %vm1736_vm5, %v6924_v44, 0.0 }
 0x3e9   :  { %5014 = vpow2.f32 %v2392_v55  ;;  %v1786_v36 = vsub.f32 %v6696_v28, %v1766_v5  ;;  %v6930_v19 = vpop.eup %5002 }
 0x3ea   :  { %5016 = vpow2.f32 %v1806_v45  ;;  %v2394_v21 = vmul.f32 1.442695, %v2373_v32  ;;  %v2416_v26 = vsel %vm1736_vm5, %v6930_v19, 0.0  ;;  %v6936_v47 = vpop.eup %5004 }
 0x3eb   :  { %v1808_v6 = vmul.f32 1.442695, %v1786_v36  ;;  %v1769_v16 = vpop.xlane.xlu0 %1768  ;;  %2417 = vadd.xlane.f32.xlu0 %v2416_v26  ;;  %v1831_v30 = vsel %vm1736_vm5, %v6936_v47, 0.0 }
 0x3ec   :  { %v2355_v12 = vpop.xlane.xlu1 %2354  ;;  %1829 = vadd.xlane.f32.xlu1 %v1828_v59  ;;  %5018 = vpow2.f32 %v2394_v21  ;;  %v1787_v28 = vsub.f32 %v6706_v62, %v1769_v16 }
 0x3ed   :  { %v2374_v38 = vsub.f32 %v6701_v40, %v2355_v12  ;;  %5020 = vpow2.f32 %v1808_v6 }
 0x3ee   :  { %v6940_v35 = vpop.eup %5006  ;;  %v1810_v15 = vmul.f32 1.442695, %v1787_v28 }
 0x3ef   :  { %v2396_v18 = vmul.f32 1.442695, %v2374_v38  ;;  %v2419_v22 = vsel %vm1736_vm5, %v6940_v35, 0.0  ;;  %v6946_v31 = vpop.eup %5008  ;;  %v2358_v23 = vpop.xlane.xlu0 %2357  ;;  %1832 = vadd.xlane.f32.xlu0 %v1831_v30 }
 0x3f0   :  { %v1772_v55 = vpop.xlane.xlu1 %1771  ;;  %2420 = vadd.xlane.f32.xlu1 %v2419_v22  ;;  %v2375_v40 = vsub.f32 %v6711_v7, %v2358_v23  ;;  %v1834_v32 = vsel %vm1736_vm5, %v6946_v31, 0.0 }
 0x3f1   :  { %5022 = vpow2.f32 %v2396_v18  ;;  %v1788_v62 = vsub.f32 %v6716_v39, %v1772_v55  ;;  %v6950_v45 = vpop.eup %5010 }
 0x3f2   :  { %5024 = vpow2.f32 %v1810_v15  ;;  %v2398_v61 = vmul.f32 1.442695, %v2375_v40  ;;  %v2422_v5 = vsel %vm1736_vm5, %v6950_v45, 0.0  ;;  %v6956_v36 = vpop.eup %5012 }
 0x3f3   :  { %v1812_v42 = vmul.f32 1.442695, %v1788_v62  ;;  %v1776_v21 = vpop.xlane.xlu0 %1775  ;;  %2423 = vadd.xlane.f32.xlu0 %v2422_v5  ;;  %v1837_v16 = vsel %vm1736_vm5, %v6956_v36, 0.0 }
 0x3f4   :  { %v2361_v59 = vpop.xlane.xlu1 %2360  ;;  %1835 = vadd.xlane.f32.xlu1 %v1834_v32  ;;  %5026 = vpow2.f32 %v2398_v61  ;;  %v1789_v39 = vsub.f32 %v6726_v51, %v1776_v21 }
 0x3f5   :  { %v2376_v7 = vsub.f32 %v6721_v27, %v2361_v59  ;;  %5028 = vpow2.f32 %v1812_v42 }
 0x3f6   :  { %v6960_v6 = vpop.eup %5014  ;;  %v1814_v12 = vmul.f32 1.442695, %v1789_v39 }
 0x3f7   :  { %v2400_v26 = vmul.f32 1.442695, %v2376_v7  ;;  %v2425_v38 = vsel %vm1736_vm5, %v6960_v6, 0.0  ;;  %v6966_v28 = vpop.eup %5016  ;;  %v2364_v18 = vpop.xlane.xlu0 %2363  ;;  %1838 = vadd.xlane.f32.xlu0 %v1837_v16 }
 0x3f8   :  { %v2915_v15 = vpop.xlane.xlu1 %2914  ;;  %2426 = vadd.xlane.f32.xlu1 %v2425_v38  ;;  %v2377_v27 = vsub.f32 %v6736_v1, %v2364_v18  ;;  %v1840_v62 = vsel %vm1736_vm5, %v6966_v28, 0.0 }
 0x3f9   :  { %5030 = vpow2.f32 %v2400_v26  ;;  %v2952_v51 = vsub.f32 %v6746_v56, %v2915_v15  ;;  %v6970_v30 = vpop.eup %5018 }
 0x3fa   :  { %5032 = vpow2.f32 %v1814_v12  ;;  %v6972_v22 = vpop.eup %5020  ;;  %v2402_v23 = vmul.f32 1.442695, %v2377_v27  ;;  %v2428_v40 = vsel %vm1736_vm5, %v6970_v30, 0.0 }
 0x3fb   :  { %v2965_v55 = vmul.f32 1.442695, %v2952_v51  ;;  %v3502_v61 = vpop.xlane.xlu0 %3501  ;;  %2429 = vadd.xlane.f32.xlu0 %v2428_v40  ;;  %v1843_v32 = vsel %vm1736_vm5, %v6972_v22, 0.0 }
 0x3fc   :  { %v3505_v42 = vpop.xlane.xlu1 %3504  ;;  %1841 = vadd.xlane.f32.xlu1 %v1840_v62  ;;  %5034 = vpow2.f32 %v2402_v23  ;;  %v3539_v1 = vsub.f32 %v6751_v0, %v3502_v61 }
 0x3fd   :  { %v3540_v56 = vsub.f32 %v6756_v2, %v3505_v42  ;;  %5036 = vpow2.f32 %v2965_v55 }
 0x3fe   :  { %v6980_v5 = vpop.eup %5022  ;;  %v3552_v21 = vmul.f32 1.442695, %v3539_v1 }
 0x3ff   :  { %v6984_v59 = vpop.eup %5024  ;;  %v3554_v7 = vmul.f32 1.442695, %v3540_v56  ;;  %v2431_v39 = vsel %vm1736_vm5, %v6980_v5, 0.0  ;;  %v2918_v26 = vpop.xlane.xlu0 %2917  ;;  %1844 = vadd.xlane.f32.xlu0 %v1843_v32 }
 0x400   :  { %v2921_v12 = vpop.xlane.xlu1 %2920  ;;  %2432 = vadd.xlane.f32.xlu1 %v2431_v39  ;;  %5038 = vpow2.f32 %v3552_v21  ;;  %v2953_v0 = vsub.f32 %v6761_v11, %v2918_v26  ;;  %v1846_v38 = vsel %vm1736_vm5, %v6984_v59, 0.0 }
 0x401   :  { %v2954_v2 = vsub.f32 %v6766_v14, %v2921_v12  ;;  %v6990_v16 = vpop.eup %5026  ;;  %5040 = vpow2.f32 %v3554_v7 }
 0x402   :  { %v6994_v18 = vpop.eup %5028  ;;  %v2967_v15 = vmul.f32 1.442695, %v2953_v0  ;;  %v2434_v51 = vsel %vm1736_vm5, %v6990_v16, 0.0 }
 0x403   :  { %v2969_v27 = vmul.f32 1.442695, %v2954_v2  ;;  %v3508_v23 = vpop.xlane.xlu0 %3507  ;;  %2435 = vadd.xlane.f32.xlu0 %v2434_v51  ;;  %v1849_v62 = vsel %vm1736_vm5, %v6994_v18, 0.0 }
 0x404   :  { %v3511_v55 = vpop.xlane.xlu1 %3510  ;;  %1847 = vadd.xlane.f32.xlu1 %v1846_v38  ;;  %5042 = vpow2.f32 %v2967_v15  ;;  %v3541_v11 = vsub.f32 %v6771_v25, %v3508_v23 }
 0x405   :  { %v3542_v14 = vsub.f32 %v6776_v57, %v3511_v55  ;;  %5044 = vpow2.f32 %v2969_v27 }
 0x406   :  { %v7000_v40 = vpop.eup %5030  ;;  %v3556_v42 = vmul.f32 1.442695, %v3541_v11 }
 0x407   :  { %v7004_v61 = vpop.eup %5032  ;;  %v3558_v1 = vmul.f32 1.442695, %v3542_v14  ;;  %v2437_v56 = vsel %vm1736_vm5, %v7000_v40, 0.0  ;;  %v2924_v32 = vpop.xlane.xlu0 %2923  ;;  %1850 = vadd.xlane.f32.xlu0 %v1849_v62 }
 0x408   :  { %v2927_v21 = vpop.xlane.xlu1 %2926  ;;  %2438 = vadd.xlane.f32.xlu1 %v2437_v56  ;;  %5046 = vpow2.f32 %v3556_v42  ;;  %v2955_v25 = vsub.f32 %v6781_v4, %v2924_v32  ;;  %v1852_v39 = vsel %vm1773_vm7, %v7004_v61, 0.0 }
 0x409   :  { %v2956_v57 = vsub.f32 %v6786_v33, %v2927_v21  ;;  %v7010_v7 = vpop.eup %5034  ;;  %5048 = vpow2.f32 %v3558_v1 }
 0x40a   :  { %v2971_v26 = vmul.f32 1.442695, %v2955_v25  ;;  %v2440_v0 = vsel %vm1773_vm7, %v7010_v7, 0.0  ;;  %v7016_v2 = vpop.eup %5036 }
 0x40b   :  { %v2973_v12 = vmul.f32 1.442695, %v2956_v57  ;;  %v3514_v38 = vpop.xlane.xlu0 %3513  ;;  %2441 = vadd.xlane.f32.xlu0 %v2440_v0  ;;  %v2991_v11 = vsel %vm1736_vm5, %v7016_v2, 0.0 }
 0x40c   :  { %v3517_v15 = vpop.xlane.xlu1 %3516  ;;  %1853 = vadd.xlane.f32.xlu1 %v1852_v39  ;;  %5050 = vpow2.f32 %v2971_v26  ;;  %v3543_v4 = vsub.f32 %v6791_v52, %v3514_v38 }
 0x40d   :  { %v3544_v33 = vsub.f32 %v6796_v34, %v3517_v15  ;;  %v7020_v27 = vpop.eup %5038  ;;  %5052 = vpow2.f32 %v2973_v12 }
 0x40e   :  { %v3560_v51 = vmul.f32 1.442695, %v3543_v4  ;;  %v3578_v55 = vsel %vm1736_vm5, %v7020_v27, 0.0  ;;  %v7026_v14 = vpop.eup %5040 }
 0x40f   :  { %v3562_v23 = vmul.f32 1.442695, %v3544_v33  ;;  %v2930_v62 = vpop.xlane.xlu0 %2929  ;;  %3579 = vadd.xlane.f32.xlu0 %v3578_v55  ;;  %v3581_v25 = vsel %vm1736_vm5, %v7026_v14, 0.0 }
 0x410   :  { %v2933_v42 = vpop.xlane.xlu1 %2932  ;;  %2992 = vadd.xlane.f32.xlu1 %v2991_v11  ;;  %5054 = vpow2.f32 %v3560_v51  ;;  %v2957_v52 = vsub.f32 %v6801_v29, %v2930_v62 }
 0x411   :  { %v2958_v34 = vsub.f32 %v6806_v48, %v2933_v42  ;;  %v7030_v1 = vpop.eup %5042  ;;  %5056 = vpow2.f32 %v3562_v23 }
 0x412   :  { %v2975_v56 = vmul.f32 1.442695, %v2957_v52  ;;  %v2994_v21 = vsel %vm1736_vm5, %v7030_v1, 0.0  ;;  %v7036_v57 = vpop.eup %5044 }
 0x413   :  { %v2977_v32 = vmul.f32 1.442695, %v2958_v34  ;;  %v3520_v39 = vpop.xlane.xlu0 %3519  ;;  %2995 = vadd.xlane.f32.xlu0 %v2994_v21  ;;  %v2997_v4 = vsel %vm1736_vm5, %v7036_v57, 0.0 }
 0x414   :  { %v3523_v26 = vpop.xlane.xlu1 %3522  ;;  %3582 = vadd.xlane.f32.xlu1 %v3581_v25  ;;  %5058 = vpow2.f32 %v2975_v56  ;;  %v3545_v29 = vsub.f32 %v6811_v8, %v3520_v39 }
 0x415   :  { %v3546_v48 = vsub.f32 %v6816_v9, %v3523_v26  ;;  %v7040_v12 = vpop.eup %5046  ;;  %5060 = vpow2.f32 %v2977_v32 }
 0x416   :  { %v3564_v0 = vmul.f32 1.442695, %v3545_v29  ;;  %v3584_v15 = vsel %vm1736_vm5, %v7040_v12, 0.0  ;;  %v7046_v33 = vpop.eup %5048 }
 0x417   :  { %v3566_v38 = vmul.f32 1.442695, %v3546_v48  ;;  %v2936_v51 = vpop.xlane.xlu0 %2935  ;;  %3585 = vadd.xlane.f32.xlu0 %v3584_v15  ;;  %v3587_v34 = vsel %vm1736_vm5, %v7046_v33, 0.0 }
 0x418   :  { %v2939_v23 = vpop.xlane.xlu1 %2938  ;;  %2998 = vadd.xlane.f32.xlu1 %v2997_v4  ;;  %5062 = vpow2.f32 %v3564_v0  ;;  %v2959_v8 = vsub.f32 %v6821_v24, %v2936_v51 }
 0x419   :  { %v2960_v9 = vsub.f32 %v6826_v13, %v2939_v23  ;;  %v7050_v55 = vpop.eup %5050  ;;  %5064 = vpow2.f32 %v3566_v38 }
 0x41a   :  { %v7052_v11 = vpop.eup %5052  ;;  %v2979_v62 = vmul.f32 1.442695, %v2959_v8  ;;  %v3000_v52 = vsel %vm1736_vm5, %v7050_v55, 0.0 }
 0x41b   :  { %v2981_v42 = vmul.f32 1.442695, %v2960_v9  ;;  %v3526_v56 = vpop.xlane.xlu0 %3525  ;;  %3001 = vadd.xlane.f32.xlu0 %v3000_v52  ;;  %v3003_v25 = vsel %vm1736_vm5, %v7052_v11, 0.0 }
 0x41c   :  { %v3529_v32 = vpop.xlane.xlu1 %3528  ;;  %3588 = vadd.xlane.f32.xlu1 %v3587_v34  ;;  %5066 = vpow2.f32 %v2979_v62  ;;  %v3547_v24 = vsub.f32 %v6831_v53, %v3526_v56 }
 0x41d   :  { %v3548_v13 = vsub.f32 %v6836_v37, %v3529_v32  ;;  %v7060_v21 = vpop.eup %5054  ;;  %5068 = vpow2.f32 %v2981_v42 }
 0x41e   :  { %v7064_v39 = vpop.eup %5056  ;;  %v3568_v26 = vmul.f32 1.442695, %v3547_v24  ;;  %v3590_v48 = vsel %vm1736_vm5, %v7060_v21, 0.0 }
 0x41f   :  { %v3570_v29 = vmul.f32 1.442695, %v3548_v13  ;;  %v2942_v0 = vpop.xlane.xlu0 %2941  ;;  %3591 = vadd.xlane.f32.xlu0 %v3590_v48  ;;  %v3593_v4 = vsel %vm1736_vm5, %v7064_v39, 0.0 }
 0x420   :  { %v2945_v38 = vpop.xlane.xlu1 %2944  ;;  %3004 = vadd.xlane.f32.xlu1 %v3003_v25  ;;  %5070 = vpow2.f32 %v3568_v26  ;;  %v2961_v53 = vsub.f32 %v6841_v43, %v2942_v0 }
 0x421   :  { %v2962_v37 = vsub.f32 %v6846_v46, %v2945_v38  ;;  %v7070_v15 = vpop.eup %5058  ;;  %5072 = vpow2.f32 %v3570_v29 }
 0x422   :  { %v7074_v51 = vpop.eup %5060  ;;  %v2983_v23 = vmul.f32 1.442695, %v2961_v53  ;;  %v3006_v9 = vsel %vm1736_vm5, %v7070_v15, 0.0 }
 0x423   :  { %v2985_v8 = vmul.f32 1.442695, %v2962_v37  ;;  %v3532_v62 = vpop.xlane.xlu0 %3531  ;;  %3007 = vadd.xlane.f32.xlu0 %v3006_v9  ;;  %v3009_v34 = vsel %vm1736_vm5, %v7074_v51, 0.0 }
 0x424   :  { %v3535_v42 = vpop.xlane.xlu1 %3534  ;;  %3594 = vadd.xlane.f32.xlu1 %v3593_v4  ;;  %5074 = vpow2.f32 %v2983_v23  ;;  %v3549_v43 = vsub.f32 %v6851_v49, %v3532_v62 }
 0x425   :  { %v3550_v46 = vsub.f32 %v6856_v54, %v3535_v42  ;;  %v7080_v52 = vpop.eup %5062  ;;  %5076 = vpow2.f32 %v2985_v8  ;;  %v8797_v54 = vld [vmem:[#allocation13_spill] sm:$0xff] }
 0x426   :  { %v7084_v56 = vpop.eup %5064  ;;  %v3572_v32 = vmul.f32 1.442695, %v3549_v43  ;;  %v3596_v13 = vsel %vm1736_vm5, %v7080_v52, 0.0 }
 0x427   :  { %v3574_v24 = vmul.f32 1.442695, %v3550_v46  ;;  %3597 = vadd.xlane.f32.xlu0 %v3596_v13  ;;  %v2948_v25 = vpop.xlane.xlu0 %2947  ;;  %v3599_v0 = vsel %vm1736_vm5, %v7084_v56, 0.0 }
 0x428   :  { %3010 = vadd.xlane.f32.xlu1 %v3009_v34  ;;  %v2951_v26 = vpop.xlane.xlu1 %2950  ;;  %5078 = vpow2.f32 %v3572_v32  ;;  %v2963_v49 = vsub.f32 %v6861_v50, %v2948_v25  ;;  %v8798_v50 = vld [vmem:[#allocation11_spill] sm:$0xff] }
 0x429   :  { %v2964_v29 = vsub.f32 %v8797_v54, %v2951_v26  ;;  %v7090_v48 = vpop.eup %5066  ;;  %5080 = vpow2.f32 %v3574_v24 }
 0x42a   :  { %v2987_v38 = vmul.f32 1.442695, %v2963_v49  ;;  %v3012_v37 = vsel %vm1736_vm5, %v7090_v48, 0.0  ;;  %v7096_v4 = vpop.eup %5068 }
 0x42b   :  { %v2989_v53 = vmul.f32 1.442695, %v2964_v29  ;;  %3013 = vadd.xlane.f32.xlu0 %v3012_v37  ;;  %v3538_v23 = vpop.xlane.xlu0 %3537  ;;  %v3015_v43 = vsel %vm1736_vm5, %v7096_v4, 0.0 }
 0x42c   :  { %3600 = vadd.xlane.f32.xlu1 %v3599_v0  ;;  %5082 = vpow2.f32 %v2987_v38  ;;  %v3551_v8 = vsub.f32 %v8798_v50, %v3538_v23 }
 0x42d   :  { %v7099_v9 = vpop.eup %5070  ;;  %5084 = vpow2.f32 %v2989_v53 }
 0x42e   :  { %v3576_v62 = vmul.f32 1.442695, %v3551_v8  ;;  %v3602_v42 = vsel %vm1736_vm5, %v7099_v9, 0.0  ;;  %v7105_v46 = vpop.eup %5072 }
 0x42f   :  { %3603 = vadd.xlane.f32.xlu0 %v3602_v42  ;;  %v3605_v24 = vsel %vm1736_vm5, %v7105_v46, 0.0 }
 0x430   :  { %3016 = vadd.xlane.f32.xlu1 %v3015_v43  ;;  %5086 = vpow2.f32 %v3576_v62  ;;  %v1593_v43 = vlaneseq }
 0x431   :  { %v7107_v34 = vpop.eup %5074 }
 0x432   :  { %v3018_v32 = vsel %vm1736_vm5, %v7107_v34, 0.0  ;;  %v7113_v13 = vpop.eup %5076 }
 0x433   :  { %3019 = vadd.xlane.f32.xlu0 %v3018_v32  ;;  %v3021_v49 = vsel %vm1736_vm5, %v7113_v13, 0.0 }
 0x434   :  { %3606 = vadd.xlane.f32.xlu1 %v3605_v24 }
 0x435   :  { %v7115_v25 = vpop.eup %5078 }
 0x436   :  { %v3608_v26 = vsel %vm1736_vm5, %v7115_v25, 0.0  ;;  %v7121_v54 = vpop.eup %5080 }
 0x437   :  { %3609 = vadd.xlane.f32.xlu0 %v3608_v26  ;;  %v3611_v38 = vsel %vm1736_vm5, %v7121_v54, 0.0  ;;  %v7137_v26 = vand.u32 127, %v1593_v43 }
 0x438   :  { %3022 = vadd.xlane.f32.xlu1 %v3021_v49 }
 0x439   :  { %v7123_v29 = vpop.eup %5082  ;;  %vm1881_vm8 = vcmp.ge.s32.totalorder %v7137_v26, 1 }
 0x43a   :  { %v3024_v0 = vsel %vm1736_vm5, %v7123_v29, 0.0  ;;  %v7129_v53 = vpop.eup %5084 }
 0x43b   :  { %3025 = vadd.xlane.f32.xlu0 %v3024_v0  ;;  %v3027_v50 = vsel %vm1773_vm7, %v7129_v53, 0.0 }
 0x43c   :  { %3612 = vadd.xlane.f32.xlu1 %v3611_v38 }
 0x43d   :  { %v7131_v37 = vpop.eup %5086 }
 0x43e   :  { %v3614_v23 = vsel %vm1773_vm7, %v7131_v37, 0.0 }
 0x43f   :  { %3615 = vadd.xlane.f32.xlu0 %v3614_v23 }
 0x440   :  { %3028 = vadd.xlane.f32.xlu1 %v3027_v50 }
 0x460   :  { %v1818_v8 = vpop.xlane.xlu1 %1817 }
 0x461   :  { %5088 = vrcp.f32 %v1818_v8 }
 0x464   :  { %v2406_v62 = vpop.xlane.xlu0 %2405 }
 0x465   :  { %5090 = vrcp.f32 %v2406_v62  ;;  %v2409_v42 = vpop.xlane.xlu1 %2408 }
 0x466   :  { %5092 = vrcp.f32 %v2409_v42 }
 0x468   :  { %v1821_v32 = vpop.xlane.xlu0 %1820 }
 0x469   :  { %5094 = vrcp.f32 %v1821_v32  ;;  %v1824_v24 = vpop.xlane.xlu1 %1823 }
 0x46a   :  { %5096 = vrcp.f32 %v1824_v24 }
 0x46c   :  { %v2412_v49 = vpop.xlane.xlu0 %2411 }
 0x46d   :  { %5098 = vrcp.f32 %v2412_v49 }
 0x46e   :  { %v5089_v0 = vpop.eup %5088 }
 0x46f   :  { %v1856_v38 = vmul.f32 %v5089_v0, %v6884_v60 }
 0x470   :  { %v1827_v23 = vpop.xlane.xlu0 %1826 }
 0x471   :  { %5100 = vrcp.f32 %v1827_v23  ;;  %v2415_v50 = vpop.xlane.xlu1 %2414  ;;  %v7143_v8 = vsel %vm1881_vm8, %v1856_v38, -1.0 }
 0x472   :  { %v5091_v62 = vpop.eup %5090  ;;  %5102 = vrcp.f32 %v2415_v50  ;;  %v1895_v42 = vsel %vm1736_vm5, %v7143_v8, -inf }
 0x473   :  { %v5093_v43 = vpop.eup %5092  ;;  %1896 = vmax.xlane.f32.xlu0 %v1895_v42  ;;  %v2444_v32 = vmul.f32 %v5091_v62, %v6890_v63 }
 0x474   :  { %v2446_v24 = vmul.f32 %v5093_v43, %v6894_v41  ;;  %v2418_v49 = vpop.xlane.xlu0 %2417 }
 0x475   :  { %v1830_v60 = vpop.xlane.xlu1 %1829  ;;  %v7151_v0 = vsel %vm1881_vm8, %v2444_v32, -1.0  ;;  %5104 = vrcp.f32 %v2418_v49 }
 0x476   :  { %8799 = vst [vmem:[#allocation12_spill] sm:$0xff] %v7151_v0  ;;  %v5095_v23 = vpop.eup %5094  ;;  %v2482_v38 = vsel %vm1736_vm5, %v7151_v0, -inf  ;;  %v7157_v50 = vsel %vm1881_vm8, %v2446_v24, -1.0  ;;  %5106 = vrcp.f32 %v1830_v60 }
 0x477   :  { %v5097_v42 = vpop.eup %5096  ;;  %2483 = vmax.xlane.f32.xlu1 %v2482_v38  ;;  %v2485_v63 = vsel %vm1736_vm5, %v7157_v50, -inf  ;;  %v1858_v41 = vmul.f32 %v5095_v23, %v6900_v58 }
 0x478   :  { %2486 = vmax.xlane.f32.xlu0 %v2485_v63  ;;  %v1860_v62 = vmul.f32 %v5097_v42, %v6904_v10  ;;  %v1833_v43 = vpop.xlane.xlu0 %1832 }
 0x479   :  { %v2421_v32 = vpop.xlane.xlu1 %2420  ;;  %v7165_v49 = vsel %vm1881_vm8, %v1858_v41, -1.0  ;;  %5108 = vrcp.f32 %v1833_v43 }
 0x47a   :  { %v5099_v0 = vpop.eup %5098  ;;  %v1898_v24 = vsel %vm1736_vm5, %v7165_v49, -inf  ;;  %v7171_v60 = vsel %vm1881_vm8, %v1860_v62, -1.0  ;;  %5110 = vrcp.f32 %v2421_v32 }
 0x47b   :  { %1899 = vmax.xlane.f32.xlu1 %v1898_v24  ;;  %v1901_v58 = vsel %vm1736_vm5, %v7171_v60, -inf  ;;  %v2448_v10 = vmul.f32 %v5099_v0, %v6910_v20 }
 0x47c   :  { %1902 = vmax.xlane.f32.xlu0 %v1901_v58  ;;  %v2424_v23 = vpop.xlane.xlu0 %2423 }
 0x47d   :  { %v1836_v38 = vpop.xlane.xlu1 %1835  ;;  %v7178_v42 = vsel %vm1881_vm8, %v2448_v10, -1.0  ;;  %5112 = vrcp.f32 %v2424_v23 }
 0x47e   :  { %v5101_v63 = vpop.eup %5100  ;;  %v2488_v41 = vsel %vm1736_vm5, %v7178_v42, -inf  ;;  %5114 = vrcp.f32 %v1836_v38 }
 0x47f   :  { %v5103_v62 = vpop.eup %5102  ;;  %2489 = vmax.xlane.f32.xlu1 %v2488_v41  ;;  %v1862_v43 = vmul.f32 %v5101_v63, %v6916_v3 }
 0x480   :  { %v2450_v32 = vmul.f32 %v5103_v62, %v6920_v17  ;;  %v1839_v20 = vpop.xlane.xlu0 %1838 }
 0x481   :  { %v2427_v0 = vpop.xlane.xlu1 %2426  ;;  %v7186_v24 = vsel %vm1881_vm8, %v1862_v43, -1.0  ;;  %5116 = vrcp.f32 %v1839_v20 }
 0x482   :  { %v1904_v58 = vsel %vm1736_vm5, %v7186_v24, -inf  ;;  %v7192_v10 = vsel %vm1881_vm8, %v2450_v32, -1.0  ;;  %v5105_v23 = vpop.eup %5104  ;;  %5118 = vrcp.f32 %v2427_v0 }
 0x483   :  { %1905 = vmax.xlane.f32.xlu1 %v1904_v58  ;;  %v2491_v3 = vsel %vm1736_vm5, %v7192_v10, -inf  ;;  %v5107_v17 = vpop.eup %5106  ;;  %v2452_v38 = vmul.f32 %v5105_v23, %v6930_v19 }
 0x484   :  { %2492 = vmax.xlane.f32.xlu0 %v2491_v3  ;;  %v2430_v63 = vpop.xlane.xlu0 %2429  ;;  %v1864_v62 = vmul.f32 %v5107_v17, %v6924_v44 }
 0x485   :  { %v1842_v41 = vpop.xlane.xlu1 %1841  ;;  %5120 = vrcp.f32 %v2430_v63  ;;  %v7200_v43 = vsel %vm1881_vm8, %v2452_v38, -1.0 }
 0x486   :  { %v5109_v32 = vpop.eup %5108  ;;  %5122 = vrcp.f32 %v1842_v41  ;;  %v2494_v20 = vsel %vm1736_vm5, %v7200_v43, -inf  ;;  %v7206_v0 = vsel %vm1881_vm8, %v1864_v62, -1.0 }
 0x487   :  { %v5111_v58 = vpop.eup %5110  ;;  %2495 = vmax.xlane.f32.xlu1 %v2494_v20  ;;  %v1907_v19 = vsel %vm1736_vm5, %v7206_v0, -inf  ;;  %v1866_v44 = vmul.f32 %v5109_v32, %v6936_v47 }
 0x488   :  { %1908 = vmax.xlane.f32.xlu0 %v1907_v19  ;;  %v1845_v23 = vpop.xlane.xlu0 %1844  ;;  %v2454_v17 = vmul.f32 %v5111_v58, %v6940_v35 }
 0x489   :  { %v2433_v3 = vpop.xlane.xlu1 %2432  ;;  %5124 = vrcp.f32 %v1845_v23  ;;  %v7214_v38 = vsel %vm1881_vm8, %v1866_v44, -1.0 }
 0x48a   :  { %v5113_v63 = vpop.eup %5112  ;;  %5126 = vrcp.f32 %v2433_v3  ;;  %v1910_v41 = vsel %vm1736_vm5, %v7214_v38, -inf  ;;  %v7220_v62 = vsel %vm1881_vm8, %v2454_v17, -1.0 }
 0x48b   :  { %v5115_v47 = vpop.eup %5114  ;;  %1911 = vmax.xlane.f32.xlu1 %v1910_v41  ;;  %v2497_v32 = vsel %vm1736_vm5, %v7220_v62, -inf  ;;  %v2456_v35 = vmul.f32 %v5113_v63, %v6950_v45 }
 0x48c   :  { %2498 = vmax.xlane.f32.xlu0 %v2497_v32  ;;  %v2436_v20 = vpop.xlane.xlu0 %2435  ;;  %v1868_v19 = vmul.f32 %v5115_v47, %v6946_v31 }
 0x48d   :  { %v1848_v58 = vpop.xlane.xlu1 %1847  ;;  %5128 = vrcp.f32 %v2436_v20  ;;  %v7228_v44 = vsel %vm1881_vm8, %v2456_v35, -1.0 }
 0x48e   :  { %v5117_v23 = vpop.eup %5116  ;;  %5130 = vrcp.f32 %v1848_v58  ;;  %v2500_v3 = vsel %vm1736_vm5, %v7228_v44, -inf  ;;  %v7234_v17 = vsel %vm1881_vm8, %v1868_v19, -1.0 }
 0x48f   :  { %v5119_v45 = vpop.eup %5118  ;;  %2501 = vmax.xlane.f32.xlu1 %v2500_v3  ;;  %v1913_v63 = vsel %vm1736_vm5, %v7234_v17, -inf  ;;  %v1870_v31 = vmul.f32 %v5117_v23, %v6956_v36 }
 0x490   :  { %1914 = vmax.xlane.f32.xlu0 %v1913_v63  ;;  %v1851_v41 = vpop.xlane.xlu0 %1850  ;;  %v2458_v32 = vmul.f32 %v5119_v45, %v6960_v6 }
 0x491   :  { %v2439_v47 = vpop.xlane.xlu1 %2438  ;;  %5132 = vrcp.f32 %v1851_v41  ;;  %v7242_v35 = vsel %vm1881_vm8, %v1870_v31, -1.0 }
 0x492   :  { %v5121_v20 = vpop.eup %5120  ;;  %5134 = vrcp.f32 %v2439_v47  ;;  %v1916_v58 = vsel %vm1736_vm5, %v7242_v35, -inf  ;;  %v7248_v19 = vsel %vm1881_vm8, %v2458_v32, -1.0 }
 0x493   :  { %v5123_v36 = vpop.eup %5122  ;;  %1917 = vmax.xlane.f32.xlu1 %v1916_v58  ;;  %v2503_v23 = vsel %vm1736_vm5, %v7248_v19, -inf  ;;  %v2460_v6 = vmul.f32 %v5121_v20, %v6970_v30 }
 0x494   :  { %2504 = vmax.xlane.f32.xlu0 %v2503_v23  ;;  %v2442_v3 = vpop.xlane.xlu0 %2441  ;;  %v1872_v63 = vmul.f32 %v5123_v36, %v6966_v28 }
 0x495   :  { %v1854_v45 = vpop.xlane.xlu1 %1853  ;;  %5136 = vrcp.f32 %v2442_v3  ;;  %v7256_v31 = vsel %vm1881_vm8, %v2460_v6, -1.0 }
 0x496   :  { %v5125_v41 = vpop.eup %5124  ;;  %5138 = vrcp.f32 %v1854_v45  ;;  %v2506_v47 = vsel %vm1736_vm5, %v7256_v31, -inf  ;;  %v7262_v32 = vsel %vm1881_vm8, %v1872_v63, -1.0 }
 0x497   :  { %v5127_v30 = vpop.eup %5126  ;;  %2507 = vmax.xlane.f32.xlu1 %v2506_v47  ;;  %v1919_v20 = vsel %vm1736_vm5, %v7262_v32, -inf  ;;  %v1874_v28 = vmul.f32 %v5125_v41, %v6972_v22 }
 0x498   :  { %1920 = vmax.xlane.f32.xlu0 %v1919_v20  ;;  %v3580_v58 = vpop.xlane.xlu0 %3579  ;;  %v2462_v23 = vmul.f32 %v5127_v30, %v6980_v5 }
 0x499   :  { %v2993_v36 = vpop.xlane.xlu1 %2992  ;;  %5140 = vrcp.f32 %v3580_v58  ;;  %v7270_v6 = vsel %vm1881_vm8, %v1874_v28, -1.0 }
 0x49a   :  { %v5129_v3 = vpop.eup %5128  ;;  %5142 = vrcp.f32 %v2993_v36  ;;  %v1922_v45 = vsel %vm1736_vm5, %v7270_v6, -inf  ;;  %v7276_v63 = vsel %vm1881_vm8, %v2462_v23, -1.0 }
 0x49b   :  { %v5131_v22 = vpop.eup %5130  ;;  %1923 = vmax.xlane.f32.xlu1 %v1922_v45  ;;  %v2509_v41 = vsel %vm1736_vm5, %v7276_v63, -inf  ;;  %v2464_v5 = vmul.f32 %v5129_v3, %v6990_v16 }
 0x49c   :  { %2510 = vmax.xlane.f32.xlu0 %v2509_v41  ;;  %v2996_v47 = vpop.xlane.xlu0 %2995  ;;  %v1876_v20 = vmul.f32 %v5131_v22, %v6984_v59 }
 0x49d   :  { %v3583_v30 = vpop.xlane.xlu1 %3582  ;;  %5144 = vrcp.f32 %v2996_v47  ;;  %v7284_v28 = vsel %vm1881_vm8, %v2464_v5, -1.0 }
 0x49e   :  { %v5133_v58 = vpop.eup %5132  ;;  %5146 = vrcp.f32 %v3583_v30  ;;  %v2512_v36 = vsel %vm1736_vm5, %v7284_v28, -inf  ;;  %v7290_v23 = vsel %vm1881_vm8, %v1876_v20, -1.0 }
 0x49f   :  { %v5135_v16 = vpop.eup %5134  ;;  %2513 = vmax.xlane.f32.xlu1 %v2512_v36  ;;  %v1925_v3 = vsel %vm1736_vm5, %v7290_v23, -inf  ;;  %v1878_v59 = vmul.f32 %v5133_v58, %v6994_v18 }
 0x4a0   :  { %1926 = vmax.xlane.f32.xlu0 %v1925_v3  ;;  %v3586_v45 = vpop.xlane.xlu0 %3585  ;;  %v2466_v41 = vmul.f32 %v5135_v16, %v7000_v40 }
 0x4a1   :  { %v2999_v22 = vpop.xlane.xlu1 %2998  ;;  %5148 = vrcp.f32 %v3586_v45  ;;  %v7298_v5 = vsel %vm1881_vm8, %v1878_v59, -1.0 }
 0x4a2   :  { %v5137_v47 = vpop.eup %5136  ;;  %5150 = vrcp.f32 %v2999_v22  ;;  %v1928_v30 = vsel %vm1736_vm5, %v7298_v5, -inf  ;;  %v7304_v20 = vsel %vm1881_vm8, %v2466_v41, -1.0 }
 0x4a3   :  { %v5139_v18 = vpop.eup %5138  ;;  %1929 = vmax.xlane.f32.xlu1 %v1928_v30  ;;  %v2515_v58 = vsel %vm1736_vm5, %v7304_v20, -inf  ;;  %v2468_v40 = vmul.f32 %v5137_v47, %v7010_v7 }
 0x4a4   :  { %2516 = vmax.xlane.f32.xlu0 %v2515_v58  ;;  %v3002_v36 = vpop.xlane.xlu0 %3001  ;;  %v1880_v3 = vmul.f32 %v5139_v18, %v7004_v61 }
 0x4a5   :  { %v3589_v16 = vpop.xlane.xlu1 %3588  ;;  %5152 = vrcp.f32 %v3002_v36  ;;  %v7312_v59 = vsel %vm1881_vm8, %v2468_v40, -1.0 }
 0x4a6   :  { %v5141_v45 = vpop.eup %5140  ;;  %5154 = vrcp.f32 %v3589_v16  ;;  %v2518_v22 = vsel %vm1773_vm7, %v7312_v59, -inf  ;;  %v7318_v41 = vsel %vm1881_vm8, %v1880_v3, -1.0 }
 0x4a7   :  { %v5143_v7 = vpop.eup %5142  ;;  %2519 = vmax.xlane.f32.xlu1 %v2518_v22  ;;  %v1931_v47 = vsel %vm1773_vm7, %v7318_v41, -inf  ;;  %v3618_v61 = vmul.f32 %v5141_v45, %v7020_v27 }
 0x4a8   :  { %1932 = vmax.xlane.f32.xlu0 %v1931_v47  ;;  %v3592_v30 = vpop.xlane.xlu0 %3591  ;;  %v3031_v58 = vmul.f32 %v5143_v7, %v7016_v2 }
 0x4a9   :  { %v3005_v18 = vpop.xlane.xlu1 %3004  ;;  %5156 = vrcp.f32 %v3592_v30  ;;  %v7326_v40 = vsel %vm1881_vm8, %v3618_v61, -1.0 }
 0x4aa   :  { %v5145_v36 = vpop.eup %5144  ;;  %5158 = vrcp.f32 %v3005_v18  ;;  %v3656_v16 = vsel %vm1736_vm5, %v7326_v40, -inf  ;;  %v7332_v3 = vsel %vm1881_vm8, %v3031_v58, -1.0 }
 0x4ab   :  { %v5147_v27 = vpop.eup %5146  ;;  %3657 = vmax.xlane.f32.xlu1 %v3656_v16  ;;  %v3069_v45 = vsel %vm1736_vm5, %v7332_v3, -inf  ;;  %v3033_v2 = vmul.f32 %v5145_v36, %v7030_v1 }
 0x4ac   :  { %3070 = vmax.xlane.f32.xlu0 %v3069_v45  ;;  %v3008_v22 = vpop.xlane.xlu0 %3007  ;;  %v3620_v47 = vmul.f32 %v5147_v27, %v7026_v14 }
 0x4ad   :  { %v3595_v7 = vpop.xlane.xlu1 %3594  ;;  %5160 = vrcp.f32 %v3008_v22  ;;  %v7340_v61 = vsel %vm1881_vm8, %v3033_v2, -1.0 }
 0x4ae   :  { %v5149_v30 = vpop.eup %5148  ;;  %5162 = vrcp.f32 %v3595_v7  ;;  %v3072_v18 = vsel %vm1736_vm5, %v7340_v61, -inf  ;;  %v7346_v58 = vsel %vm1881_vm8, %v3620_v47, -1.0 }
 0x4af   :  { %v5151_v1 = vpop.eup %5150  ;;  %3073 = vmax.xlane.f32.xlu1 %v3072_v18  ;;  %v3659_v36 = vsel %vm1736_vm5, %v7346_v58, -inf  ;;  %v3622_v14 = vmul.f32 %v5149_v30, %v7040_v12 }
 0x4b0   :  { %3660 = vmax.xlane.f32.xlu0 %v3659_v36  ;;  %v3598_v16 = vpop.xlane.xlu0 %3597  ;;  %v3035_v45 = vmul.f32 %v5151_v1, %v7036_v57 }
 0x4b1   :  { %v3011_v27 = vpop.xlane.xlu1 %3010  ;;  %5164 = vrcp.f32 %v3598_v16  ;;  %v7354_v2 = vsel %vm1881_vm8, %v3622_v14, -1.0 }
 0x4b2   :  { %v5153_v22 = vpop.eup %5152  ;;  %5166 = vrcp.f32 %v3011_v27  ;;  %v3662_v7 = vsel %vm1736_vm5, %v7354_v2, -inf  ;;  %v7360_v47 = vsel %vm1881_vm8, %v3035_v45, -1.0 }
 0x4b3   :  { %v5155_v12 = vpop.eup %5154  ;;  %3663 = vmax.xlane.f32.xlu1 %v3662_v7  ;;  %v3075_v30 = vsel %vm1736_vm5, %v7360_v47, -inf  ;;  %v3037_v57 = vmul.f32 %v5153_v22, %v7050_v55 }
 0x4b4   :  { %3076 = vmax.xlane.f32.xlu0 %v3075_v30  ;;  %v3014_v18 = vpop.xlane.xlu0 %3013  ;;  %v3624_v36 = vmul.f32 %v5155_v12, %v7046_v33 }
 0x4b5   :  { %v3601_v1 = vpop.xlane.xlu1 %3600  ;;  %5168 = vrcp.f32 %v3014_v18  ;;  %v7368_v14 = vsel %vm1881_vm8, %v3037_v57, -1.0 }
 0x4b6   :  { %v5157_v16 = vpop.eup %5156  ;;  %5170 = vrcp.f32 %v3601_v1  ;;  %v3078_v27 = vsel %vm1736_vm5, %v7368_v14, -inf  ;;  %v7374_v45 = vsel %vm1881_vm8, %v3624_v36, -1.0 }
 0x4b7   :  { %v5159_v55 = vpop.eup %5158  ;;  %3079 = vmax.xlane.f32.xlu1 %v3078_v27  ;;  %v3665_v22 = vsel %vm1736_vm5, %v7374_v45, -inf  ;;  %v3626_v33 = vmul.f32 %v5157_v16, %v7060_v21 }
 0x4b8   :  { %3666 = vmax.xlane.f32.xlu0 %v3665_v22  ;;  %v3604_v7 = vpop.xlane.xlu0 %3603  ;;  %v3039_v30 = vmul.f32 %v5159_v55, %v7052_v11 }
 0x4b9   :  { %v3017_v12 = vpop.xlane.xlu1 %3016  ;;  %5172 = vrcp.f32 %v3604_v7  ;;  %v7382_v57 = vsel %vm1881_vm8, %v3626_v33, -1.0 }
 0x4ba   :  { %v5161_v18 = vpop.eup %5160  ;;  %5174 = vrcp.f32 %v3017_v12  ;;  %v3668_v1 = vsel %vm1736_vm5, %v7382_v57, -inf  ;;  %v7388_v36 = vsel %vm1881_vm8, %v3039_v30, -1.0 }
 0x4bb   :  { %v5163_v21 = vpop.eup %5162  ;;  %3669 = vmax.xlane.f32.xlu1 %v3668_v1  ;;  %v3081_v16 = vsel %vm1736_vm5, %v7388_v36, -inf  ;;  %v3041_v11 = vmul.f32 %v5161_v18, %v7070_v15 }
 0x4bc   :  { %3082 = vmax.xlane.f32.xlu0 %v3081_v16  ;;  %v3020_v27 = vpop.xlane.xlu0 %3019  ;;  %v3628_v22 = vmul.f32 %v5163_v21, %v7064_v39 }
 0x4bd   :  { %v3607_v55 = vpop.xlane.xlu1 %3606  ;;  %5176 = vrcp.f32 %v3020_v27  ;;  %v7396_v33 = vsel %vm1881_vm8, %v3041_v11, -1.0 }
 0x4be   :  { %v5165_v7 = vpop.eup %5164  ;;  %5178 = vrcp.f32 %v3607_v55  ;;  %v3084_v12 = vsel %vm1736_vm5, %v7396_v33, -inf  ;;  %v7402_v30 = vsel %vm1881_vm8, %v3628_v22, -1.0 }
 0x4bf   :  { %v5167_v15 = vpop.eup %5166  ;;  %3085 = vmax.xlane.f32.xlu1 %v3084_v12  ;;  %v3671_v18 = vsel %vm1736_vm5, %v7402_v30, -inf  ;;  %v3630_v39 = vmul.f32 %v5165_v7, %v7080_v52 }
 0x4c0   :  { %3672 = vmax.xlane.f32.xlu0 %v3671_v18  ;;  %v3610_v1 = vpop.xlane.xlu0 %3609  ;;  %v3043_v16 = vmul.f32 %v5167_v15, %v7074_v51 }
 0x4c1   :  { %v3023_v21 = vpop.xlane.xlu1 %3022  ;;  %5180 = vrcp.f32 %v3610_v1  ;;  %v7410_v11 = vsel %vm1881_vm8, %v3630_v39, -1.0 }
 0x4c2   :  { %v5169_v27 = vpop.eup %5168  ;;  %5182 = vrcp.f32 %v3023_v21  ;;  %v3674_v55 = vsel %vm1736_vm5, %v7410_v11, -inf  ;;  %v7416_v22 = vsel %vm1881_vm8, %v3043_v16, -1.0 }
 0x4c3   :  { %v5171_v52 = vpop.eup %5170  ;;  %3675 = vmax.xlane.f32.xlu1 %v3674_v55  ;;  %v3087_v7 = vsel %vm1736_vm5, %v7416_v22, -inf  ;;  %v3045_v51 = vmul.f32 %v5169_v27, %v7090_v48 }
 0x4c4   :  { %3088 = vmax.xlane.f32.xlu0 %v3087_v7  ;;  %v3026_v12 = vpop.xlane.xlu0 %3025  ;;  %v3632_v18 = vmul.f32 %v5171_v52, %v7084_v56 }
 0x4c5   :  { %v3613_v15 = vpop.xlane.xlu1 %3612  ;;  %5184 = vrcp.f32 %v3026_v12  ;;  %v7424_v39 = vsel %vm1881_vm8, %v3045_v51, -1.0 }
 0x4c6   :  { %v5173_v1 = vpop.eup %5172  ;;  %5186 = vrcp.f32 %v3613_v15  ;;  %v3090_v21 = vsel %vm1736_vm5, %v7424_v39, -inf  ;;  %v7430_v16 = vsel %vm1881_vm8, %v3632_v18, -1.0 }
 0x4c7   :  { %v5175_v48 = vpop.eup %5174  ;;  %3091 = vmax.xlane.f32.xlu1 %v3090_v21  ;;  %v3677_v27 = vsel %vm1736_vm5, %v7430_v16, -inf  ;;  %v3634_v56 = vmul.f32 %v5173_v1, %v7099_v9 }
 0x4c8   :  { %3678 = vmax.xlane.f32.xlu0 %v3677_v27  ;;  %v3616_v55 = vpop.xlane.xlu0 %3615  ;;  %v3047_v7 = vmul.f32 %v5175_v48, %v7096_v4 }
 0x4c9   :  { %v3029_v52 = vpop.xlane.xlu1 %3028  ;;  %5188 = vrcp.f32 %v3616_v55  ;;  %v7438_v51 = vsel %vm1881_vm8, %v3634_v56, -1.0 }
 0x4ca   :  { %v5177_v12 = vpop.eup %5176  ;;  %5190 = vrcp.f32 %v3029_v52  ;;  %v3680_v15 = vsel %vm1736_vm5, %v7438_v51, -inf  ;;  %v7444_v18 = vsel %vm1881_vm8, %v3047_v7, -1.0 }
 0x4cb   :  { %v5179_v9 = vpop.eup %5178  ;;  %3681 = vmax.xlane.f32.xlu1 %v3680_v15  ;;  %v3093_v1 = vsel %vm1736_vm5, %v7444_v18, -inf  ;;  %v3049_v4 = vmul.f32 %v5177_v12, %v7107_v34 }
 0x4cc   :  { %3094 = vmax.xlane.f32.xlu0 %v3093_v1  ;;  %v3636_v21 = vmul.f32 %v5179_v9, %v7105_v46 }
 0x4cd   :  { %v7452_v48 = vsel %vm1881_vm8, %v3049_v4, -1.0 }
 0x4ce   :  { %v5181_v27 = vpop.eup %5180  ;;  %v3096_v56 = vsel %vm1736_vm5, %v7452_v48, -inf  ;;  %v7458_v55 = vsel %vm1881_vm8, %v3636_v21, -1.0 }
 0x4cf   :  { %v5183_v52 = vpop.eup %5182  ;;  %3097 = vmax.xlane.f32.xlu1 %v3096_v56  ;;  %v3683_v34 = vsel %vm1736_vm5, %v7458_v55, -inf  ;;  %v3638_v7 = vmul.f32 %v5181_v27, %v7115_v25 }
 0x4d0   :  { %3684 = vmax.xlane.f32.xlu0 %v3683_v34  ;;  %v3051_v46 = vmul.f32 %v5183_v52, %v7113_v13 }
 0x4d1   :  { %v7466_v12 = vsel %vm1881_vm8, %v3638_v7, -1.0 }
 0x4d2   :  { %v5185_v15 = vpop.eup %5184  ;;  %v3686_v9 = vsel %vm1736_vm5, %v7466_v12, -inf  ;;  %v7472_v1 = vsel %vm1881_vm8, %v3051_v46, -1.0 }
 0x4d3   :  { %v5187_v4 = vpop.eup %5186  ;;  %3687 = vmax.xlane.f32.xlu1 %v3686_v9  ;;  %v3099_v25 = vsel %vm1736_vm5, %v7472_v1, -inf  ;;  %v3053_v21 = vmul.f32 %v5185_v15, %v7123_v29 }
 0x4d4   :  { %3100 = vmax.xlane.f32.xlu0 %v3099_v25  ;;  %v3640_v13 = vmul.f32 %v5187_v4, %v7121_v54 }
 0x4d5   :  { %v7480_v27 = vsel %vm1881_vm8, %v3053_v21, -1.0 }
 0x4d6   :  { %v5189_v56 = vpop.eup %5188  ;;  %v3102_v52 = vsel %vm1736_vm5, %v7480_v27, -inf  ;;  %v7486_v34 = vsel %vm1881_vm8, %v3640_v13, -1.0 }
 0x4d7   :  { %v5191_v7 = vpop.eup %5190  ;;  %3103 = vmax.xlane.f32.xlu1 %v3102_v52  ;;  %v3689_v29 = vsel %vm1736_vm5, %v7486_v34, -inf  ;;  %v3642_v46 = vmul.f32 %v5189_v56, %v7131_v37 }
 0x4d8   :  { %3690 = vmax.xlane.f32.xlu0 %v3689_v29  ;;  %v3055_v54 = vmul.f32 %v5191_v7, %v7129_v53  ;;  %v8800_v7 = vld [vmem:[#allocation12_spill] sm:$0xff] }
 0x4d9   :  { %v7494_v15 = vsel %vm1881_vm8, %v3642_v46, -1.0 }
 0x4da   :  { %v3692_v9 = vsel %vm1773_vm7, %v7494_v15, -inf  ;;  %v7500_v4 = vsel %vm1881_vm8, %v3055_v54, -1.0 }
 0x4db   :  { %3693 = vmax.xlane.f32.xlu1 %v3692_v9  ;;  %v3105_v25 = vsel %vm1773_vm7, %v7500_v4, -inf }
 0x4dc   :  { %3106 = vmax.xlane.f32.xlu0 %v3105_v25 }
 0x4fc   :  { %v1897_v37 = vpop.xlane.xlu0 %1896 }
 0x4fd   :  { %vm1934_vm10 = vcmp.ge.f32.partialorder %v7143_v8, %v1897_v37  ;;  %2156 = vst.msk [vmem:[%s8710_s10] sm:$0xff] %vm2155_vm9, %v1897_v37 }
 0x4fe   :  { %v1947_v53 = vsel %vm1934_vm10, %v7137_v26, 82 }
 0x4ff   :  { %v7511_v21 = vsel %vm1736_vm5, %v1947_v53, 2147483647 }
 0x500   :  { %v2484_v13 = vpop.xlane.xlu1 %2483  ;;  %v1962_v56 = vshra.s32 %v7511_v21, 16 }
 0x501   :  { %v2487_v52 = vpop.xlane.xlu0 %2486  ;;  %vm2521_vm11 = vcmp.ge.f32.partialorder %v8800_v7, %v2484_v13  ;;  %4119 = vst.msk [vmem:[%s8710_s10 + $0x68] sm:$0xff] %vm2155_vm9, %v2484_v13 }
 0x502   :  { %vm2522_vm12 = vcmp.ge.f32.partialorder %v7157_v50, %v2487_v52  ;;  %4120 = vst.msk [vmem:[%s8710_s10 + $0x70] sm:$0xff] %vm2155_vm9, %v2487_v52  ;;  %v2534_v8 = vsel %vm2521_vm11, %v7137_v26, 82  ;;  %v7525_v29 = vcvt.s32.f32 %v1962_v56 }
 0x503   :  { %v2535_v46 = vsel %vm2522_vm12, %v7137_v26, 82  ;;  %v7529_v54 = vsel %vm1736_vm5, %v2534_v8, 2147483647 }
 0x504   :  { %1965 = vmin.xlane.f32.xlu1 %v7525_v29  ;;  %v1900_v9 = vpop.xlane.xlu1 %1899  ;;  %v2549_v25 = vshra.s32 %v7529_v54, 16  ;;  %v7534_v50 = vsel %vm1736_vm5, %v2535_v46, 2147483647 }
 0x505   :  { %v1903_v37 = vpop.xlane.xlu0 %1902  ;;  %vm1935_vm13 = vcmp.ge.f32.partialorder %v7165_v49, %v1900_v9  ;;  %2157 = vst.msk [vmem:[%s8710_s10 + $0x8] sm:$0xff] %vm2155_vm9, %v1900_v9  ;;  %v2564_v56 = vshra.s32 %v7534_v50, 16 }
 0x506   :  { %vm1936_vm14 = vcmp.ge.f32.partialorder %v7171_v60, %v1903_v37  ;;  %2158 = vst.msk [vmem:[%s8710_s10 + $0x10] sm:$0xff] %vm2155_vm9, %v1903_v37  ;;  %v1948_v53 = vsel %vm1935_vm13, %v7137_v26, 82  ;;  %v7547_v13 = vcvt.s32.f32 %v2549_v25 }
 0x507   :  { %v1949_v49 = vsel %vm1936_vm14, %v7137_v26, 82  ;;  %v7552_v52 = vsel %vm1736_vm5, %v1948_v53, 2147483647  ;;  %v7565_v9 = vcvt.s32.f32 %v2564_v56 }
 0x508   :  { %8801 = vst [vmem:[#allocation9_spill] sm:$0xff] %v7547_v13  ;;  %2552 = vmin.xlane.f32.xlu0 %v7547_v13  ;;  %v2490_v7 = vpop.xlane.xlu1 %2489  ;;  %v1977_v60 = vshra.s32 %v7552_v52, 16  ;;  %v7557_v8 = vsel %vm1736_vm5, %v1949_v49, 2147483647 }
 0x509   :  { %vm2523_vm15 = vcmp.ge.f32.partialorder %v7178_v42, %v2490_v7  ;;  %4121 = vst.msk [vmem:[%s8710_s10 + $0x78] sm:$0xff] %vm2155_vm9, %v2490_v7  ;;  %v1992_v37 = vshra.s32 %v7557_v8, 16 }
 0x50a   :  { %v2536_v46 = vsel %vm2523_vm15, %v7137_v26, 82  ;;  %v7567_v25 = vcvt.s32.f32 %v1977_v60 }
 0x50b   :  { %v7571_v53 = vsel %vm1736_vm5, %v2536_v46, 2147483647  ;;  %v7587_v7 = vcvt.s32.f32 %v1992_v37 }
 0x50c   :  { %8802 = vst [vmem:[#allocation14_spill] sm:$0xff] %v7567_v25  ;;  %2567 = vmin.xlane.f32.xlu0 %v7565_v9  ;;  %1980 = vmin.xlane.f32.xlu1 %v7567_v25  ;;  %v1906_v42 = vpop.xlane.xlu1 %1905  ;;  %v2579_v49 = vshra.s32 %v7571_v53, 16 }
 0x50d   :  { %v2493_v13 = vpop.xlane.xlu0 %2492  ;;  %vm1937_vm0 = vcmp.ge.f32.partialorder %v7186_v24, %v1906_v42  ;;  %2159 = vst.msk [vmem:[%s8710_s10 + $0x18] sm:$0xff] %vm2155_vm9, %v1906_v42 }
 0x50e   :  { %vm2524_vm1 = vcmp.ge.f32.partialorder %v7192_v10, %v2493_v13  ;;  %4122 = vst.msk [vmem:[%s8710_s10 + $0x80] sm:$0xff] %vm2155_vm9, %v2493_v13  ;;  %v1950_v56 = vsel %vm1937_vm0, %v7137_v26, 82  ;;  %v7589_v60 = vcvt.s32.f32 %v2579_v49 }
 0x50f   :  { %v2537_v24 = vsel %vm2524_vm1, %v7137_v26, 82  ;;  %v7593_v46 = vsel %vm1736_vm5, %v1950_v56, 2147483647 }
 0x510   :  { %1995 = vmin.xlane.f32.xlu1 %v7587_v7  ;;  %2582 = vmin.xlane.f32.xlu0 %v7589_v60  ;;  %v2007_v10 = vshra.s32 %v7593_v46, 16  ;;  %v7599_v42 = vsel %vm1736_vm5, %v2537_v24, 2147483647  ;;  %v2496_v13 = vpop.xlane.xlu1 %2495 }
 0x511   :  { %8803 = vst [vmem:[#allocation15_spill] sm:$0xff] %v7599_v42  ;;  %v1909_v25 = vpop.xlane.xlu0 %1908  ;;  %vm2525_vm2 = vcmp.ge.f32.partialorder %v7200_v43, %v2496_v13  ;;  %4123 = vst.msk [vmem:[%s8710_s10 + $0x88] sm:$0xff] %vm2155_vm9, %v2496_v13  ;;  %v2594_v49 = vshra.s32 %v7599_v42, 16 }
 0x512   :  { %v7606_v37 = vcvt.s32.f32 %v2007_v10  ;;  %vm1938_vm3 = vcmp.ge.f32.partialorder %v7206_v0, %v1909_v25  ;;  %2160 = vst.msk [vmem:[%s8710_s10 + $0x20] sm:$0xff] %vm2155_vm9, %v1909_v25  ;;  %v2538_v56 = vsel %vm2525_vm2, %v7137_v26, 82 }
 0x513   :  { %v1951_v43 = vsel %vm1938_vm3, %v7137_v26, 82  ;;  %v7618_v24 = vsel %vm1736_vm5, %v2538_v56, 2147483647  ;;  %v7629_v25 = vcvt.s32.f32 %v2594_v49  ;;  %vm2168_vm3 = vcmask 3072  }
 0x514   :  { %8804 = vst [vmem:[#allocation10_spill] sm:$0xff] %v7606_v37  ;;  %2010 = vmin.xlane.f32.xlu1 %v7606_v37  ;;  %v1912_v10 = vpop.xlane.xlu1 %1911  ;;  %v2609_v13 = vshra.s32 %v7618_v24, 16  ;;  %v7622_v42 = vsel %vm1736_vm5, %v1951_v43, 2147483647 }
 0x515   :  { %v2499_v0 = vpop.xlane.xlu0 %2498  ;;  %vm1939_vm4 = vcmp.ge.f32.partialorder %v7214_v38, %v1912_v10  ;;  %2161 = vst.msk [vmem:[%s8710_s10 + $0x28] sm:$0xff] %vm2155_vm9, %v1912_v10  ;;  %v2022_v37 = vshra.s32 %v7622_v42, 16 }
 0x516   :  { %vm2526_vm6 = vcmp.ge.f32.partialorder %v7220_v62, %v2499_v0  ;;  %4124 = vst.msk [vmem:[%s8710_s10 + $0x90] sm:$0xff] %vm2155_vm9, %v2499_v0  ;;  %v1952_v56 = vsel %vm1939_vm4, %v7137_v26, 82  ;;  %v7638_v43 = vcvt.s32.f32 %v2609_v13 }
 0x517   :  { %v2539_v38 = vsel %vm2526_vm6, %v7137_v26, 82  ;;  %v7643_v49 = vsel %vm1736_vm5, %v1952_v56, 2147483647  ;;  %v7651_v13 = vcvt.s32.f32 %v2022_v37 }
 0x518   :  { %8805 = vst [vmem:[#allocation17_spill] sm:$0xff] %v7638_v43  ;;  %2597 = vmin.xlane.f32.xlu1 %v7629_v25  ;;  %8806 = vst [vmem:[#allocation16_spill] sm:$0xff] %v7643_v49  ;;  %2612 = vmin.xlane.f32.xlu0 %v7638_v43  ;;  %v2502_v10 = vpop.xlane.xlu1 %2501  ;;  %v2037_v0 = vshra.s32 %v7643_v49, 16 }
 0x519   :  { %v1915_v62 = vpop.xlane.xlu0 %1914  ;;  %vm2527_vm8 = vcmp.ge.f32.partialorder %v7228_v44, %v2502_v10  ;;  %4125 = vst.msk [vmem:[%s8710_s10 + $0x98] sm:$0xff] %vm2155_vm9, %v2502_v10  ;;  %v7661_v44 = vsel %vm1736_vm5, %v2539_v38, 2147483647 }
 0x51a   :  { %vm1940_vm10 = vcmp.ge.f32.partialorder %v7234_v17, %v1915_v62  ;;  %2162 = vst.msk [vmem:[%s8710_s10 + $0x30] sm:$0xff] %vm2155_vm9, %v1915_v62  ;;  %v2540_v56 = vsel %vm2527_vm8, %v7137_v26, 82  ;;  %v7674_v38 = vcvt.s32.f32 %v2037_v0  ;;  %v2624_v62 = vshra.s32 %v7661_v44, 16 }
 0x51b   :  { %v1953_v43 = vsel %vm1940_vm10, %v7137_v26, 82  ;;  %v7666_v37 = vsel %vm1736_vm5, %v2540_v56, 2147483647 }
 0x51c   :  { %2025 = vmin.xlane.f32.xlu1 %v7651_v13  ;;  %8807 = vst [vmem:[#allocation13_spill] sm:$0xff] %v7666_v37  ;;  %v1918_v10 = vpop.xlane.xlu1 %1917  ;;  %v2639_v17 = vshra.s32 %v7666_v37, 16  ;;  %8808 = vst [vmem:[#allocation11_spill] sm:$0xff] %v7674_v38  ;;  %v7684_v37 = vsel %vm1736_vm5, %v1953_v43, 2147483647 }
 0x51d   :  { %v2505_v49 = vpop.xlane.xlu0 %2504  ;;  %vm1941_vm11 = vcmp.ge.f32.partialorder %v7242_v35, %v1918_v10  ;;  %2163 = vst.msk [vmem:[%s8710_s10 + $0x38] sm:$0xff] %vm2155_vm9, %v1918_v10  ;;  %8810 = vst [vmem:[#allocation18_spill] sm:$0xff] %v7684_v37  ;;  %v2052_v43 = vshra.s32 %v7684_v37, 16 }
 0x51e   :  { %4126 = vst.msk [vmem:[%s8710_s10 + $0xa0] sm:$0xff] %vm2155_vm9, %v2505_v49  ;;  %v7681_v56 = vcvt.s32.f32 %v2639_v17  ;;  %v1954_v35 = vsel %vm1941_vm11, %v7137_v26, 82  ;;  %vm2528_vm12 = vcmp.ge.f32.partialorder %v7248_v19, %v2505_v49  ;;  %v7695_v17 = vcvt.s32.f32 %v2624_v62 }
 0x51f   :  { %v7704_v49 = vsel %vm1736_vm5, %v1954_v35, 2147483647  ;;  %v7717_v35 = vcvt.s32.f32 %v2052_v43 }
 0x520   :  { %8809 = vst [vmem:[#allocation12_spill] sm:$0xff] %v7681_v56  ;;  %2040 = vmin.xlane.f32.xlu1 %v7674_v38  ;;  %2642 = vmin.xlane.f32.xlu0 %v7681_v56  ;;  %v2508_v0 = vpop.xlane.xlu1 %2507  ;;  %8811 = vst [vmem:[#allocation19_spill] sm:$0xff] %v7704_v49  ;;  %v2067_v38 = vshra.s32 %v7704_v49, 16 }
 0x521   :  { %v1921_v10 = vpop.xlane.xlu0 %1920  ;;  %vm2529_vm13 = vcmp.ge.f32.partialorder %v7256_v31, %v2508_v0  ;;  %4127 = vst.msk [vmem:[%s8710_s10 + $0xa8] sm:$0xff] %vm2155_vm9, %v2508_v0  ;;  %v2541_v31 = vsel %vm2528_vm12, %v7137_v26, 82 }
 0x522   :  { %2164 = vst.msk [vmem:[%s8710_s10 + $0x40] sm:$0xff] %vm2155_vm9, %v1921_v10  ;;  %v2542_v19 = vsel %vm2529_vm13, %v7137_v26, 82  ;;  %vm1942_vm14 = vcmp.ge.f32.partialorder %v7262_v32, %v1921_v10  ;;  %v7727_v32 = vsel %vm1736_vm5, %v2541_v31, 2147483647 }
 0x523   :  { %v7709_v0 = vsel %vm1736_vm5, %v2542_v19, 2147483647  ;;  %8813 = vst [vmem:[#allocation21_spill] sm:$0xff] %v7727_v32  ;;  %v1955_v10 = vsel %vm1942_vm14, %v7137_v26, 82  ;;  %v2654_v31 = vshra.s32 %v7727_v32, 16 }
 0x524   :  { %2627 = vmin.xlane.f32.xlu1 %v7695_v17  ;;  %v1924_v62 = vpop.xlane.xlu1 %1923  ;;  %v2669_v37 = vshra.s32 %v7709_v0, 16 }
 0x525   :  { %v2511_v56 = vpop.xlane.xlu0 %2510  ;;  %2165 = vst.msk [vmem:[%s8710_s10 + $0x48] sm:$0xff] %vm2155_vm9, %v1924_v62  ;;  %vm1943_vm15 = vcmp.ge.f32.partialorder %v7270_v6, %v1924_v62  ;;  %v7747_v62 = vsel %vm1736_vm5, %v1955_v10, 2147483647  ;;  %v7761_v10 = vcvt.s32.f32 %v2654_v31 }
 0x526   :  { %4128 = vst.msk [vmem:[%s8710_s10 + $0xb0] sm:$0xff] %vm2155_vm9, %v2511_v56  ;;  %v7724_v19 = vcvt.s32.f32 %v2669_v37  ;;  %v7738_v37 = vcvt.s32.f32 %v2067_v38  ;;  %8815 = vst [vmem:[#allocation23_spill] sm:$0xff] %v7747_v62  ;;  %vm2530_vm1 = vcmp.ge.f32.partialorder %v7276_v63, %v2511_v56 }
 0x528   :  { %8812 = vst [vmem:[#allocation20_spill] sm:$0xff] %v7724_v19  ;;  %2055 = vmin.xlane.f32.xlu1 %v7717_v35  ;;  %2672 = vmin.xlane.f32.xlu0 %v7724_v19  ;;  %v2514_v43 = vpop.xlane.xlu1 %2513  ;;  %8814 = vst [vmem:[#allocation22_spill] sm:$0xff] %v7738_v37 }
 0x529   :  { %v1927_v49 = vpop.xlane.xlu0 %1926  ;;  %vm2531_vm0 = vcmp.ge.f32.partialorder %v7284_v28, %v2514_v43  ;;  %4129 = vst.msk [vmem:[%s8710_s10 + $0xb8] sm:$0xff] %vm2155_vm9, %v2514_v43  ;;  %v1956_v28 = vsel %vm1943_vm15, %v7137_v26, 82 }
 0x52a   :  { %2166 = vst.msk [vmem:[%s8710_s10 + $0x50] sm:$0xff] %vm2155_vm9, %v1927_v49  ;;  %v2544_v6 = vsel %vm2531_vm0, %v7137_v26, 82  ;;  %vm1944_vm4 = vcmp.ge.f32.partialorder %v7290_v23, %v1927_v49 }
 0x52b   :  { %v7752_v43 = vsel %vm1736_vm5, %v2544_v6, 2147483647  ;;  %v2543_v6 = vsel %vm2530_vm1, %v7137_v26, 82 }
 0x52c   :  { %2070 = vmin.xlane.f32.xlu1 %v7738_v37  ;;  %8816 = vst [vmem:[#allocation24_spill] sm:$0xff] %v7752_v43  ;;  %v1930_v38 = vpop.xlane.xlu1 %1929  ;;  %v2699_v32 = vshra.s32 %v7752_v43, 16  ;;  %v2082_v37 = vshra.s32 %v7747_v62, 16 }
 0x52d   :  { %v2517_v19 = vpop.xlane.xlu0 %2516  ;;  %vm1945_vm2 = vcmp.ge.f32.partialorder %v7298_v5, %v1930_v38  ;;  %2167 = vst.msk [vmem:[%s8710_s10 + $0x58] sm:$0xff] %vm2155_vm9, %v1930_v38  ;;  %v7772_v5 = vsel %vm1736_vm5, %v1956_v28, 2147483647 }
 0x52e   :  { %4130 = vst.msk [vmem:[%s8710_s10 + $0xc0] sm:$0xff] %vm2155_vm9, %v2517_v19  ;;  %v1958_v63 = vsel %vm1945_vm2, %v7137_v26, 82  ;;  %v7769_v56 = vcvt.s32.f32 %v2699_v32  ;;  %v7787_v32 = vcvt.s32.f32 %v2082_v37  ;;  %v2097_v28 = vshra.s32 %v7772_v5, 16 }
 0x52f   :  { %v7777_v31 = vsel %vm1736_vm5, %v1958_v63, 2147483647  ;;  %v1957_v63 = vsel %vm1944_vm4, %v7137_v26, 82  ;;  %vm2532_vm10 = vcmp.ge.f32.partialorder %v7304_v20, %v2517_v19 }
 0x530   :  { %2657 = vmin.xlane.f32.xlu1 %v7761_v10  ;;  %8817 = vst [vmem:[#allocation25_spill] sm:$0xff] %v7777_v31  ;;  %2702 = vmin.xlane.f32.xlu0 %v7769_v56  ;;  %v2520_v38 = vpop.xlane.xlu1 %2519  ;;  %v2127_v43 = vshra.s32 %v7777_v31, 16 }
 0x531   :  { %v1933_v62 = vpop.xlane.xlu0 %1932  ;;  %vm2533_vm6 = vcmp.ge.f32.partialorder %v7312_v59, %v2520_v38  ;;  %4131 = vst.msk [vmem:[%s8710_s10 + $0xc8] sm:$0xf] %vm2168_vm3, %v2520_v38  ;;  %v7799_v59 = vsel %vm1736_vm5, %v2543_v6, 2147483647  ;;  %v7817_v6 = vcvt.s32.f32 %v2097_v28 }
 0x532   :  { %vm1946_vm8 = vcmp.ge.f32.partialorder %v7318_v41, %v1933_v62  ;;  %2169 = vst.msk [vmem:[%s8710_s10 + $0x60] sm:$0xf] %vm2168_vm3, %v1933_v62  ;;  %v2546_v23 = vsel %vm2533_vm6, %v7137_v26, 82  ;;  %v7796_v49 = vcvt.s32.f32 %v2127_v43  ;;  %v2684_v19 = vshra.s32 %v7799_v59, 16 }
 0x533   :  { %v1959_v37 = vsel %vm1946_vm8, %v7137_v26, 82  ;;  %v7810_v43 = vsel %vm1773_vm7, %v2546_v23, 2147483647 }
 0x534   :  { %8818 = vst [vmem:[#allocation26_spill] sm:$0xff] %v7796_v49  ;;  %2085 = vmin.xlane.f32.xlu1 %v7787_v32  ;;  %2130 = vmin.xlane.f32.xlu0 %v7796_v49  ;;  %v3658_v41 = vpop.xlane.xlu1 %3657  ;;  %v7807_v62 = vsel %vm1773_vm7, %v1959_v37, 2147483647  ;;  %8820 = vst [vmem:[#allocation28_spill] sm:$0xff] %v7810_v43  ;;  %v2545_v37 = vsel %vm2532_vm10, %v7137_v26, 82 }
 0x535   :  { %8819 = vst [vmem:[#allocation27_spill] sm:$0xff] %v7807_v62  ;;  %v3071_v38 = vpop.xlane.xlu0 %3070  ;;  %vm3695_vm11 = vcmp.ge.f32.partialorder %v7326_v40, %v3658_v41  ;;  %4201 = vst.msk [vmem:[%s8710_s10 + $0x138] sm:$0xff] %vm2155_vm9, %v3658_v41  ;;  %v2142_v20 = vshra.s32 %v7807_v62, 16  ;;  %v7827_v40 = vsel %vm1736_vm5, %v1957_v63, 2147483647  ;;  %v2729_v41 = vshra.s32 %v7810_v43, 16 }
 0x536   :  { %4160 = vst.msk [vmem:[%s8710_s10 + $0xd0] sm:$0xff] %vm2155_vm9, %v3071_v38  ;;  %v3708_v23 = vsel %vm3695_vm11, %v7137_v26, 82  ;;  %vm3108_vm12 = vcmp.ge.f32.partialorder %v7332_v3, %v3071_v38  ;;  %v7844_v63 = vcvt.s32.f32 %v2684_v19  ;;  %v7853_v38 = vsel %vm1736_vm5, %v2545_v37, 2147483647 }
 0x537   :  { %v7831_v28 = vcvt.s32.f32 %v2142_v20  ;;  %v7836_v49 = vsel %vm1736_vm5, %v3708_v23, 2147483647  ;;  %v2112_v20 = vshra.s32 %v7827_v40, 16  ;;  %v7857_v23 = vcvt.s32.f32 %v2729_v41 }
 0x538   :  { %2100 = vmin.xlane.f32.xlu1 %v7817_v6  ;;  %v3074_v62 = vpop.xlane.xlu1 %3073  ;;  %8822 = vst [vmem:[#allocation30_spill] sm:$0xff] %v7836_v49  ;;  %v2714_v41 = vshra.s32 %v7853_v38, 16 }
 0x539   :  { %8821 = vst [vmem:[#allocation29_spill] sm:$0xff] %v7831_v28  ;;  %v3661_v31 = vpop.xlane.xlu0 %3660  ;;  %2145 = vmin.xlane.f32.xlu0 %v7831_v28  ;;  %vm3109_vm13 = vcmp.ge.f32.partialorder %v7340_v61, %v3074_v62  ;;  %4161 = vst.msk [vmem:[%s8710_s10 + $0xd8] sm:$0xff] %vm2155_vm9, %v3074_v62  ;;  %v3121_v61 = vsel %vm3108_vm12, %v7137_v26, 82  ;;  %v3723_v62 = vshra.s32 %v7836_v49, 16  ;;  %v7870_v37 = vcvt.s32.f32 %v2112_v20 }
 0x53a   :  { %4202 = vst.msk [vmem:[%s8710_s10 + $0x140] sm:$0xff] %vm2155_vm9, %v3661_v31  ;;  %v3122_v3 = vsel %vm3109_vm13, %v7137_v26, 82  ;;  %8823 = vst [vmem:[#allocation31_spill] sm:$0xff] %v7857_v23  ;;  %vm3696_vm14 = vcmp.ge.f32.partialorder %v7346_v58, %v3661_v31  ;;  %v7879_v31 = vsel %vm1736_vm5, %v3121_v61, 2147483647  ;;  %v7896_v61 = vcvt.s32.f32 %v2714_v41 }
 0x53b   :  { %v7862_v43 = vsel %vm1736_vm5, %v3122_v3, 2147483647  ;;  %v7883_v3 = vcvt.s32.f32 %v3723_v62  ;;  %v3136_v62 = vshra.s32 %v7879_v31, 16 }
 0x53c   :  { %2687 = vmin.xlane.f32.xlu1 %v7844_v63  ;;  %v3664_v19 = vpop.xlane.xlu1 %3663  ;;  %8824 = vst [vmem:[#allocation32_spill] sm:$0xff] %v7862_v43  ;;  %v3151_v20 = vshra.s32 %v7862_v43, 16 }
 0x53d   :  { %v3077_v28 = vpop.xlane.xlu0 %3076  ;;  %2732 = vmin.xlane.f32.xlu0 %v7857_v23  ;;  %vm3697_vm15 = vcmp.ge.f32.partialorder %v7354_v2, %v3664_v19  ;;  %4203 = vst.msk [vmem:[%s8710_s10 + $0x148] sm:$0xff] %vm2155_vm9, %v3664_v19  ;;  %v3709_v2 = vsel %vm3696_vm14, %v7137_v26, 82  ;;  %8825 = vst [vmem:[#allocation33_spill] sm:$0xff] %v7883_v3 }
 0x53e   :  { %4162 = vst.msk [vmem:[%s8710_s10 + $0xe0] sm:$0xff] %vm2155_vm9, %v3077_v28  ;;  %v3710_v58 = vsel %vm3697_vm15, %v7137_v26, 82  ;;  %vm3110_vm0 = vcmp.ge.f32.partialorder %v7360_v47, %v3077_v28  ;;  %v7905_v28 = vsel %vm1736_vm5, %v3709_v2, 2147483647  ;;  %v7922_v2 = vcvt.s32.f32 %v3136_v62 }
 0x53f   :  { %v7888_v49 = vsel %vm1736_vm5, %v3710_v58, 2147483647  ;;  %v7909_v58 = vcvt.s32.f32 %v3151_v20  ;;  %v3738_v20 = vshra.s32 %v7905_v28, 16 }
 0x540   :  { %2115 = vmin.xlane.f32.xlu1 %v7870_v37  ;;  %v3080_v19 = vpop.xlane.xlu1 %3079  ;;  %8826 = vst [vmem:[#allocation34_spill] sm:$0xff] %v7888_v49  ;;  %v3753_v41 = vshra.s32 %v7888_v49, 16 }
 0x541   :  { %v3667_v23 = vpop.xlane.xlu0 %3666  ;;  %3726 = vmin.xlane.f32.xlu0 %v7883_v3  ;;  %vm3111_vm1 = vcmp.ge.f32.partialorder %v7368_v14, %v3080_v19  ;;  %4163 = vst.msk [vmem:[%s8710_s10 + $0xe8] sm:$0xff] %vm2155_vm9, %v3080_v19  ;;  %v3123_v14 = vsel %vm3110_vm0, %v7137_v26, 82  ;;  %8827 = vst [vmem:[#allocation35_spill] sm:$0xff] %v7909_v58 }
 0x542   :  { %4204 = vst.msk [vmem:[%s8710_s10 + $0x150] sm:$0xff] %vm2155_vm9, %v3667_v23  ;;  %v3124_v47 = vsel %vm3111_vm1, %v7137_v26, 82  ;;  %vm3698_vm2 = vcmp.ge.f32.partialorder %v7374_v45, %v3667_v23  ;;  %v7931_v23 = vsel %vm1736_vm5, %v3123_v14, 2147483647  ;;  %v7948_v14 = vcvt.s32.f32 %v3738_v20 }
 0x543   :  { %v7914_v43 = vsel %vm1736_vm5, %v3124_v47, 2147483647  ;;  %v7935_v47 = vcvt.s32.f32 %v3753_v41  ;;  %v3166_v41 = vshra.s32 %v7931_v23, 16 }
 0x544   :  { %2717 = vmin.xlane.f32.xlu1 %v7896_v61  ;;  %v3670_v19 = vpop.xlane.xlu1 %3669  ;;  %8828 = vst [vmem:[#allocation36_spill] sm:$0xff] %v7914_v43  ;;  %v3181_v62 = vshra.s32 %v7914_v43, 16 }
 0x545   :  { %v3083_v3 = vpop.xlane.xlu0 %3082  ;;  %3154 = vmin.xlane.f32.xlu0 %v7909_v58  ;;  %vm3699_vm4 = vcmp.ge.f32.partialorder %v7382_v57, %v3670_v19  ;;  %4205 = vst.msk [vmem:[%s8710_s10 + $0x158] sm:$0xff] %vm2155_vm9, %v3670_v19  ;;  %v3711_v57 = vsel %vm3698_vm2, %v7137_v26, 82  ;;  %8829 = vst [vmem:[#allocation37_spill] sm:$0xff] %v7935_v47 }
 0x546   :  { %4164 = vst.msk [vmem:[%s8710_s10 + $0xf0] sm:$0xff] %vm2155_vm9, %v3083_v3  ;;  %v3712_v45 = vsel %vm3699_vm4, %v7137_v26, 82  ;;  %vm3112_vm6 = vcmp.ge.f32.partialorder %v7388_v36, %v3083_v3  ;;  %v7957_v3 = vsel %vm1736_vm5, %v3711_v57, 2147483647  ;;  %v7974_v57 = vcvt.s32.f32 %v3166_v41 }
 0x547   :  { %v7940_v49 = vsel %vm1736_vm5, %v3712_v45, 2147483647  ;;  %v7961_v45 = vcvt.s32.f32 %v3181_v62  ;;  %v3768_v62 = vshra.s32 %v7957_v3, 16 }
 0x548   :  { %3139 = vmin.xlane.f32.xlu1 %v7922_v2  ;;  %v3086_v19 = vpop.xlane.xlu1 %3085  ;;  %8830 = vst [vmem:[#allocation38_spill] sm:$0xff] %v7940_v49  ;;  %v3783_v20 = vshra.s32 %v7940_v49, 16 }
 0x549   :  { %v3673_v58 = vpop.xlane.xlu0 %3672  ;;  %3756 = vmin.xlane.f32.xlu0 %v7935_v47  ;;  %vm3113_vm8 = vcmp.ge.f32.partialorder %v7396_v33, %v3086_v19  ;;  %4165 = vst.msk [vmem:[%s8710_s10 + $0xf8] sm:$0xff] %vm2155_vm9, %v3086_v19  ;;  %v3125_v33 = vsel %vm3112_vm6, %v7137_v26, 82  ;;  %8831 = vst [vmem:[#allocation39_spill] sm:$0xff] %v7961_v45 }
 0x54a   :  { %4206 = vst.msk [vmem:[%s8710_s10 + $0x160] sm:$0xff] %vm2155_vm9, %v3673_v58  ;;  %v3126_v36 = vsel %vm3113_vm8, %v7137_v26, 82  ;;  %vm3700_vm10 = vcmp.ge.f32.partialorder %v7402_v30, %v3673_v58  ;;  %v7983_v58 = vsel %vm1736_vm5, %v3125_v33, 2147483647  ;;  %v8000_v33 = vcvt.s32.f32 %v3768_v62 }
 0x54b   :  { %v7966_v43 = vsel %vm1736_vm5, %v3126_v36, 2147483647  ;;  %v7987_v36 = vcvt.s32.f32 %v3783_v20  ;;  %v3196_v20 = vshra.s32 %v7983_v58, 16 }
 0x54c   :  { %3741 = vmin.xlane.f32.xlu1 %v7948_v14  ;;  %v3676_v19 = vpop.xlane.xlu1 %3675  ;;  %8832 = vst [vmem:[#allocation40_spill] sm:$0xff] %v7966_v43  ;;  %v3211_v41 = vshra.s32 %v7966_v43, 16 }
 0x54d   :  { %v3089_v47 = vpop.xlane.xlu0 %3088  ;;  %3184 = vmin.xlane.f32.xlu0 %v7961_v45  ;;  %vm3701_vm11 = vcmp.ge.f32.partialorder %v7410_v11, %v3676_v19  ;;  %4207 = vst.msk [vmem:[%s8710_s10 + $0x168] sm:$0xff] %vm2155_vm9, %v3676_v19  ;;  %v3713_v11 = vsel %vm3700_vm10, %v7137_v26, 82  ;;  %8833 = vst [vmem:[#allocation41_spill] sm:$0xff] %v7987_v36 }
 0x54e   :  { %4166 = vst.msk [vmem:[%s8710_s10 + $0x100] sm:$0xff] %vm2155_vm9, %v3089_v47  ;;  %v3714_v30 = vsel %vm3701_vm11, %v7137_v26, 82  ;;  %vm3114_vm12 = vcmp.ge.f32.partialorder %v7416_v22, %v3089_v47  ;;  %v8009_v47 = vsel %vm1736_vm5, %v3713_v11, 2147483647  ;;  %v8026_v11 = vcvt.s32.f32 %v3196_v20 }
 0x54f   :  { %v7992_v49 = vsel %vm1736_vm5, %v3714_v30, 2147483647  ;;  %v8013_v30 = vcvt.s32.f32 %v3211_v41  ;;  %v3798_v41 = vshra.s32 %v8009_v47, 16 }
 0x550   :  { %3169 = vmin.xlane.f32.xlu1 %v7974_v57  ;;  %v3092_v19 = vpop.xlane.xlu1 %3091  ;;  %8834 = vst [vmem:[#allocation42_spill] sm:$0xff] %v7992_v49  ;;  %v3813_v62 = vshra.s32 %v7992_v49, 16 }
 0x551   :  { %v3679_v45 = vpop.xlane.xlu0 %3678  ;;  %3786 = vmin.xlane.f32.xlu0 %v7987_v36  ;;  %vm3115_vm13 = vcmp.ge.f32.partialorder %v7424_v39, %v3092_v19  ;;  %4167 = vst.msk [vmem:[%s8710_s10 + $0x108] sm:$0xff] %vm2155_vm9, %v3092_v19  ;;  %v3127_v39 = vsel %vm3114_vm12, %v7137_v26, 82  ;;  %8835 = vst [vmem:[#allocation43_spill] sm:$0xff] %v8013_v30 }
 0x552   :  { %4208 = vst.msk [vmem:[%s8710_s10 + $0x170] sm:$0xff] %vm2155_vm9, %v3679_v45  ;;  %v3128_v22 = vsel %vm3115_vm13, %v7137_v26, 82  ;;  %vm3702_vm14 = vcmp.ge.f32.partialorder %v7430_v16, %v3679_v45  ;;  %v8035_v45 = vsel %vm1736_vm5, %v3127_v39, 2147483647  ;;  %v8052_v39 = vcvt.s32.f32 %v3798_v41 }
 0x553   :  { %v8018_v43 = vsel %vm1736_vm5, %v3128_v22, 2147483647  ;;  %v8039_v22 = vcvt.s32.f32 %v3813_v62  ;;  %v3226_v62 = vshra.s32 %v8035_v45, 16 }
 0x554   :  { %3771 = vmin.xlane.f32.xlu1 %v8000_v33  ;;  %v3682_v19 = vpop.xlane.xlu1 %3681  ;;  %8836 = vst [vmem:[#allocation44_spill] sm:$0xff] %v8018_v43  ;;  %v3241_v20 = vshra.s32 %v8018_v43, 16 }
 0x555   :  { %v3095_v36 = vpop.xlane.xlu0 %3094  ;;  %3214 = vmin.xlane.f32.xlu0 %v8013_v30  ;;  %vm3703_vm15 = vcmp.ge.f32.partialorder %v7438_v51, %v3682_v19  ;;  %4209 = vst.msk [vmem:[%s8710_s10 + $0x178] sm:$0xff] %vm2155_vm9, %v3682_v19  ;;  %v3715_v51 = vsel %vm3702_vm14, %v7137_v26, 82  ;;  %8837 = vst [vmem:[#allocation45_spill] sm:$0xff] %v8039_v22 }
 0x556   :  { %4168 = vst.msk [vmem:[%s8710_s10 + $0x110] sm:$0xff] %vm2155_vm9, %v3095_v36  ;;  %v3716_v16 = vsel %vm3703_vm15, %v7137_v26, 82  ;;  %vm3116_vm0 = vcmp.ge.f32.partialorder %v7444_v18, %v3095_v36  ;;  %v8061_v36 = vsel %vm1736_vm5, %v3715_v51, 2147483647  ;;  %v8078_v51 = vcvt.s32.f32 %v3226_v62 }
 0x557   :  { %v8044_v49 = vsel %vm1736_vm5, %v3716_v16, 2147483647  ;;  %v8065_v16 = vcvt.s32.f32 %v3241_v20  ;;  %v3828_v20 = vshra.s32 %v8061_v36, 16 }
 0x558   :  { %3199 = vmin.xlane.f32.xlu1 %v8026_v11  ;;  %v3098_v19 = vpop.xlane.xlu1 %3097  ;;  %8838 = vst [vmem:[#allocation46_spill] sm:$0xff] %v8044_v49  ;;  %v3843_v41 = vshra.s32 %v8044_v49, 16 }
 0x559   :  { %v3685_v30 = vpop.xlane.xlu0 %3684  ;;  %3816 = vmin.xlane.f32.xlu0 %v8039_v22  ;;  %vm3117_vm1 = vcmp.ge.f32.partialorder %v7452_v48, %v3098_v19  ;;  %4169 = vst.msk [vmem:[%s8710_s10 + $0x118] sm:$0xff] %vm2155_vm9, %v3098_v19  ;;  %v3129_v48 = vsel %vm3116_vm0, %v7137_v26, 82  ;;  %8839 = vst [vmem:[#allocation47_spill] sm:$0xff] %v8065_v16 }
 0x55a   :  { %4210 = vst.msk [vmem:[%s8710_s10 + $0x180] sm:$0xff] %vm2155_vm9, %v3685_v30  ;;  %v3130_v18 = vsel %vm3117_vm1, %v7137_v26, 82  ;;  %vm3704_vm2 = vcmp.ge.f32.partialorder %v7458_v55, %v3685_v30  ;;  %v8087_v30 = vsel %vm1736_vm5, %v3129_v48, 2147483647  ;;  %v8104_v48 = vcvt.s32.f32 %v3828_v20 }
 0x55b   :  { %v8070_v43 = vsel %vm1736_vm5, %v3130_v18, 2147483647  ;;  %v8091_v18 = vcvt.s32.f32 %v3843_v41  ;;  %v3256_v41 = vshra.s32 %v8087_v30, 16 }
 0x55c   :  { %3801 = vmin.xlane.f32.xlu1 %v8052_v39  ;;  %v3688_v19 = vpop.xlane.xlu1 %3687  ;;  %8840 = vst [vmem:[#allocation48_spill] sm:$0xff] %v8070_v43  ;;  %v3271_v62 = vshra.s32 %v8070_v43, 16 }
 0x55d   :  { %v3101_v22 = vpop.xlane.xlu0 %3100  ;;  %3244 = vmin.xlane.f32.xlu0 %v8065_v16  ;;  %vm3705_vm4 = vcmp.ge.f32.partialorder %v7466_v12, %v3688_v19  ;;  %4211 = vst.msk [vmem:[%s8710_s10 + $0x188] sm:$0xff] %vm2155_vm9, %v3688_v19  ;;  %v3717_v12 = vsel %vm3704_vm2, %v7137_v26, 82  ;;  %8841 = vst [vmem:[#allocation49_spill] sm:$0xff] %v8091_v18 }
 0x55e   :  { %4170 = vst.msk [vmem:[%s8710_s10 + $0x120] sm:$0xff] %vm2155_vm9, %v3101_v22  ;;  %v3718_v55 = vsel %vm3705_vm4, %v7137_v26, 82  ;;  %vm3118_vm6 = vcmp.ge.f32.partialorder %v7472_v1, %v3101_v22  ;;  %v8113_v22 = vsel %vm1736_vm5, %v3717_v12, 2147483647  ;;  %v8130_v12 = vcvt.s32.f32 %v3256_v41 }
 0x55f   :  { %v8096_v49 = vsel %vm1736_vm5, %v3718_v55, 2147483647  ;;  %v8117_v55 = vcvt.s32.f32 %v3271_v62  ;;  %v3858_v62 = vshra.s32 %v8113_v22, 16 }
 0x560   :  { %3229 = vmin.xlane.f32.xlu1 %v8078_v51  ;;  %v3104_v19 = vpop.xlane.xlu1 %3103  ;;  %8842 = vst [vmem:[#allocation50_spill] sm:$0xff] %v8096_v49  ;;  %v3873_v20 = vshra.s32 %v8096_v49, 16  ;;  %8845 = vst [vmem:[#allocation53_spill] sm:$0xff] %v8130_v12 }
 0x561   :  { %v3691_v16 = vpop.xlane.xlu0 %3690  ;;  %3846 = vmin.xlane.f32.xlu0 %v8091_v18  ;;  %vm3119_vm8 = vcmp.ge.f32.partialorder %v7480_v27, %v3104_v19  ;;  %4171 = vst.msk [vmem:[%s8710_s10 + $0x128] sm:$0xff] %vm2155_vm9, %v3104_v19  ;;  %v3131_v27 = vsel %vm3118_vm6, %v7137_v26, 82  ;;  %8843 = vst [vmem:[#allocation51_spill] sm:$0xff] %v8117_v55  ;;  %v8151_v49 = vcvt.s32.f32 %v3858_v62 }
 0x562   :  { %4212 = vst.msk [vmem:[%s8710_s10 + $0x190] sm:$0xff] %vm2155_vm9, %v3691_v16  ;;  %v3132_v1 = vsel %vm3119_vm8, %v7137_v26, 82  ;;  %vm3706_vm10 = vcmp.ge.f32.partialorder %v7486_v34, %v3691_v16  ;;  %v8139_v16 = vsel %vm1736_vm5, %v3131_v27, 2147483647 }
 0x563   :  { %v8122_v43 = vsel %vm1736_vm5, %v3132_v1, 2147483647  ;;  %v8143_v1 = vcvt.s32.f32 %v3873_v20  ;;  %v3286_v27 = vshra.s32 %v8139_v16, 16 }
 0x564   :  { %3831 = vmin.xlane.f32.xlu1 %v8104_v48  ;;  %v3694_v19 = vpop.xlane.xlu1 %3693  ;;  %8844 = vst [vmem:[#allocation52_spill] sm:$0xff] %v8122_v43  ;;  %v3301_v41 = vshra.s32 %v8122_v43, 16 }
 0x565   :  { %v3107_v18 = vpop.xlane.xlu0 %3106  ;;  %3274 = vmin.xlane.f32.xlu0 %v8117_v55  ;;  %vm3707_vm11 = vcmp.ge.f32.partialorder %v7494_v15, %v3694_v19  ;;  %4213 = vst.msk [vmem:[%s8710_s10 + $0x198] sm:$0xf] %vm2168_vm3, %v3694_v19  ;;  %v3719_v15 = vsel %vm3706_vm10, %v7137_v26, 82  ;;  %8846 = vst [vmem:[#allocation54_spill] sm:$0xff] %v8143_v1 }
 0x566   :  { %4172 = vst.msk [vmem:[%s8710_s10 + $0x130] sm:$0xf] %vm2168_vm3, %v3107_v18  ;;  %v3720_v34 = vsel %vm3707_vm11, %v7137_v26, 82  ;;  %vm3120_vm12 = vcmp.ge.f32.partialorder %v7500_v4, %v3107_v18  ;;  %v8155_v55 = vsel %vm1736_vm5, %v3719_v15, 2147483647  ;;  %v8159_v20 = vcvt.s32.f32 %v3301_v41 }
 0x567   :  { %v8148_v19 = vsel %vm1773_vm7, %v3720_v34, 2147483647  ;;  %v8163_v18 = vcvt.s32.f32 %v3286_v27  ;;  %v3888_v62 = vshra.s32 %v8155_v55, 16  ;;  %v1961_v27 = vand.u32 65535, %v7511_v21 }
 0x568   :  { %3259 = vmin.xlane.f32.xlu1 %v8130_v12  ;;  %8847 = vst [vmem:[#allocation55_spill] sm:$0xff] %v8148_v19  ;;  %v3133_v12 = vsel %vm3120_vm12, %v7137_v26, 82  ;;  %8848 = vst [vmem:[#allocation56_spill] sm:$0xff] %v8159_v20  ;;  %v3903_v4 = vshra.s32 %v8148_v19, 16 }
 0x569   :  { %3876 = vmin.xlane.f32.xlu0 %v8143_v1  ;;  %v8167_v34 = vsel %vm1773_vm7, %v3133_v12, 2147483647  ;;  %v8173_v26 = vcvt.s32.f32 %v3888_v62  ;;  %v8852_v1 = vld [vmem:[#allocation9_spill] sm:$0xff] }
 0x56a   :  { %v8170_v15 = vcvt.s32.f32 %v3903_v4  ;;  %v3316_v41 = vshra.s32 %v8167_v34, 16  ;;  %v2548_v4 = vand.u32 65535, %v7529_v54 }
 0x56b   :  { %8850 = vst [vmem:[#allocation58_spill] sm:$0xff] %v8173_v26 }
 0x56c   :  { %3861 = vmin.xlane.f32.xlu1 %v8151_v49  ;;  %8849 = vst [vmem:[#allocation57_spill] sm:$0xff] %v8170_v15  ;;  %v8177_v19 = vcvt.s32.f32 %v3316_v41  ;;  %v2550_v43 = vcvt.s32.f32 %v2548_v4  ;;  %v2563_v41 = vand.u32 65535, %v7534_v50  ;;  %v8853_v50 = vld [vmem:[#allocation14_spill] sm:$0xff] }
 0x56d   :  { %3304 = vmin.xlane.f32.xlu0 %v8159_v20  ;;  %v1963_v20 = vcvt.s32.f32 %v1961_v27 }
 0x56e   :  { %8851 = vst [vmem:[#allocation59_spill] sm:$0xff] %v8177_v19 }
 0x570   :  { %3289 = vmin.xlane.f32.xlu1 %v8163_v18 }
 0x571   :  { %3906 = vmin.xlane.f32.xlu0 %v8170_v15 }
 0x574   :  { %3891 = vmin.xlane.f32.xlu1 %v8173_v26  ;;  %v1976_v26 = vand.u32 65535, %v7552_v52 }
 0x578   :  { %3319 = vmin.xlane.f32.xlu1 %v8177_v19  ;;  %v2565_v19 = vcvt.s32.f32 %v2563_v41 }
 0x58d   :  { %v8181_v12 = vpop.xlane.xlu1 %1965 }
 0x58e   :  { %vm1967_vm5 = vcmp.eq.f32.partialorder %v7525_v29, %v8181_v12  ;;  %v1978_v29 = vcvt.s32.f32 %v1976_v26 }
 0x58f   :  { %v1968_v62 = vsel %vm1967_vm5, %v1963_v20, inf  ;;  %v2578_v20 = vand.u32 65535, %v7571_v53  ;;  %v2006_v53 = vand.u32 65535, %v7593_v46  ;;  %v2608_v46 = vand.u32 65535, %v7618_v24 }
 0x590   :  { %1969 = vmin.xlane.f32.xlu0 %v1968_v62  ;;  %v1991_v62 = vand.u32 65535, %v7557_v8 }
 0x591   :  { %v8186_v15 = vpop.xlane.xlu0 %2552  ;;  %v2580_v41 = vcvt.s32.f32 %v2578_v20  ;;  %v8855_v20 = vld [vmem:[#allocation10_spill] sm:$0xff] }
 0x592   :  { %vm2554_vm7 = vcmp.eq.f32.partialorder %v8852_v1, %v8186_v15  ;;  %v1993_v26 = vcvt.s32.f32 %v1991_v62 }
 0x593   :  { %v2555_v21 = vsel %vm2554_vm7, %v2550_v43, inf }
 0x594   :  { %2556 = vmin.xlane.f32.xlu1 %v2555_v21  ;;  %v2008_v21 = vcvt.s32.f32 %v2006_v53 }
 0x595   :  { %v8192_v27 = vpop.xlane.xlu0 %2567  ;;  %v8194_v54 = vpop.xlane.xlu1 %1980 }
 0x596   :  { %vm2569_vm13 = vcmp.eq.f32.partialorder %v7565_v9, %v8192_v27  ;;  %vm1982_vm14 = vcmp.eq.f32.partialorder %v8853_v50, %v8194_v54 }
 0x597   :  { %v2570_v52 = vsel %vm2569_vm13, %v2565_v19, inf  ;;  %v1983_v1 = vsel %vm1982_vm14, %v1978_v29, inf  ;;  %v8854_v29 = vld [vmem:[#allocation15_spill] sm:$0xff] }
 0x598   :  { %2571 = vmin.xlane.f32.xlu1 %v2570_v52  ;;  %1984 = vmin.xlane.f32.xlu0 %v1983_v1  ;;  %v2593_v50 = vand.u32 65535, %v8854_v29 }
 0x599   :  { %v8202_v43 = vpop.xlane.xlu0 %2582  ;;  %v8204_v4 = vpop.xlane.xlu1 %1995 }
 0x59a   :  { %vm2584_vm15 = vcmp.eq.f32.partialorder %v7589_v60, %v8202_v43  ;;  %vm1997_vm0 = vcmp.eq.f32.partialorder %v7587_v7, %v8204_v4  ;;  %v2595_v52 = vcvt.s32.f32 %v2593_v50  ;;  %v2021_v7 = vand.u32 65535, %v7622_v42  ;;  %v8858_v42 = vld [vmem:[#allocation13_spill] sm:$0xff] }
 0x59b   :  { %v2585_v8 = vsel %vm2584_vm15, %v2580_v41, inf  ;;  %v1998_v9 = vsel %vm1997_vm0, %v1993_v26, inf  ;;  %v2610_v41 = vcvt.s32.f32 %v2608_v46  ;;  %v8856_v26 = vld [vmem:[#allocation17_spill] sm:$0xff]  ;;  %v2638_v50 = vand.u32 65535, %v8858_v42 }
 0x59c   :  { %2586 = vmin.xlane.f32.xlu1 %v2585_v8  ;;  %1999 = vmin.xlane.f32.xlu0 %v1998_v9  ;;  %v2023_v9 = vcvt.s32.f32 %v2021_v7 }
 0x59d   :  { %v8211_v19 = vpop.xlane.xlu1 %2010  ;;  %v2640_v7 = vcvt.s32.f32 %v2638_v50 }
 0x59e   :  { %vm2012_vm1 = vcmp.eq.f32.partialorder %v8855_v20, %v8211_v19 }
 0x59f   :  { %v2013_v62 = vsel %vm2012_vm1, %v2008_v21, inf  ;;  %v8857_v21 = vld [vmem:[#allocation16_spill] sm:$0xff] }
 0x5a0   :  { %2014 = vmin.xlane.f32.xlu0 %v2013_v62  ;;  %v2036_v29 = vand.u32 65535, %v8857_v21  ;;  %v2623_v62 = vand.u32 65535, %v7661_v44  ;;  %v8861_v21 = vld [vmem:[#allocation18_spill] sm:$0xff]  ;;  %v2668_v44 = vand.u32 65535, %v7709_v0 }
 0x5a1   :  { %v8217_v60 = vpop.xlane.xlu1 %2597  ;;  %v8220_v1 = vpop.xlane.xlu0 %2612 }
 0x5a2   :  { %vm2599_vm2 = vcmp.eq.f32.partialorder %v7629_v25, %v8217_v60  ;;  %vm2614_vm4 = vcmp.eq.f32.partialorder %v8856_v26, %v8220_v1  ;;  %v2038_v46 = vcvt.s32.f32 %v2036_v29  ;;  %v8860_v26 = vld [vmem:[#allocation12_spill] sm:$0xff]  ;;  %v2051_v29 = vand.u32 65535, %v8861_v21 }
 0x5a3   :  { %v2600_v53 = vsel %vm2599_vm2, %v2595_v52, inf  ;;  %v2615_v8 = vsel %vm2614_vm4, %v2610_v41, inf  ;;  %v8859_v41 = vld [vmem:[#allocation11_spill] sm:$0xff] }
 0x5a4   :  { %2601 = vmin.xlane.f32.xlu0 %v2600_v53  ;;  %2616 = vmin.xlane.f32.xlu1 %v2615_v8 }
 0x5a5   :  { %v8226_v24 = vpop.xlane.xlu1 %2025 }
 0x5a6   :  { %vm2027_vm6 = vcmp.eq.f32.partialorder %v7651_v13, %v8226_v24 }
 0x5a7   :  { %v2028_v20 = vsel %vm2027_vm6, %v2023_v9, inf  ;;  %v2625_v9 = vcvt.s32.f32 %v2623_v62  ;;  %v2670_v62 = vcvt.s32.f32 %v2668_v44  ;;  %v8867_v44 = vld [vmem:[#allocation23_spill] sm:$0xff] }
 0x5a8   :  { %2029 = vmin.xlane.f32.xlu0 %v2028_v20  ;;  %v2053_v20 = vcvt.s32.f32 %v2051_v29  ;;  %v8866_v29 = vld [vmem:[#allocation22_spill] sm:$0xff] }
 0x5a9   :  { %v8232_v25 = vpop.xlane.xlu1 %2040  ;;  %v8235_v52 = vpop.xlane.xlu0 %2642 }
 0x5aa   :  { %vm2042_vm8 = vcmp.eq.f32.partialorder %v8859_v41, %v8232_v25  ;;  %vm2644_vm10 = vcmp.eq.f32.partialorder %v8860_v26, %v8235_v52  ;;  %v8863_v41 = vld [vmem:[#allocation19_spill] sm:$0xff]  ;;  %v8864_v26 = vld [vmem:[#allocation20_spill] sm:$0xff] }
 0x5ab   :  { %v2043_v53 = vsel %vm2042_vm8, %v2038_v46, inf  ;;  %v2645_v13 = vsel %vm2644_vm10, %v2640_v7, inf  ;;  %v2066_v46 = vand.u32 65535, %v8863_v41 }
 0x5ac   :  { %2044 = vmin.xlane.f32.xlu0 %v2043_v53  ;;  %2646 = vmin.xlane.f32.xlu1 %v2645_v13 }
 0x5ad   :  { %v8241_v8 = vpop.xlane.xlu1 %2627  ;;  %v2068_v13 = vcvt.s32.f32 %v2066_v46 }
 0x5ae   :  { %vm2629_vm11 = vcmp.eq.f32.partialorder %v7695_v17, %v8241_v8 }
 0x5af   :  { %v2630_v42 = vsel %vm2629_vm11, %v2625_v9, inf  ;;  %v8865_v9 = vld [vmem:[#allocation21_spill] sm:$0xff] }
 0x5b0   :  { %2631 = vmin.xlane.f32.xlu0 %v2630_v42  ;;  %v2653_v21 = vand.u32 65535, %v8865_v9 }
 0x5b1   :  { %v8247_v50 = vpop.xlane.xlu1 %2055  ;;  %v8250_v7 = vpop.xlane.xlu0 %2672 }
 0x5b2   :  { %8862 = vst [vmem:[#allocation9_spill] sm:$0xff] %v8247_v50  ;;  %vm2057_vm12 = vcmp.eq.f32.partialorder %v7717_v35, %v8247_v50  ;;  %vm2674_vm5 = vcmp.eq.f32.partialorder %v8864_v26, %v8250_v7  ;;  %v2655_v35 = vcvt.s32.f32 %v2653_v21  ;;  %v2081_v50 = vand.u32 65535, %v8867_v44 }
 0x5b3   :  { %v2058_v53 = vsel %vm2057_vm12, %v2053_v20, inf  ;;  %v2675_v17 = vsel %vm2674_vm5, %v2670_v62, inf }
 0x5b4   :  { %2059 = vmin.xlane.f32.xlu0 %v2058_v53  ;;  %2676 = vmin.xlane.f32.xlu1 %v2675_v17  ;;  %v2083_v62 = vcvt.s32.f32 %v2081_v50  ;;  %v2096_v53 = vand.u32 65535, %v7772_v5 }
 0x5b5   :  { %v8256_v0 = vpop.xlane.xlu1 %2070 }
 0x5b6   :  { %vm2072_vm7 = vcmp.eq.f32.partialorder %v8866_v29, %v8256_v0  ;;  %v2098_v21 = vcvt.s32.f32 %v2096_v53  ;;  %v2683_v29 = vand.u32 65535, %v7799_v59  ;;  %v2713_v53 = vand.u32 65535, %v7853_v38 }
 0x5b7   :  { %v2073_v42 = vsel %vm2072_vm7, %v2068_v13, inf }
 0x5b8   :  { %2074 = vmin.xlane.f32.xlu0 %v2073_v42  ;;  %v2685_v42 = vcvt.s32.f32 %v2683_v29  ;;  %v2715_v29 = vcvt.s32.f32 %v2713_v53  ;;  %v8871_v53 = vld [vmem:[#allocation27_spill] sm:$0xff] }
 0x5b9   :  { %v8261_v41 = vpop.xlane.xlu1 %2657  ;;  %v8264_v26 = vpop.xlane.xlu0 %2702 }
 0x5ba   :  { %vm2659_vm13 = vcmp.eq.f32.partialorder %v7761_v10, %v8261_v41  ;;  %vm2704_vm2 = vcmp.eq.f32.partialorder %v7769_v56, %v8264_v26 }
 0x5bb   :  { %v2660_v20 = vsel %vm2659_vm13, %v2655_v35, inf  ;;  %v2111_v35 = vand.u32 65535, %v7827_v40 }
 0x5bc   :  { %2661 = vmin.xlane.f32.xlu0 %v2660_v20 }
 0x5bd   :  { %v8268_v46 = vpop.xlane.xlu1 %2085  ;;  %v8271_v17 = vpop.xlane.xlu0 %2130  ;;  %v2113_v20 = vcvt.s32.f32 %v2111_v35  ;;  %v3135_v35 = vand.u32 65535, %v7879_v31  ;;  %v3737_v31 = vand.u32 65535, %v7905_v28  ;;  %v3165_v28 = vand.u32 65535, %v7931_v23 }
 0x5be   :  { %vm2087_vm14 = vcmp.eq.f32.partialorder %v7787_v32, %v8268_v46  ;;  %v3767_v23 = vand.u32 65535, %v7957_v3  ;;  %v3195_v3 = vand.u32 65535, %v7983_v58  ;;  %v3797_v58 = vand.u32 65535, %v8009_v47 }
 0x5bf   :  { %v2088_v13 = vsel %vm2087_vm14, %v2083_v62, inf  ;;  %v3225_v47 = vand.u32 65535, %v8035_v45 }
 0x5c0   :  { %2089 = vmin.xlane.f32.xlu0 %v2088_v13 }
 0x5c1   :  { %v8275_v9 = vpop.xlane.xlu1 %2100 }
 0x5c2   :  { %vm2102_vm15 = vcmp.eq.f32.partialorder %v7817_v6, %v8275_v9  ;;  %v8280_v10 = vpop.xlane.xlu0 %2145  ;;  %v8868_v6 = vld [vmem:[#allocation24_spill] sm:$0xff] }
 0x5c3   :  { %v2103_v50 = vsel %vm2102_vm15, %v2098_v21, inf  ;;  %v2698_v62 = vand.u32 65535, %v8868_v6 }
 0x5c4   :  { %2104 = vmin.xlane.f32.xlu0 %v2103_v50  ;;  %v8869_v50 = vld [vmem:[#allocation25_spill] sm:$0xff] }
 0x5c5   :  { %v8282_v5 = vpop.xlane.xlu1 %2687  ;;  %v2700_v21 = vcvt.s32.f32 %v2698_v62  ;;  %v3137_v62 = vcvt.s32.f32 %v3135_v35  ;;  %v3739_v35 = vcvt.s32.f32 %v3737_v31  ;;  %v3167_v31 = vcvt.s32.f32 %v3165_v28 }
 0x5c6   :  { %vm2689_vm0 = vcmp.eq.f32.partialorder %v7844_v63, %v8282_v5  ;;  %v8287_v32 = vpop.xlane.xlu0 %2732  ;;  %v3769_v28 = vcvt.s32.f32 %v3767_v23  ;;  %v3197_v23 = vcvt.s32.f32 %v3195_v3  ;;  %v3799_v3 = vcvt.s32.f32 %v3797_v58 }
 0x5c7   :  { %v2690_v44 = vsel %vm2689_vm0, %v2685_v42, inf  ;;  %v2126_v42 = vand.u32 65535, %v8869_v50  ;;  %v8872_v50 = vld [vmem:[#allocation29_spill] sm:$0xff] }
 0x5c8   :  { %2691 = vmin.xlane.f32.xlu0 %v2690_v44  ;;  %vm2147_vm10 = vcmp.eq.f32.partialorder %v8872_v50, %v8280_v10 }
 0x5c9   :  { %v8289_v59 = vpop.xlane.xlu1 %2115  ;;  %v2128_v6 = vcvt.s32.f32 %v2126_v42 }
 0x5ca   :  { %vm2117_vm1 = vcmp.eq.f32.partialorder %v7870_v37, %v8289_v59  ;;  %v8295_v13 = vpop.xlane.xlu0 %3726  ;;  %v2705_v37 = vsel %vm2704_vm2, %v2700_v21, inf }
 0x5cb   :  { %v2118_v40 = vsel %vm2117_vm1, %v2113_v20, inf  ;;  %v8870_v20 = vld [vmem:[#allocation26_spill] sm:$0xff] }
 0x5cc   :  { %2119 = vmin.xlane.f32.xlu1 %v2118_v40  ;;  %vm2132_vm6 = vcmp.eq.f32.partialorder %v8870_v20, %v8271_v17  ;;  %v2141_v40 = vand.u32 65535, %v8871_v53  ;;  %v8874_v53 = vld [vmem:[#allocation31_spill] sm:$0xff] }
 0x5cd   :  { %v8299_v63 = vpop.xlane.xlu1 %2717  ;;  %v2133_v21 = vsel %vm2132_vm6, %v2128_v6, inf  ;;  %vm2734_vm12 = vcmp.eq.f32.partialorder %v8874_v53, %v8287_v32 }
 0x5ce   :  { %vm2719_vm4 = vcmp.eq.f32.partialorder %v7896_v61, %v8299_v63  ;;  %v8305_v38 = vpop.xlane.xlu0 %3154  ;;  %v2143_v42 = vcvt.s32.f32 %v2141_v40 }
 0x5cf   :  { %v2720_v44 = vsel %vm2719_vm4, %v2715_v29, inf }
 0x5d0   :  { %2706 = vmin.xlane.f32.xlu1 %v2705_v37  ;;  %2721 = vmin.xlane.f32.xlu0 %v2720_v44  ;;  %v8873_v44 = vld [vmem:[#allocation28_spill] sm:$0xff]  ;;  %v2148_v6 = vsel %vm2147_vm10, %v2143_v42, inf }
 0x5d1   :  { %v8309_v56 = vpop.xlane.xlu1 %3139  ;;  %v2728_v20 = vand.u32 65535, %v8873_v44  ;;  %v8876_v44 = vld [vmem:[#allocation33_spill] sm:$0xff] }
 0x5d2   :  { %vm3141_vm8 = vcmp.eq.f32.partialorder %v7922_v2, %v8309_v56  ;;  %v8315_v61 = vpop.xlane.xlu0 %3756  ;;  %vm3728_vm7 = vcmp.eq.f32.partialorder %v8876_v44, %v8295_v13 }
 0x5d3   :  { %v3142_v29 = vsel %vm3141_vm8, %v3137_v62, inf  ;;  %v2730_v40 = vcvt.s32.f32 %v2728_v20 }
 0x5d4   :  { %2134 = vmin.xlane.f32.xlu1 %v2133_v21  ;;  %3143 = vmin.xlane.f32.xlu0 %v3142_v29  ;;  %v8875_v29 = vld [vmem:[#allocation30_spill] sm:$0xff] }
 0x5d5   :  { %v8319_v37 = vpop.xlane.xlu1 %3741  ;;  %v3722_v50 = vand.u32 65535, %v8875_v29  ;;  %v2735_v42 = vsel %vm2734_vm12, %v2730_v40, inf  ;;  %v8878_v29 = vld [vmem:[#allocation35_spill] sm:$0xff] }
 0x5d6   :  { %vm3743_vm11 = vcmp.eq.f32.partialorder %v7948_v14, %v8319_v37  ;;  %v8325_v2 = vpop.xlane.xlu0 %3184  ;;  %vm3156_vm14 = vcmp.eq.f32.partialorder %v8878_v29, %v8305_v38 }
 0x5d7   :  { %v3744_v62 = vsel %vm3743_vm11, %v3739_v35, inf  ;;  %v3724_v20 = vcvt.s32.f32 %v3722_v50 }
 0x5d8   :  { %2149 = vmin.xlane.f32.xlu1 %v2148_v6  ;;  %3745 = vmin.xlane.f32.xlu0 %v3744_v62  ;;  %v8877_v62 = vld [vmem:[#allocation32_spill] sm:$0xff] }
 0x5d9   :  { %v8329_v21 = vpop.xlane.xlu1 %3169  ;;  %v3150_v53 = vand.u32 65535, %v8877_v62  ;;  %v3729_v40 = vsel %vm3728_vm7, %v3724_v20, inf  ;;  %v8880_v20 = vld [vmem:[#allocation37_spill] sm:$0xff] }
 0x5da   :  { %vm3171_vm5 = vcmp.eq.f32.partialorder %v7974_v57, %v8329_v21  ;;  %v8335_v14 = vpop.xlane.xlu0 %3786  ;;  %vm3758_vm0 = vcmp.eq.f32.partialorder %v8880_v20, %v8315_v61  ;;  %v3827_v20 = vand.u32 65535, %v8061_v36  ;;  %v3255_v36 = vand.u32 65535, %v8087_v30 }
 0x5db   :  { %v3172_v35 = vsel %vm3171_vm5, %v3167_v31, inf  ;;  %v3152_v50 = vcvt.s32.f32 %v3150_v53  ;;  %v3857_v30 = vand.u32 65535, %v8113_v22 }
 0x5dc   :  { %2736 = vmin.xlane.f32.xlu1 %v2735_v42  ;;  %3173 = vmin.xlane.f32.xlu0 %v3172_v35  ;;  %v8879_v35 = vld [vmem:[#allocation34_spill] sm:$0xff] }
 0x5dd   :  { %v8339_v6 = vpop.xlane.xlu1 %3771  ;;  %v3752_v44 = vand.u32 65535, %v8879_v35 }
 0x5de   :  { %vm3773_vm13 = vcmp.eq.f32.partialorder %v8000_v33, %v8339_v6  ;;  %v8345_v57 = vpop.xlane.xlu0 %3214  ;;  %v3157_v33 = vsel %vm3156_vm14, %v3152_v50, inf }
 0x5df   :  { %v3774_v31 = vsel %vm3773_vm13, %v3769_v28, inf  ;;  %v3754_v53 = vcvt.s32.f32 %v3752_v44  ;;  %v8883_v44 = vld [vmem:[#allocation38_spill] sm:$0xff] }
 0x5e0   :  { %3730 = vmin.xlane.f32.xlu1 %v3729_v40  ;;  %3775 = vmin.xlane.f32.xlu0 %v3774_v31  ;;  %v8881_v31 = vld [vmem:[#allocation36_spill] sm:$0xff]  ;;  %v3782_v58 = vand.u32 65535, %v8883_v44 }
 0x5e1   :  { %v8349_v42 = vpop.xlane.xlu1 %3199  ;;  %v3180_v29 = vand.u32 65535, %v8881_v31 }
 0x5e2   :  { %vm3201_vm15 = vcmp.eq.f32.partialorder %v8026_v11, %v8349_v42  ;;  %v8357_v28 = vpop.xlane.xlu0 %3816  ;;  %v3759_v11 = vsel %vm3758_vm0, %v3754_v53, inf }
 0x5e3   :  { %v3202_v62 = vsel %vm3201_vm15, %v3197_v23, inf  ;;  %v8882_v23 = vld [vmem:[#allocation39_spill] sm:$0xff] }
 0x5e4   :  { %3158 = vmin.xlane.f32.xlu1 %v3157_v33  ;;  %3203 = vmin.xlane.f32.xlu0 %v3202_v62  ;;  %vm3186_vm2 = vcmp.eq.f32.partialorder %v8882_v23, %v8325_v2  ;;  %v3182_v33 = vcvt.s32.f32 %v3180_v29  ;;  %v3227_v62 = vcvt.s32.f32 %v3225_v47  ;;  %v3784_v29 = vcvt.s32.f32 %v3782_v58 }
 0x5e5   :  { %v8359_v40 = vpop.xlane.xlu1 %3801  ;;  %v3829_v47 = vcvt.s32.f32 %v3827_v20  ;;  %v3257_v20 = vcvt.s32.f32 %v3255_v36 }
 0x5e6   :  { %vm3803_vm1 = vcmp.eq.f32.partialorder %v8052_v39, %v8359_v40  ;;  %v8373_v45 = vpop.xlane.xlu0 %3244  ;;  %v3187_v39 = vsel %vm3186_vm2, %v3182_v33, inf  ;;  %v8886_v33 = vld [vmem:[#allocation43_spill] sm:$0xff] }
 0x5e7   :  { %v3804_v50 = vsel %vm3803_vm1, %v3799_v3, inf  ;;  %v8884_v3 = vld [vmem:[#allocation41_spill] sm:$0xff]  ;;  %vm3216_vm10 = vcmp.eq.f32.partialorder %v8886_v33, %v8345_v57  ;;  %v3285_v33 = vand.u32 65535, %v8139_v16 }
 0x5e8   :  { %3760 = vmin.xlane.f32.xlu1 %v3759_v11  ;;  %3805 = vmin.xlane.f32.xlu0 %v3804_v50  ;;  %vm3788_vm6 = vcmp.eq.f32.partialorder %v8884_v3, %v8335_v14  ;;  %v8885_v11 = vld [vmem:[#allocation40_spill] sm:$0xff]  ;;  %v8888_v3 = vld [vmem:[#allocation53_spill] sm:$0xff] }
 0x5e9   :  { %v8367_v35 = vpop.xlane.xlu1 %3229  ;;  %v3210_v50 = vand.u32 65535, %v8885_v11 }
 0x5ea   :  { %vm3231_vm4 = vcmp.eq.f32.partialorder %v8078_v51, %v8367_v35  ;;  %v3789_v51 = vsel %vm3788_vm6, %v3784_v29, inf }
 0x5eb   :  { %v3232_v53 = vsel %vm3231_vm4, %v3227_v62, inf  ;;  %v8385_v62 = vpop.xlane.xlu0 %3846  ;;  %v3212_v58 = vcvt.s32.f32 %v3210_v50  ;;  %v8890_v50 = vld [vmem:[#allocation44_spill] sm:$0xff] }
 0x5ec   :  { %3188 = vmin.xlane.f32.xlu1 %v3187_v39  ;;  %3233 = vmin.xlane.f32.xlu0 %v3232_v53  ;;  %v8887_v39 = vld [vmem:[#allocation42_spill] sm:$0xff]  ;;  %v3240_v36 = vand.u32 65535, %v8890_v50 }
 0x5ed   :  { %v8377_v31 = vpop.xlane.xlu1 %3831  ;;  %v3812_v53 = vand.u32 65535, %v8887_v39  ;;  %v8892_v39 = vld [vmem:[#allocation47_spill] sm:$0xff] }
 0x5ee   :  { %vm3833_vm8 = vcmp.eq.f32.partialorder %v8104_v48, %v8377_v31  ;;  %v3217_v48 = vsel %vm3216_vm10, %v3212_v58, inf  ;;  %vm3246_vm7 = vcmp.eq.f32.partialorder %v8892_v39, %v8373_v45  ;;  %v8897_v39 = vld [vmem:[#allocation51_spill] sm:$0xff] }
 0x5ef   :  { %v3834_v23 = vsel %vm3833_vm8, %v3829_v47, inf  ;;  %v8889_v47 = vld [vmem:[#allocation45_spill] sm:$0xff]  ;;  %v8401_v22 = vpop.xlane.xlu0 %3274 }
 0x5f0   :  { %3790 = vmin.xlane.f32.xlu1 %v3789_v51  ;;  %3835 = vmin.xlane.f32.xlu0 %v3834_v23  ;;  %vm3818_vm12 = vcmp.eq.f32.partialorder %v8889_v47, %v8357_v28  ;;  %v3814_v51 = vcvt.s32.f32 %v3812_v53  ;;  %v3859_v23 = vcvt.s32.f32 %v3857_v30  ;;  %8891 = vst [vmem:[#allocation14_spill] sm:$0xff] %v8401_v22  ;;  %v3242_v53 = vcvt.s32.f32 %v3240_v36  ;;  %v8894_v47 = vld [vmem:[#allocation49_spill] sm:$0xff] }
 0x5f1   :  { %v8387_v44 = vpop.xlane.xlu1 %3259  ;;  %v3287_v30 = vcvt.s32.f32 %v3285_v33  ;;  %vm3848_vm14 = vcmp.eq.f32.partialorder %v8894_v47, %v8385_v62  ;;  %v3315_v33 = vand.u32 65535, %v8167_v34  ;;  %vm3276_vm15 = vcmp.eq.f32.partialorder %v8897_v39, %v8401_v22  ;;  %v8900_v47 = vld [vmem:[#allocation59_spill] sm:$0xff]  ;;  %v8903_v39 = vld [vmem:[#allocation52_spill] sm:$0xff] }
 0x5f2   :  { %vm3261_vm11 = vcmp.eq.f32.partialorder %v8888_v3, %v8387_v44  ;;  %v3819_v58 = vsel %vm3818_vm12, %v3814_v51, inf  ;;  %v3247_v16 = vsel %vm3246_vm7, %v3242_v53, inf }
 0x5f3   :  { %v3262_v29 = vsel %vm3261_vm11, %v3257_v20, inf  ;;  %v8412_v51 = vpop.xlane.xlu0 %3876 }
 0x5f4   :  { %3218 = vmin.xlane.f32.xlu1 %v3217_v48  ;;  %3263 = vmin.xlane.f32.xlu0 %v3262_v29  ;;  %v8893_v48 = vld [vmem:[#allocation46_spill] sm:$0xff]  ;;  %8895 = vst [vmem:[#allocation15_spill] sm:$0xff] %v8412_v51 }
 0x5f5   :  { %v8395_v11 = vpop.xlane.xlu1 %3861  ;;  %v3842_v29 = vand.u32 65535, %v8893_v48  ;;  %v8899_v48 = vld [vmem:[#allocation50_spill] sm:$0xff] }
 0x5f6   :  { %vm3863_vm5 = vcmp.eq.f32.partialorder %v8151_v49, %v8395_v11 }
 0x5f7   :  { %v3864_v20 = vsel %vm3863_vm5, %v3859_v23, inf  ;;  %v3844_v50 = vcvt.s32.f32 %v3842_v29  ;;  %v8426_v29 = vpop.xlane.xlu0 %3304 }
 0x5f8   :  { %3820 = vmin.xlane.f32.xlu1 %v3819_v58  ;;  %3865 = vmin.xlane.f32.xlu0 %v3864_v20  ;;  %v8896_v58 = vld [vmem:[#allocation48_spill] sm:$0xff] }
 0x5f9   :  { %v8405_v3 = vpop.xlane.xlu1 %3289  ;;  %v3270_v36 = vand.u32 65535, %v8896_v58  ;;  %v3849_v20 = vsel %vm3848_vm14, %v3844_v50, inf  ;;  %v8901_v50 = vld [vmem:[#allocation54_spill] sm:$0xff] }
 0x5fa   :  { %vm3291_vm13 = vcmp.eq.f32.partialorder %v8163_v18, %v8405_v3  ;;  %vm3878_vm1 = vcmp.eq.f32.partialorder %v8901_v50, %v8412_v51  ;;  %v8905_v50 = vld [vmem:[#allocation55_spill] sm:$0xff] }
 0x5fb   :  { %v3292_v49 = vsel %vm3291_vm13, %v3287_v30, inf  ;;  %v3272_v53 = vcvt.s32.f32 %v3270_v36  ;;  %v3317_v30 = vcvt.s32.f32 %v3315_v33  ;;  %v3902_v51 = vand.u32 65535, %v8905_v50 }
 0x5fc   :  { %3248 = vmin.xlane.f32.xlu1 %v3247_v16  ;;  %3293 = vmin.xlane.f32.xlu0 %v3292_v49  ;;  %v3872_v16 = vand.u32 65535, %v8899_v48  ;;  %v3887_v49 = vand.u32 65535, %v8155_v55  ;;  %v3300_v48 = vand.u32 65535, %v8903_v39  ;;  %v2589_v50 = vcvt.f32.s32 %v8202_v43 }
 0x5fd   :  { %v8414_v23 = vpop.xlane.xlu1 %3891  ;;  %v3277_v58 = vsel %vm3276_vm15, %v3272_v53, inf  ;;  %v8435_v53 = vpop.xlane.xlu0 %3906  ;;  %v2017_v43 = vcvt.f32.s32 %v8211_v19 }
 0x5fe   :  { %v3874_v36 = vcvt.s32.f32 %v3872_v16  ;;  %v3889_v33 = vcvt.s32.f32 %v3887_v49  ;;  %v3904_v16 = vcvt.s32.f32 %v3902_v51 }
 0x600   :  { %3850 = vmin.xlane.f32.xlu1 %v3849_v20  ;;  %v8902_v20 = vld [vmem:[#allocation58_spill] sm:$0xff]  ;;  %v3879_v55 = vsel %vm3878_vm1, %v3874_v36, inf }
 0x601   :  { %v8420_v18 = vpop.xlane.xlu1 %3319  ;;  %vm3893_vm2 = vcmp.eq.f32.partialorder %v8902_v20, %v8414_v23 }
 0x602   :  { %8898 = vst [vmem:[#allocation10_spill] sm:$0xff] %v8420_v18  ;;  %vm3321_vm0 = vcmp.eq.f32.partialorder %v8900_v47, %v8420_v18  ;;  %v3894_v22 = vsel %vm3893_vm2, %v3889_v33, inf  ;;  %v8904_v47 = vld [vmem:[#allocation56_spill] sm:$0xff]  ;;  %v2559_v33 = vcvt.f32.s32 %v8186_v15 }
 0x603   :  { %v3322_v34 = vsel %vm3321_vm0, %v3317_v30, inf  ;;  %vm3306_vm4 = vcmp.eq.f32.partialorder %v8904_v47, %v8426_v29  ;;  %v3302_v30 = vcvt.s32.f32 %v3300_v48  ;;  %v2574_v48 = vcvt.f32.s32 %v8192_v27 }
 0x604   :  { %3278 = vmin.xlane.f32.xlu1 %v3277_v58  ;;  %3323 = vmin.xlane.f32.xlu0 %v3322_v34  ;;  %v8906_v58 = vld [vmem:[#allocation57_spill] sm:$0xff]  ;;  %v1972_v34 = vcvt.f32.s32 %v8181_v12  ;;  %v2560_v47 = vshll.u32 %v2559_v33, 16 }
 0x605   :  { %v3307_v18 = vsel %vm3306_vm4, %v3302_v30, inf  ;;  %vm3908_vm6 = vcmp.eq.f32.partialorder %v8906_v58, %v8435_v53  ;;  %v1987_v30 = vcvt.f32.s32 %v8194_v54  ;;  %v2575_v12 = vshll.u32 %v2574_v48, 16 }
 0x606   :  { %v3909_v49 = vsel %vm3908_vm6, %v3904_v16, inf  ;;  %v1973_v36 = vshll.u32 %v1972_v34, 16 }
 0x607   :  { %v1988_v16 = vshll.u32 %v1987_v30, 16 }
 0x608   :  { %3880 = vmin.xlane.f32.xlu1 %v3879_v55  ;;  %3895 = vmin.xlane.f32.xlu0 %v3894_v22 }
 0x60c   :  { %3308 = vmin.xlane.f32.xlu1 %v3307_v18 }
 0x610   :  { %3910 = vmin.xlane.f32.xlu1 %v3909_v49  ;;  %v2002_v49 = vcvt.f32.s32 %v8204_v4 }
 0x619   :  { %v1970_v20 = vpop.xlane.xlu0 %1969 }
 0x61a   :  { %v1971_v22 = vcvt.f32.s32 %v1970_v20 }
 0x61c   :  { %v1974_v39 = vadd.s32 %v1973_v36, %v1971_v22  ;;  %v2590_v36 = vshll.u32 %v2589_v50, 16 }
 0x61d   :  { %v2557_v55 = vpop.xlane.xlu1 %2556 }
 0x61e   :  { %2170 = vst.msk [vmem:[%s8711_s11] sm:$0xff] %vm2155_vm9, %v1974_v39  ;;  %v2558_v51 = vcvt.f32.s32 %v2557_v55  ;;  %v2003_v39 = vshll.u32 %v2002_v49, 16 }
 0x620   :  { %v2561_v18 = vadd.s32 %v2560_v47, %v2558_v51  ;;  %v2018_v51 = vshll.u32 %v2017_v43, 16 }
 0x621   :  { %v1985_v58 = vpop.xlane.xlu0 %1984  ;;  %v2572_v15 = vpop.xlane.xlu1 %2571 }
 0x622   :  { %4132 = vst.msk [vmem:[%s8711_s11 + $0x68] sm:$0xff] %vm2155_vm9, %v2561_v18  ;;  %v1986_v27 = vcvt.f32.s32 %v1985_v58  ;;  %v2573_v54 = vcvt.f32.s32 %v2572_v15  ;;  %v2604_v18 = vcvt.f32.s32 %v8217_v60 }
 0x624   :  { %v1989_v34 = vadd.s32 %v1988_v16, %v1986_v27  ;;  %v2576_v20 = vadd.s32 %v2575_v12, %v2573_v54  ;;  %v2619_v12 = vcvt.f32.s32 %v8220_v1  ;;  %v2605_v15 = vshll.u32 %v2604_v18, 16 }
 0x625   :  { %v2000_v33 = vpop.xlane.xlu0 %1999  ;;  %v2587_v22 = vpop.xlane.xlu1 %2586  ;;  %v2032_v16 = vcvt.f32.s32 %v8226_v24  ;;  %v2047_v1 = vcvt.f32.s32 %v8232_v25 }
 0x626   :  { %2171 = vst.msk [vmem:[%s8711_s11 + $0x8] sm:$0xff] %vm2155_vm9, %v1989_v34  ;;  %4133 = vst.msk [vmem:[%s8711_s11 + $0x70] sm:$0xff] %vm2155_vm9, %v2576_v20  ;;  %v2001_v4 = vcvt.f32.s32 %v2000_v33  ;;  %v2588_v48 = vcvt.f32.s32 %v2587_v22  ;;  %v2620_v27 = vshll.u32 %v2619_v12, 16  ;;  %v2649_v22 = vcvt.f32.s32 %v8235_v52  ;;  %v8907_v12 = vld [vmem:[#allocation9_spill] sm:$0xff] }
 0x627   :  { %v2033_v33 = vshll.u32 %v2032_v16, 16 }
 0x628   :  { %v2004_v55 = vadd.s32 %v2003_v39, %v2001_v4  ;;  %v2591_v47 = vadd.s32 %v2590_v36, %v2588_v48  ;;  %v2048_v4 = vshll.u32 %v2047_v1, 16  ;;  %v2634_v48 = vcvt.f32.s32 %v8241_v8 }
 0x629   :  { %v2015_v30 = vpop.xlane.xlu0 %2014 }
 0x62a   :  { %2172 = vst.msk [vmem:[%s8711_s11 + $0x10] sm:$0xff] %vm2155_vm9, %v2004_v55  ;;  %4134 = vst.msk [vmem:[%s8711_s11 + $0x78] sm:$0xff] %vm2155_vm9, %v2591_v47  ;;  %v2016_v19 = vcvt.f32.s32 %v2015_v30  ;;  %v2650_v47 = vshll.u32 %v2649_v22, 16 }
 0x62c   :  { %v2019_v50 = vadd.s32 %v2018_v51, %v2016_v19  ;;  %v2635_v19 = vshll.u32 %v2634_v48, 16 }
 0x62d   :  { %v2602_v58 = vpop.xlane.xlu0 %2601  ;;  %v2617_v49 = vpop.xlane.xlu1 %2616 }
 0x62e   :  { %2173 = vst.msk [vmem:[%s8711_s11 + $0x18] sm:$0xff] %vm2155_vm9, %v2019_v50  ;;  %v2603_v60 = vcvt.f32.s32 %v2602_v58  ;;  %v2618_v54 = vcvt.f32.s32 %v2617_v49  ;;  %v2062_v50 = vcvt.f32.s32 %v8907_v12  ;;  %v2679_v58 = vcvt.f32.s32 %v8250_v7 }
 0x62f   :  { %v2077_v49 = vcvt.f32.s32 %v8256_v0 }
 0x630   :  { %v2606_v34 = vadd.s32 %v2605_v15, %v2603_v60  ;;  %v2621_v20 = vadd.s32 %v2620_v27, %v2618_v54  ;;  %v2063_v60 = vshll.u32 %v2062_v50, 16 }
 0x631   :  { %v2030_v36 = vpop.xlane.xlu0 %2029  ;;  %v2078_v1 = vshll.u32 %v2077_v49, 16  ;;  %v2724_v49 = vcvt.f32.s32 %v8299_v63 }
 0x632   :  { %4135 = vst.msk [vmem:[%s8711_s11 + $0x80] sm:$0xff] %vm2155_vm9, %v2606_v34  ;;  %v2031_v24 = vcvt.f32.s32 %v2030_v36  ;;  %4136 = vst.msk [vmem:[%s8711_s11 + $0x88] sm:$0xff] %vm2155_vm9, %v2621_v20  ;;  %v2680_v34 = vshll.u32 %v2679_v58, 16 }
 0x634   :  { %v2034_v39 = vadd.s32 %v2033_v33, %v2031_v24  ;;  %v2664_v24 = vcvt.f32.s32 %v8261_v41 }
 0x635   :  { %v2045_v43 = vpop.xlane.xlu0 %2044  ;;  %v2647_v55 = vpop.xlane.xlu1 %2646 }
 0x636   :  { %2174 = vst.msk [vmem:[%s8711_s11 + $0x20] sm:$0xff] %vm2155_vm9, %v2034_v39  ;;  %v2046_v25 = vcvt.f32.s32 %v2045_v43  ;;  %v2648_v30 = vcvt.f32.s32 %v2647_v55  ;;  %v2665_v43 = vshll.u32 %v2664_v24, 16 }
 0x638   :  { %v2049_v52 = vadd.s32 %v2048_v4, %v2046_v25  ;;  %v2651_v51 = vadd.s32 %v2650_v47, %v2648_v30  ;;  %v2092_v4 = vcvt.f32.s32 %v8268_v46  ;;  %v2107_v47 = vcvt.f32.s32 %v8275_v9 }
 0x639   :  { %v2632_v18 = vpop.xlane.xlu0 %2631 }
 0x63a   :  { %2175 = vst.msk [vmem:[%s8711_s11 + $0x28] sm:$0xff] %vm2155_vm9, %v2049_v52  ;;  %v2633_v8 = vcvt.f32.s32 %v2632_v18  ;;  %4138 = vst.msk [vmem:[%s8711_s11 + $0x98] sm:$0xff] %vm2155_vm9, %v2651_v51  ;;  %v2093_v55 = vshll.u32 %v2092_v4, 16  ;;  %v2108_v46 = vshll.u32 %v2107_v47, 16  ;;  %v2694_v18 = vcvt.f32.s32 %v8282_v5 }
 0x63b   :  { %v2709_v5 = vcvt.f32.s32 %v8264_v26  ;;  %v3748_v4 = vcvt.f32.s32 %v8319_v37 }
 0x63c   :  { %v2636_v15 = vadd.s32 %v2635_v19, %v2633_v8  ;;  %v2695_v9 = vshll.u32 %v2694_v18, 16  ;;  %v2122_v8 = vcvt.f32.s32 %v8289_v59 }
 0x63d   :  { %v2060_v16 = vpop.xlane.xlu0 %2059  ;;  %v2677_v54 = vpop.xlane.xlu1 %2676  ;;  %v3749_v37 = vshll.u32 %v3748_v4, 16  ;;  %v3236_v4 = vcvt.f32.s32 %v8367_v35 }
 0x63e   :  { %4137 = vst.msk [vmem:[%s8711_s11 + $0x90] sm:$0xff] %vm2155_vm9, %v2636_v15  ;;  %v2061_v27 = vcvt.f32.s32 %v2060_v16  ;;  %v2678_v20 = vcvt.f32.s32 %v2677_v54  ;;  %v2710_v54 = vshll.u32 %v2709_v5, 16 }
 0x63f   :  { %v3237_v35 = vshll.u32 %v3236_v4, 16 }
 0x640   :  { %v2064_v7 = vadd.s32 %v2063_v60, %v2061_v27  ;;  %v2681_v36 = vadd.s32 %v2680_v34, %v2678_v20  ;;  %v2123_v60 = vshll.u32 %v2122_v8, 16  ;;  %v2137_v34 = vcvt.f32.s32 %v8271_v17 }
 0x641   :  { %v2075_v33 = vpop.xlane.xlu0 %2074  ;;  %v3778_v8 = vcvt.f32.s32 %v8339_v6 }
 0x642   :  { %2176 = vst.msk [vmem:[%s8711_s11 + $0x30] sm:$0xff] %vm2155_vm9, %v2064_v7  ;;  %v2076_v0 = vcvt.f32.s32 %v2075_v33  ;;  %4140 = vst.msk [vmem:[%s8711_s11 + $0xa8] sm:$0xff] %vm2155_vm9, %v2681_v36  ;;  %v2725_v36 = vshll.u32 %v2724_v49, 16  ;;  %v3146_v33 = vcvt.f32.s32 %v8309_v56 }
 0x643   :  { %v3779_v6 = vshll.u32 %v3778_v8, 16 }
 0x644   :  { %v2079_v22 = vadd.s32 %v2078_v1, %v2076_v0  ;;  %v2138_v0 = vshll.u32 %v2137_v34, 16  ;;  %v3147_v17 = vshll.u32 %v3146_v33, 16 }
 0x645   :  { %v2662_v39 = vpop.xlane.xlu0 %2661 }
 0x646   :  { %2177 = vst.msk [vmem:[%s8711_s11 + $0x38] sm:$0xff] %vm2155_vm9, %v2079_v22  ;;  %v2663_v41 = vcvt.f32.s32 %v2662_v39  ;;  %v2152_v22 = vcvt.f32.s32 %v8280_v10 }
 0x648   :  { %v2666_v48 = vadd.s32 %v2665_v43, %v2663_v41  ;;  %v2153_v10 = vshll.u32 %v2152_v22, 16 }
 0x649   :  { %v2090_v25 = vpop.xlane.xlu0 %2089 }
 0x64a   :  { %4139 = vst.msk [vmem:[%s8711_s11 + $0xa0] sm:$0xff] %vm2155_vm9, %v2666_v48  ;;  %v2091_v30 = vcvt.f32.s32 %v2090_v25 }
 0x64c   :  { %v2094_v52 = vadd.s32 %v2093_v55, %v2091_v30  ;;  %v2739_v55 = vcvt.f32.s32 %v8287_v32 }
 0x64d   :  { %v2105_v51 = vpop.xlane.xlu0 %2104 }
 0x64e   :  { %2178 = vst.msk [vmem:[%s8711_s11 + $0x40] sm:$0xff] %vm2155_vm9, %v2094_v52  ;;  %v2106_v19 = vcvt.f32.s32 %v2105_v51  ;;  %v3176_v52 = vcvt.f32.s32 %v8329_v21  ;;  %v2740_v32 = vshll.u32 %v2739_v55, 16 }
 0x650   :  { %v2109_v12 = vadd.s32 %v2108_v46, %v2106_v19  ;;  %v3177_v21 = vshll.u32 %v3176_v52, 16 }
 0x651   :  { %v2692_v50 = vpop.xlane.xlu0 %2691 }
 0x652   :  { %2179 = vst.msk [vmem:[%s8711_s11 + $0x48] sm:$0xff] %vm2155_vm9, %v2109_v12  ;;  %v2693_v58 = vcvt.f32.s32 %v2692_v50  ;;  %v3733_v12 = vcvt.f32.s32 %v8295_v13 }
 0x654   :  { %v2696_v15 = vadd.s32 %v2695_v9, %v2693_v58  ;;  %v3734_v13 = vshll.u32 %v3733_v12, 16  ;;  %v3266_v12 = vcvt.f32.s32 %v8387_v44 }
 0x655   :  { %v2120_v16 = vpop.xlane.xlu1 %2119 }
 0x656   :  { %4141 = vst.msk [vmem:[%s8711_s11 + $0xb0] sm:$0xff] %vm2155_vm9, %v2696_v15  ;;  %v2121_v27 = vcvt.f32.s32 %v2120_v16  ;;  %v3267_v44 = vshll.u32 %v3266_v12, 16 }
 0x658   :  { %v2124_v59 = vadd.s32 %v2123_v60, %v2121_v27  ;;  %v3161_v60 = vcvt.f32.s32 %v8305_v38 }
 0x659   :  { %v2722_v20 = vpop.xlane.xlu0 %2721  ;;  %v2707_v7 = vpop.xlane.xlu1 %2706 }
 0x65a   :  { %2180 = vst.msk [vmem:[%s8711_s11 + $0x50] sm:$0xff] %vm2155_vm9, %v2124_v59  ;;  %v2723_v26 = vcvt.f32.s32 %v2722_v20  ;;  %v2708_v63 = vcvt.f32.s32 %v2707_v7  ;;  %v3206_v59 = vcvt.f32.s32 %v8349_v42  ;;  %v3162_v38 = vshll.u32 %v3161_v60, 16 }
 0x65c   :  { %v2726_v1 = vadd.s32 %v2725_v36, %v2723_v26  ;;  %v2711_v24 = vadd.s32 %v2710_v54, %v2708_v63  ;;  %v3763_v36 = vcvt.f32.s32 %v8315_v61  ;;  %v3207_v42 = vshll.u32 %v3206_v59, 16 }
 0x65d   :  { %v3144_v39 = vpop.xlane.xlu0 %3143  ;;  %v2135_v43 = vpop.xlane.xlu1 %2134  ;;  %v3808_v63 = vcvt.f32.s32 %v8359_v40 }
 0x65e   :  { %4143 = vst.msk [vmem:[%s8711_s11 + $0xc0] sm:$0xff] %vm2155_vm9, %v2726_v1  ;;  %4142 = vst.msk [vmem:[%s8711_s11 + $0xb8] sm:$0xff] %vm2155_vm9, %v2711_v24  ;;  %v3145_v56 = vcvt.f32.s32 %v3144_v39  ;;  %v2136_v41 = vcvt.f32.s32 %v2135_v43  ;;  %v3764_v61 = vshll.u32 %v3763_v36, 16  ;;  %v3191_v39 = vcvt.f32.s32 %v8325_v2 }
 0x65f   :  { %v3809_v40 = vshll.u32 %v3808_v63, 16 }
 0x660   :  { %v3148_v48 = vadd.s32 %v3147_v17, %v3145_v56  ;;  %v2139_v25 = vadd.s32 %v2138_v0, %v2136_v41  ;;  %v3192_v2 = vshll.u32 %v3191_v39, 16 }
 0x661   :  { %v3746_v47 = vpop.xlane.xlu0 %3745  ;;  %v2150_v30 = vpop.xlane.xlu1 %2149 }
 0x662   :  { %4173 = vst.msk [vmem:[%s8711_s11 + $0xd0] sm:$0xff] %vm2155_vm9, %v3148_v48  ;;  %2181 = vst.msk [vmem:[%s8711_s11 + $0x58] sm:$0xff] %vm2155_vm9, %v2139_v25  ;;  %v3747_v51 = vcvt.f32.s32 %v3746_v47  ;;  %v2151_v46 = vcvt.f32.s32 %v2150_v30  ;;  %v3838_v30 = vcvt.f32.s32 %v8377_v31 }
 0x664   :  { %v3750_v18 = vadd.s32 %v3749_v37, %v3747_v51  ;;  %v2154_v19 = vadd.s32 %v2153_v10, %v2151_v46  ;;  %v3793_v10 = vcvt.f32.s32 %v8335_v14  ;;  %v3839_v31 = vshll.u32 %v3838_v30, 16 }
 0x665   :  { %v3174_v50 = vpop.xlane.xlu0 %3173  ;;  %v2737_v9 = vpop.xlane.xlu1 %2736 }
 0x666   :  { %4215 = vst.msk [vmem:[%s8711_s11 + $0x140] sm:$0xff] %vm2155_vm9, %v3750_v18  ;;  %v3175_v58 = vcvt.f32.s32 %v3174_v50  ;;  %v2738_v15 = vcvt.f32.s32 %v2737_v9  ;;  %v3794_v14 = vshll.u32 %v3793_v10, 16  ;;  %v3221_v18 = vcvt.f32.s32 %v8345_v57 }
 0x667   :  { %2182 = vst.msk [vmem:[%s8711_s11 + $0x60] sm:$0xf] %vm2168_vm3, %v2154_v19  ;;  %v3898_v10 = vcvt.f32.s32 %v8414_v23 }
 0x668   :  { %v3178_v5 = vadd.s32 %v3177_v21, %v3175_v58  ;;  %v2741_v16 = vadd.s32 %v2740_v32, %v2738_v15  ;;  %v3222_v57 = vshll.u32 %v3221_v18, 16  ;;  %v3823_v58 = vcvt.f32.s32 %v8357_v28 }
 0x669   :  { %v3776_v49 = vpop.xlane.xlu0 %3775  ;;  %v3731_v27 = vpop.xlane.xlu1 %3730  ;;  %v3899_v18 = vshll.u32 %v3898_v10, 16 }
 0x66a   :  { %4175 = vst.msk [vmem:[%s8711_s11 + $0xe0] sm:$0xff] %vm2155_vm9, %v3178_v5  ;;  %v3777_v54 = vcvt.f32.s32 %v3776_v49  ;;  %v3732_v34 = vcvt.f32.s32 %v3731_v27  ;;  %v3824_v28 = vshll.u32 %v3823_v58, 16 }
 0x66b   :  { %4144 = vst.msk [vmem:[%s8711_s11 + $0xc8] sm:$0xf] %vm2168_vm3, %v2741_v16  ;;  %v3868_v16 = vcvt.f32.s32 %v8395_v11 }
 0x66c   :  { %v3780_v20 = vadd.s32 %v3779_v6, %v3777_v54  ;;  %v3735_v7 = vadd.s32 %v3734_v13, %v3732_v34  ;;  %v3251_v6 = vcvt.f32.s32 %v8373_v45  ;;  %v3296_v34 = vcvt.f32.s32 %v8405_v3 }
 0x66d   :  { %v3204_v33 = vpop.xlane.xlu0 %3203  ;;  %v3159_v26 = vpop.xlane.xlu1 %3158  ;;  %v3869_v11 = vshll.u32 %v3868_v16, 16 }
 0x66e   :  { %4217 = vst.msk [vmem:[%s8711_s11 + $0x150] sm:$0xff] %vm2155_vm9, %v3780_v20  ;;  %4214 = vst.msk [vmem:[%s8711_s11 + $0x138] sm:$0xff] %vm2155_vm9, %v3735_v7  ;;  %v3205_v1 = vcvt.f32.s32 %v3204_v33  ;;  %v3160_v24 = vcvt.f32.s32 %v3159_v26  ;;  %v3252_v45 = vshll.u32 %v3251_v6, 16  ;;  %v3297_v3 = vshll.u32 %v3296_v34, 16 }
 0x670   :  { %v3208_v0 = vadd.s32 %v3207_v42, %v3205_v1  ;;  %v3163_v22 = vadd.s32 %v3162_v38, %v3160_v24  ;;  %v3853_v42 = vcvt.f32.s32 %v8385_v62  ;;  %v8909_v62 = vld [vmem:[#allocation10_spill] sm:$0xff] }
 0x671   :  { %v3806_v43 = vpop.xlane.xlu0 %3805  ;;  %v3761_v17 = vpop.xlane.xlu1 %3760 }
 0x672   :  { %4177 = vst.msk [vmem:[%s8711_s11 + $0xf0] sm:$0xff] %vm2155_vm9, %v3208_v0  ;;  %4174 = vst.msk [vmem:[%s8711_s11 + $0xd8] sm:$0xff] %vm2155_vm9, %v3163_v22  ;;  %v3807_v56 = vcvt.f32.s32 %v3806_v43  ;;  %v3762_v41 = vcvt.f32.s32 %v3761_v17  ;;  %v8908_v22 = vld [vmem:[#allocation14_spill] sm:$0xff]  ;;  %v3854_v43 = vshll.u32 %v3853_v42, 16  ;;  %v3326_v17 = vcvt.f32.s32 %v8909_v62 }
 0x674   :  { %v3810_v48 = vadd.s32 %v3809_v40, %v3807_v56  ;;  %v3765_v25 = vadd.s32 %v3764_v61, %v3762_v41  ;;  %v3281_v61 = vcvt.f32.s32 %v8908_v22  ;;  %v8910_v41 = vld [vmem:[#allocation15_spill] sm:$0xff] }
 0x675   :  { %v3234_v55 = vpop.xlane.xlu0 %3233  ;;  %v3189_v47 = vpop.xlane.xlu1 %3188 }
 0x676   :  { %4219 = vst.msk [vmem:[%s8711_s11 + $0x160] sm:$0xff] %vm2155_vm9, %v3810_v48  ;;  %4216 = vst.msk [vmem:[%s8711_s11 + $0x148] sm:$0xff] %vm2155_vm9, %v3765_v25  ;;  %v3235_v37 = vcvt.f32.s32 %v3234_v55  ;;  %v3190_v52 = vcvt.f32.s32 %v3189_v47  ;;  %v3282_v56 = vshll.u32 %v3281_v61, 16  ;;  %v3883_v48 = vcvt.f32.s32 %v8910_v41 }
 0x677   :  { %v3327_v55 = vshll.u32 %v3326_v17, 16 }
 0x678   :  { %v3238_v51 = vadd.s32 %v3237_v35, %v3235_v37  ;;  %v3193_v46 = vadd.s32 %v3192_v2, %v3190_v52  ;;  %v3884_v52 = vshll.u32 %v3883_v48, 16 }
 0x679   :  { %v3836_v19 = vpop.xlane.xlu0 %3835  ;;  %v3791_v32 = vpop.xlane.xlu1 %3790 }
 0x67a   :  { %4179 = vst.msk [vmem:[%s8711_s11 + $0x100] sm:$0xff] %vm2155_vm9, %v3238_v51  ;;  %4176 = vst.msk [vmem:[%s8711_s11 + $0xe8] sm:$0xff] %vm2155_vm9, %v3193_v46  ;;  %v3837_v50 = vcvt.f32.s32 %v3836_v19  ;;  %v3792_v9 = vcvt.f32.s32 %v3791_v32 }
 0x67c   :  { %v3840_v21 = vadd.s32 %v3839_v31, %v3837_v50  ;;  %v3795_v8 = vadd.s32 %v3794_v14, %v3792_v9  ;;  %v3311_v14 = vcvt.f32.s32 %v8426_v29  ;;  %v3913_v9 = vcvt.f32.s32 %v8435_v53 }
 0x67d   :  { %v3264_v15 = vpop.xlane.xlu0 %3263  ;;  %v3219_v5 = vpop.xlane.xlu1 %3218 }
 0x67e   :  { %4221 = vst.msk [vmem:[%s8711_s11 + $0x170] sm:$0xff] %vm2155_vm9, %v3840_v21  ;;  %4218 = vst.msk [vmem:[%s8711_s11 + $0x158] sm:$0xff] %vm2155_vm9, %v3795_v8  ;;  %v3265_v13 = vcvt.f32.s32 %v3264_v15  ;;  %v3220_v60 = vcvt.f32.s32 %v3219_v5  ;;  %v3312_v50 = vshll.u32 %v3311_v14, 16 }
 0x680   :  { %v3268_v49 = vadd.s32 %v3267_v44, %v3265_v13  ;;  %v3223_v27 = vadd.s32 %v3222_v57, %v3220_v60  ;;  %v3914_v57 = vshll.u32 %v3913_v9, 16 }
 0x681   :  { %v3866_v59 = vpop.xlane.xlu0 %3865  ;;  %v3821_v54 = vpop.xlane.xlu1 %3820 }
 0x682   :  { %4181 = vst.msk [vmem:[%s8711_s11 + $0x110] sm:$0xff] %vm2155_vm9, %v3268_v49  ;;  %4178 = vst.msk [vmem:[%s8711_s11 + $0xf8] sm:$0xff] %vm2155_vm9, %v3223_v27  ;;  %v3867_v20 = vcvt.f32.s32 %v3866_v59  ;;  %v3822_v7 = vcvt.f32.s32 %v3821_v54 }
 0x684   :  { %v3870_v38 = vadd.s32 %v3869_v11, %v3867_v20  ;;  %v3825_v36 = vadd.s32 %v3824_v28, %v3822_v7 }
 0x685   :  { %v3294_v33 = vpop.xlane.xlu0 %3293  ;;  %v3249_v26 = vpop.xlane.xlu1 %3248 }
 0x686   :  { %4223 = vst.msk [vmem:[%s8711_s11 + $0x180] sm:$0xff] %vm2155_vm9, %v3870_v38  ;;  %4220 = vst.msk [vmem:[%s8711_s11 + $0x168] sm:$0xff] %vm2155_vm9, %v3825_v36  ;;  %v3295_v63 = vcvt.f32.s32 %v3294_v33  ;;  %v3250_v1 = vcvt.f32.s32 %v3249_v26 }
 0x688   :  { %v3298_v24 = vadd.s32 %v3297_v3, %v3295_v63  ;;  %v3253_v0 = vadd.s32 %v3252_v45, %v3250_v1 }
 0x689   :  { %v3851_v39 = vpop.xlane.xlu1 %3850 }
 0x68a   :  { %4183 = vst.msk [vmem:[%s8711_s11 + $0x120] sm:$0xff] %vm2155_vm9, %v3298_v24  ;;  %4180 = vst.msk [vmem:[%s8711_s11 + $0x108] sm:$0xff] %vm2155_vm9, %v3253_v0  ;;  %v3852_v40 = vcvt.f32.s32 %v3851_v39 }
 0x68c   :  { %v3855_v4 = vadd.s32 %v3854_v43, %v3852_v40 }
 0x68d   :  { %v3324_v25 = vpop.xlane.xlu0 %3323  ;;  %v3279_v2 = vpop.xlane.xlu1 %3278 }
 0x68e   :  { %4222 = vst.msk [vmem:[%s8711_s11 + $0x178] sm:$0xff] %vm2155_vm9, %v3855_v4  ;;  %v3325_v47 = vcvt.f32.s32 %v3324_v25  ;;  %v3280_v35 = vcvt.f32.s32 %v3279_v2 }
 0x690   :  { %v3328_v30 = vadd.s32 %v3327_v55, %v3325_v47  ;;  %v3283_v37 = vadd.s32 %v3282_v56, %v3280_v35 }
 0x691   :  { %v3896_v51 = vpop.xlane.xlu0 %3895  ;;  %v3881_v46 = vpop.xlane.xlu1 %3880 }
 0x692   :  { %4185 = vst.msk [vmem:[%s8711_s11 + $0x130] sm:$0xf] %vm2168_vm3, %v3328_v30  ;;  %v3897_v23 = vcvt.f32.s32 %v3896_v51  ;;  %v3882_v19 = vcvt.f32.s32 %v3881_v46 }
 0x693   :  { %4182 = vst.msk [vmem:[%s8711_s11 + $0x118] sm:$0xff] %vm2155_vm9, %v3283_v37 }
 0x694   :  { %v3900_v32 = vadd.s32 %v3899_v18, %v3897_v23  ;;  %v3885_v31 = vadd.s32 %v3884_v52, %v3882_v19 }
 0x695   :  { %v3309_v12 = vpop.xlane.xlu1 %3308 }
 0x696   :  { %4225 = vst.msk [vmem:[%s8711_s11 + $0x190] sm:$0xff] %vm2155_vm9, %v3900_v32  ;;  %4224 = vst.msk [vmem:[%s8711_s11 + $0x188] sm:$0xff] %vm2155_vm9, %v3885_v31  ;;  %v3310_v29 = vcvt.f32.s32 %v3309_v12 }
 0x698   :  { %v3313_v21 = vadd.s32 %v3312_v50, %v3310_v29 }
 0x699   :  { %v3911_v8 = vpop.xlane.xlu1 %3910 }
 0x69a   :  { %4184 = vst.msk [vmem:[%s8711_s11 + $0x128] sm:$0xff] %vm2155_vm9, %v3313_v21  ;;  %v3912_v53 = vcvt.f32.s32 %v3911_v8 }
 0x69c   :  { %v3915_v58 = vadd.s32 %v3914_v57, %v3912_v53 }
 0x69e   :  { %4226 = vst.msk [vmem:[%s8711_s11 + $0x198] sm:$0xf] %vm2168_vm3, %v3915_v58 }
 0x69f   :  { %3956 = vsyncpa [#allocation3], 1 }
 0x6a0   :  { %3957 = vsyncpa [#allocation5], 1 }

</bundles_post_ra>
